<compile_context>
chip_gen: v6e
topology: v6e:2x2x1
jax: 0.10.0
libtpu: 0.0.40
codegen_flags: <defaults>
</compile_context>

<pallas_src>
import functools

import jax
import jax.numpy as jnp
from jax import lax
from jax.experimental import pallas as pl
from jax.experimental.pallas import tpu as pltpu


def _round_up(x, m):
    return ((x + m - 1) // m) * m


def _largest_divisor_leq(n, cap):
    cap = max(1, min(cap, n))
    for d in range(cap, 0, -1):
        if n % d == 0:
            return d
    return 1


def _parallel(n):
    return pltpu.CompilerParams(dimension_semantics=("parallel",) * n)


# ---------------------------------------------------------------------------
# Pallas kernels
# ---------------------------------------------------------------------------
def _conv1_pad_kernel(x_ref, w1_ref, b1_ref, o_ref):
    # conv1 (1x1) + BN1 + ReLU for a block of TR rows; writes a width-padded row block
    # (zero columns at 0 and W+1) so conv2 never needs an XLA pad pass on out1.
    tr, w, cin = x_ref.shape
    planes = w1_ref.shape[1]
    a = x_ref[...].reshape(tr * w, cin)
    y = jnp.dot(a, w1_ref[...], preferred_element_type=jnp.float32) + b1_ref[...]
    y = jnp.maximum(y, 0.0).astype(o_ref.dtype).reshape(tr, w, planes)
    z = jnp.zeros((tr, 1, planes), o_ref.dtype)
    o_ref[:, 0:1, :] = z
    o_ref[:, 1:1 + w, :] = y
    o_ref[:, 1 + w:2 + w, :] = z


def _conv1_pad_dual_kernel(x_ref, w1_ref, b1_ref, wd_ref, bd_ref, o_ref, r_ref):
    # Same as above, plus the 1x1 downsample (+BN, no ReLU) sharing the activation tile.
    # Residual is emitted in bf16 (flat (M, 4*planes)) to halve its HBM traffic.
    tr, w, cin = x_ref.shape
    planes = w1_ref.shape[1]
    a = x_ref[...].reshape(tr * w, cin)
    y = jnp.dot(a, w1_ref[...], preferred_element_type=jnp.float32) + b1_ref[...]
    y = jnp.maximum(y, 0.0).astype(o_ref.dtype).reshape(tr, w, planes)
    z = jnp.zeros((tr, 1, planes), o_ref.dtype)
    o_ref[:, 0:1, :] = z
    o_ref[:, 1:1 + w, :] = y
    o_ref[:, 1 + w:2 + w, :] = z
    rd = jnp.dot(a, wd_ref[...], preferred_element_type=jnp.float32) + bd_ref[...]
    r_ref[...] = rd.astype(r_ref.dtype)


def _conv2_conv3_res_kernel(top_ref, mid_ref, bot_ref, w2_ref, b2_ref,
                            w3_ref, b3_ref, res_ref, o_ref, *, stride, tr, wo):
    # Fused: 3x3 conv (+BN2+ReLU) -> 1x1 conv3 (+BN3+ReLU) -> +residual -> ReLU.
    # Input rows arrive as a TR-row mid block plus clamped single-row top/bottom halos
    # that are zero-masked at the image borders (replaces explicit H padding).
    hb = pl.program_id(1)
    planes = mid_ref.shape[-1]

    top = top_ref[...]
    top = jnp.where(hb > 0, top, jnp.zeros_like(top))
    pieces = [top, mid_ref[...]]
    if stride == 1:
        bot = bot_ref[...]
        bot = jnp.where(hb < pl.num_programs(1) - 1, bot, jnp.zeros_like(bot))
        pieces.append(bot)
    window = jnp.concatenate(pieces, axis=0)          # (stride*(tr-1)+3, W+2, planes)

    span_h = stride * (tr - 1) + 1
    span_w = stride * (wo - 1) + 1
    taps = []
    for di in range(3):
        for dj in range(3):
            if stride == 1:
                taps.append(window[di:di + tr, dj:dj + wo, :])
            else:
                # stride>1 keeps an in-register strided slice (secondary path).
                taps.append(window[di:di + span_h:stride, dj:dj + span_w:stride, :])
    # K-stacked 3x3: one (TR*Wo, 9*planes) @ (9*planes, planes) MXU matmul.
    patch = jnp.concatenate(taps, axis=-1).reshape(tr * wo, 9 * planes)

    y2 = jnp.dot(patch, w2_ref[...], preferred_element_type=jnp.float32) + b2_ref[...]
    y2 = jnp.maximum(y2, 0.0).astype(jnp.bfloat16)
    y3 = jnp.dot(y2, w3_ref[...], preferred_element_type=jnp.float32) + b3_ref[...]
    y3 = jnp.maximum(y3, 0.0)                         # bn3's ReLU precedes the add
    out = jnp.maximum(y3 + res_ref[...].astype(jnp.float32), 0.0)
    o_ref[...] = out.astype(o_ref.dtype)


def _mm_bias_kernel(a_ref, w_ref, b_ref, o_ref, *, relu):
    y = jnp.dot(a_ref[...], w_ref[...], preferred_element_type=jnp.float32) + b_ref[...]
    if relu:
        y = jnp.maximum(y, 0.0)
    o_ref[...] = y.astype(o_ref.dtype)


# ---------------------------------------------------------------------------
# Wrappers
# ---------------------------------------------------------------------------
def _conv1_wpad(x_bf, w1, b1, wd=None, bd=None):
    """conv1 (1x1+BN+ReLU) producing a width-padded (N, H, W+2, planes) bf16 buffer.
    When wd/bd are given (stride-1 downsample) also emits the flat bf16 residual."""
    n, h, w, cin = x_bf.shape
    planes = w1.shape[1]
    tr = _largest_divisor_leq(h, max(1, 512 // w))    # big M per step (mem-bound 1x1)
    nhb = h // tr
    grid = (n, nhb)

    x_spec = pl.BlockSpec((pl.Squeezed(), tr, w, cin), lambda ni, hi: (ni, hi, 0, 0))
    w1_spec = pl.BlockSpec((cin, planes), lambda ni, hi: (0, 0))
    b1_spec = pl.BlockSpec((1, planes), lambda ni, hi: (0, 0))
    o_spec = pl.BlockSpec((pl.Squeezed(), tr, w + 2, planes),
                          lambda ni, hi: (ni, hi, 0, 0))
    o_shape = jax.ShapeDtypeStruct((n, h, w + 2, planes), jnp.bfloat16)

    if wd is None:
        out1p = pl.pallas_call(
            _conv1_pad_kernel, out_shape=o_shape, grid=grid,
            in_specs=[x_spec, w1_spec, b1_spec], out_specs=o_spec,
            compiler_params=_parallel(2),
        )(x_bf, w1, b1)
        return out1p, None

    cd = wd.shape[1]
    r_spec = pl.BlockSpec((tr * w, cd), lambda ni, hi: (ni * nhb + hi, 0))
    out1p, res = pl.pallas_call(
        _conv1_pad_dual_kernel,
        out_shape=(o_shape, jax.ShapeDtypeStruct((n * h * w, cd), jnp.bfloat16)),
        grid=grid,
        in_specs=[x_spec, w1_spec, b1_spec,
                  pl.BlockSpec((cin, cd), lambda ni, hi: (0, 0)),
                  pl.BlockSpec((1, cd), lambda ni, hi: (0, 0))],
        out_specs=[o_spec, r_spec],
        compiler_params=_parallel(2),
    )(x_bf, w1, b1, wd, bd)
    return out1p, res


def _conv2_conv3_res(out1p, w2, b2, w3, b3, res_flat, *, stride):
    """Fused conv2(3x3,stride)+BN2+ReLU -> conv3(1x1)+BN3+ReLU -> +res -> ReLU.
    out1p: (N, H, W+2, planes) bf16 (width-padded); res_flat: (N*Ho*Wo, 4p) bf16.
    Returns flat (N*Ho*Wo, 4p) f32."""
    n, h, wpad, planes = out1p.shape
    w_in = wpad - 2
    ho = (h - 1) // stride + 1
    wo = (w_in - 1) // stride + 1
    cout = w3.shape[1]
    if stride > 1:
        assert stride * ho <= h, "fused conv2 path requires stride*Ho <= H"
    tr = _largest_divisor_leq(ho, max(1, 256 // wo))  # TR rows per step, M = TR*Wo
    nhb = ho // tr
    grid = (n, nhb)

    def top_map(ni, hi):
        return (ni, jnp.maximum(hi * tr * stride - 1, 0), 0, 0)

    def mid_map(ni, hi):
        return (ni, hi, 0, 0)

    def bot_map(ni, hi):
        return (ni, jnp.minimum(hi * tr * stride + tr * stride, h - 1), 0, 0)

    def halo_spec(imap):
        return pl.BlockSpec((pl.Squeezed(), 1, wpad, planes), imap)

    in_specs = [
        halo_spec(top_map),
        pl.BlockSpec((pl.Squeezed(), stride * tr, wpad, planes), mid_map),
        halo_spec(bot_map),
        pl.BlockSpec((9 * planes, planes), lambda ni, hi: (0, 0)),
        pl.BlockSpec((1, planes), lambda ni, hi: (0, 0)),
        pl.BlockSpec((planes, cout), lambda ni, hi: (0, 0)),
        pl.BlockSpec((1, cout), lambda ni, hi: (0, 0)),
        pl.BlockSpec((tr * wo, cout), lambda ni, hi: (ni * nhb + hi, 0)),
    ]
    out_spec = pl.BlockSpec((tr * wo, cout), lambda ni, hi: (ni * nhb + hi, 0))

    m = n * ho * wo
    flops = 2 * m * (9 * planes * planes + planes * cout)
    bytes_acc = (out1p.size * 2 + res_flat.size * 2 + m * cout * 4
                 + (9 * planes * planes + planes * cout) * 2)

    return pl.pallas_call(
        functools.partial(_conv2_conv3_res_kernel, stride=stride, tr=tr, wo=wo),
        out_shape=jax.ShapeDtypeStruct((m, cout), jnp.float32),
        grid=grid, in_specs=in_specs, out_specs=out_spec,
        compiler_params=_parallel(2),
        cost_estimate=pl.CostEstimate(flops=flops, transcendentals=0,
                                      bytes_accessed=bytes_acc),
    )(out1p, out1p, out1p, w2, b2, w3, b3, res_flat)


def _conv1x1(a, w, b, *, relu, out_dtype):
    """Generic pointwise conv as a tiled matmul (used for the strided downsample)."""
    m, k = a.shape
    cout = w.shape[1]
    tm = min(512, _round_up(m, 8))
    mp = _round_up(m, tm)
    if mp != m:
        a = jnp.pad(a, ((0, mp - m), (0, 0)))
    if cout <= 256:
        tn = cout
    elif cout % 256 == 0:
        tn = 256
    elif cout % 128 == 0:
        tn = 128
    else:
        tn = cout
    grid = (mp // tm, cout // tn)
    out = pl.pallas_call(
        functools.partial(_mm_bias_kernel, relu=relu),
        out_shape=jax.ShapeDtypeStruct((mp, cout), out_dtype),
        grid=grid,
        in_specs=[pl.BlockSpec((tm, k), lambda i, j: (i, 0)),
                  pl.BlockSpec((k, tn), lambda i, j: (0, j)),
                  pl.BlockSpec((1, tn), lambda i, j: (0, j))],
        out_specs=pl.BlockSpec((tm, tn), lambda i, j: (i, j)),
        compiler_params=_parallel(2),
    )(a, w, b)
    return out[:m]


# ---------------------------------------------------------------------------
# Bottleneck forward (NCHW in / NCHW out; NHWC + bf16 inside the kernels)
# ---------------------------------------------------------------------------
def bottleneck_forward(x_nchw, kp, *, stride=1):
    x = jnp.transpose(x_nchw, (0, 2, 3, 1))                    # NHWC
    n, h, w, cin = x.shape
    planes = kp["w1"].shape[-1]
    cout = kp["w3"].shape[-1]
    has_ds = "wd" in kp
    x_bf = x.astype(jnp.bfloat16)

    w1 = kp["w1"].reshape(cin, planes)
    w2 = kp["w2"].reshape(9 * planes, planes)                  # HWIO -> (9*Cin, Cout)
    w3 = kp["w3"].reshape(planes, cout)

    # conv1 + bn1 + ReLU (width-padded output for conv2); downsample fused when stride==1
    if has_ds and stride == 1:
        out1p, res_flat = _conv1_wpad(x_bf, w1, kp["b1"],
                                      kp["wd"].reshape(cin, cout), kp["bd"])
    else:
        out1p, _ = _conv1_wpad(x_bf, w1, kp["b1"])
        if has_ds:
            xs = x_bf[:, ::stride, ::stride, :]
            res_flat = _conv1x1(xs.reshape(-1, cin), kp["wd"].reshape(cin, cout),
                                kp["bd"], relu=False, out_dtype=jnp.bfloat16)
        else:
            assert stride == 1 and cin == cout, "identity residual needs matching shapes"
            res_flat = x_bf.reshape(n * h * w, cin)

    ho = (h - 1) // stride + 1
    wo = (w - 1) // stride + 1
    out_flat = _conv2_conv3_res(out1p, w2, kp["b2"], w3, kp["b3"], res_flat,
                                stride=stride)
    # Final NHWC->NCHW layout change kept in XLA (one pass over the output).
    return jnp.transpose(out_flat.reshape(n, ho, wo, cout), (0, 3, 1, 2))


# ---------------------------------------------------------------------------
# Parameters (synthetic, deterministic) + BN folding + plain-JAX reference
# ---------------------------------------------------------------------------
# TODO(synk): nn.BatchNorm2d training-mode statistic updates are not implemented;
# BN is folded into the conv weights/bias (inference mode).
def _fold_bn(w, gamma, beta, mean, var, eps=1e-5):
    scale = gamma / jnp.sqrt(var + eps)
    return w * scale, (beta - mean * scale).reshape(1, -1)


def _conv_init(key, kh, kw, cin, cout):
    std = (2.0 / (kh * kw * cin)) ** 0.5
    return std * jax.random.normal(key, (kh, kw, cin, cout), dtype=jnp.float32)


def _bn_init(key, c):
    k1, k2, k3, k4 = jax.random.split(key, 4)
    gamma = 1.0 + 0.1 * jax.random.normal(k1, (c,), jnp.float32)
    beta = 0.1 * jax.random.normal(k2, (c,), jnp.float32)
    mean = 0.1 * jax.random.normal(k3, (c,), jnp.float32)
    var = 1.0 + 0.1 * jnp.abs(jax.random.normal(k4, (c,), jnp.float32))
    return gamma, beta, mean, var


def make_params(key, inplanes, planes, stride):
    cout = planes * 4
    ks = jax.random.split(key, 8)
    p = {}
    p["w1"], p["b1"] = _fold_bn(_conv_init(ks[0], 1, 1, inplanes, planes), *_bn_init(ks[1], planes))
    p["w2"], p["b2"] = _fold_bn(_conv_init(ks[2], 3, 3, planes, planes), *_bn_init(ks[3], planes))
    p["w3"], p["b3"] = _fold_bn(_conv_init(ks[4], 1, 1, planes, cout), *_bn_init(ks[5], cout))
    if stride != 1 or inplanes != cout:
        p["wd"], p["bd"] = _fold_bn(_conv_init(ks[6], 1, 1, inplanes, cout), *_bn_init(ks[7], cout))
    return p                                    # f32, BN already folded


def to_kernel_params(p_f32):
    return {k: (v.astype(jnp.bfloat16) if k.startswith("w") else v) for k, v in p_f32.items()}


def ref_bottleneck(x_nhwc, p, stride):
    def conv(x, w, s, pad):
        return lax.conv_general_dilated(x, w, (s, s), ((pad, pad), (pad, pad)),
                                        dimension_numbers=("NHWC", "HWIO", "NHWC"))
    relu = lambda t: jnp.maximum(t, 0.0)
    o = relu(conv(x_nhwc, p["w1"], 1, 0) + p["b1"])
    o = relu(conv(o, p["w2"], stride, 1) + p["b2"])
    o = relu(conv(o, p["w3"], 1, 0) + p["b3"])          # bn3's ReLU precedes the add
    r = conv(x_nhwc, p["wd"], stride, 0) + p["bd"] if "wd" in p else x_nhwc
    return relu(o + r)


if __name__ == "__main__":
    key = jax.random.PRNGKey(0)
    kx, kparam = jax.random.split(key)

    # Small canonical Bottleneck: inplanes=64, planes=64 (-> 256 out), stride=1,
    # with the standard 1x1-conv + BN downsample on the residual path.
    N, INPLANES, H, W = 2, 64, 16, 16
    PLANES, STRIDE = 64, 1

    x = jax.random.normal(kx, (N, INPLANES, H, W), dtype=jnp.float32)
    p_f32 = make_params(kparam, INPLANES, PLANES, STRIDE)
    p_bf16 = to_kernel_params(p_f32)

    fwd = jax.jit(functools.partial(bottleneck_forward, stride=STRIDE))
    out = jax.block_until_ready(fwd(x, p_bf16))

    ho = (H - 1) // STRIDE + 1
    assert out.shape == (N, 4 * PLANES, ho, ho), out.shape
    assert bool(jnp.all(jnp.isfinite(out)))

    # Sanity-check against a plain-JAX f32 reference (loose tol: bf16 operands/residual).
    ref = jnp.transpose(ref_bottleneck(jnp.transpose(x, (0, 2, 3, 1)), p_f32, STRIDE),
                        (0, 3, 1, 2))
    err = float(jnp.max(jnp.abs(out - ref) / (jnp.abs(ref) + 1.0)))
    assert err < 0.2, f"mismatch vs reference: {err}"
    print("KERNEL_OK")
</pallas_src>

<mosaic_0001>
module attributes {stable_mosaic.version = 11 : i64} {
  func.func @_conv1_pad_dual_kernel(%arg0: i32, %arg1: i32, %arg2: memref<1x16x16x64xbf16, #tpu.memory_space<vmem>>, %arg3: memref<64x64xbf16, #tpu.memory_space<vmem>>, %arg4: memref<1x64xf32, #tpu.memory_space<vmem>>, %arg5: memref<64x256xbf16, #tpu.memory_space<vmem>>, %arg6: memref<1x256xf32, #tpu.memory_space<vmem>>, %arg7: memref<1x16x18x64xbf16, #tpu.memory_space<vmem>>, %arg8: memref<256x256xbf16, #tpu.memory_space<vmem>>) attributes {dimension_semantics = [#tpu.dimension_semantics<parallel>, #tpu.dimension_semantics<parallel>], iteration_bounds = array<i64: 2, 1>, scalar_prefetch = 0 : i64, scratch_operands = 0 : i64, tpu.core_type = #tpu.core_type<tc>, window_params = [{transform_indices = @transform_0, window_bounds = array<i64: 1, 16, 16, 64>}, {pipeline_mode = #tpu.pipeline_mode<synchronous>, transform_indices = @transform_1, window_bounds = array<i64: 64, 64>}, {pipeline_mode = #tpu.pipeline_mode<synchronous>, transform_indices = @transform_2, window_bounds = array<i64: 1, 64>}, {pipeline_mode = #tpu.pipeline_mode<synchronous>, transform_indices = @transform_3, window_bounds = array<i64: 64, 256>}, {pipeline_mode = #tpu.pipeline_mode<synchronous>, transform_indices = @transform_4, window_bounds = array<i64: 1, 256>}, {transform_indices = @transform_5, window_bounds = array<i64: 1, 16, 18, 64>}, {transform_indices = @transform_6, window_bounds = array<i64: 256, 256>}]} {
    %c0 = arith.constant 0 : index
    %c0_0 = arith.constant 0 : index
    %c0_1 = arith.constant 0 : index
    %c0_2 = arith.constant 0 : index
    %0 = vector.load %arg2[%c0, %c0_0, %c0_1, %c0_2] : memref<1x16x16x64xbf16, #tpu.memory_space<vmem>>, vector<1x16x16x64xbf16>
    %1 = vector.shape_cast %0 : vector<1x16x16x64xbf16> to vector<16x16x64xbf16>
    %2 = vector.shape_cast %1 : vector<16x16x64xbf16> to vector<256x64xbf16>
    %c0_3 = arith.constant 0 : index
    %c0_4 = arith.constant 0 : index
    %3 = vector.load %arg3[%c0_3, %c0_4] : memref<64x64xbf16, #tpu.memory_space<vmem>>, vector<64x64xbf16>
    %cst = arith.constant dense<0.000000e+00> : vector<256x64xf32>
    %4 = tpu.matmul %2, %3, %cst {dimension_numbers = #tpu.dot_dimension_numbers<[1], [0], [0], [1], [0, 0, 1, 1], [], []>} : vector<256x64xbf16>, vector<64x64xbf16>, vector<256x64xf32> -> vector<256x64xf32>
    %c0_5 = arith.constant 0 : index
    %c0_6 = arith.constant 0 : index
    %5 = vector.load %arg4[%c0_5, %c0_6] : memref<1x64xf32, #tpu.memory_space<vmem>>, vector<1x64xf32>
    %6 = vector.broadcast %5 : vector<1x64xf32> to vector<256x64xf32>
    %7 = arith.addf %4, %6 : vector<256x64xf32>
    %cst_7 = arith.constant 0.000000e+00 : f32
    %8 = vector.broadcast %cst_7 : f32 to vector<256x64xf32>
    %9 = arith.maximumf %7, %8 : vector<256x64xf32>
    %10 = arith.truncf %9 : vector<256x64xf32> to vector<256x64xbf16>
    %11 = vector.shape_cast %10 : vector<256x64xbf16> to vector<16x16x64xbf16>
    %cst_8 = arith.constant 0.000000e+00 : bf16
    %12 = vector.broadcast %cst_8 : bf16 to vector<16x1x64xbf16>
    %c0_9 = arith.constant 0 : index
    %c0_10 = arith.constant 0 : index
    %c0_11 = arith.constant 0 : index
    %c0_12 = arith.constant 0 : index
    %13 = vector.load %arg7[%c0_9, %c0_10, %c0_11, %c0_12] : memref<1x16x18x64xbf16, #tpu.memory_space<vmem>>, vector<1x16x1x64xbf16>
    %14 = vector.shape_cast %13 : vector<1x16x1x64xbf16> to vector<16x1x64xbf16>
    %15 = vector.shape_cast %12 : vector<16x1x64xbf16> to vector<1x16x1x64xbf16>
    tpu.vector_store %arg7[%c0_9, %c0_10, %c0_11, %c0_12], %15 {strides = array<i32>} : memref<1x16x18x64xbf16, #tpu.memory_space<vmem>>, vector<1x16x1x64xbf16>,
    %c0_13 = arith.constant 0 : index
    %c0_14 = arith.constant 0 : index
    %c1 = arith.constant 1 : index
    %c0_15 = arith.constant 0 : index
    %16 = vector.load %arg7[%c0_13, %c0_14, %c1, %c0_15] : memref<1x16x18x64xbf16, #tpu.memory_space<vmem>>, vector<1x16x16x64xbf16>
    %17 = vector.shape_cast %16 : vector<1x16x16x64xbf16> to vector<16x16x64xbf16>
    %18 = vector.shape_cast %11 : vector<16x16x64xbf16> to vector<1x16x16x64xbf16>
    tpu.vector_store %arg7[%c0_13, %c0_14, %c1, %c0_15], %18 {strides = array<i32>} : memref<1x16x18x64xbf16, #tpu.memory_space<vmem>>, vector<1x16x16x64xbf16>,
    %c0_16 = arith.constant 0 : index
    %c0_17 = arith.constant 0 : index
    %c17 = arith.constant 17 : index
    %c0_18 = arith.constant 0 : index
    %19 = vector.load %arg7[%c0_16, %c0_17, %c17, %c0_18] : memref<1x16x18x64xbf16, #tpu.memory_space<vmem>>, vector<1x16x1x64xbf16>
    %20 = vector.shape_cast %19 : vector<1x16x1x64xbf16> to vector<16x1x64xbf16>
    %21 = vector.shape_cast %12 : vector<16x1x64xbf16> to vector<1x16x1x64xbf16>
    tpu.vector_store %arg7[%c0_16, %c0_17, %c17, %c0_18], %21 {strides = array<i32>} : memref<1x16x18x64xbf16, #tpu.memory_space<vmem>>, vector<1x16x1x64xbf16>,
    %c0_19 = arith.constant 0 : index
    %c0_20 = arith.constant 0 : index
    %22 = vector.load %arg5[%c0_19, %c0_20] : memref<64x256xbf16, #tpu.memory_space<vmem>>, vector<64x256xbf16>
    %cst_21 = arith.constant dense<0.000000e+00> : vector<256x256xf32>
    %23 = tpu.matmul %2, %22, %cst_21 {dimension_numbers = #tpu.dot_dimension_numbers<[1], [0], [0], [1], [0, 0, 1, 1], [], []>} : vector<256x64xbf16>, vector<64x256xbf16>, vector<256x256xf32> -> vector<256x256xf32>
    %c0_22 = arith.constant 0 : index
    %c0_23 = arith.constant 0 : index
    %24 = vector.load %arg6[%c0_22, %c0_23] : memref<1x256xf32, #tpu.memory_space<vmem>>, vector<1x256xf32>
    %25 = vector.broadcast %24 : vector<1x256xf32> to vector<256x256xf32>
    %26 = arith.addf %23, %25 : vector<256x256xf32>
    %27 = arith.truncf %26 : vector<256x256xf32> to vector<256x256xbf16>
    %c0_24 = arith.constant 0 : index
    %c0_25 = arith.constant 0 : index
    %28 = vector.load %arg8[%c0_24, %c0_25] : memref<256x256xbf16, #tpu.memory_space<vmem>>, vector<256x256xbf16>
    tpu.vector_store %arg8[%c0_24, %c0_25], %27 {strides = array<i32>} : memref<256x256xbf16, #tpu.memory_space<vmem>>, vector<256x256xbf16>,
    return
  }
  func.func @transform_0(%arg0: i32, %arg1: i32) -> (i32, i32, i32, i32) {
    %c0_i32 = arith.constant 0 : i32
    %c0_i32_0 = arith.constant 0 : i32
    %c0_i32_1 = arith.constant 0 : i32
    return %arg0, %arg1, %c0_i32, %c0_i32_0 : i32, i32, i32, i32
  }
  func.func @transform_1(%arg0: i32, %arg1: i32) -> (i32, i32) {
    %c0_i32 = arith.constant 0 : i32
    %c0_i32_0 = arith.constant 0 : i32
    %c0_i32_1 = arith.constant 0 : i32
    return %c0_i32, %c0_i32_0 : i32, i32
  }
  func.func @transform_2(%arg0: i32, %arg1: i32) -> (i32, i32) {
    %c0_i32 = arith.constant 0 : i32
    %c0_i32_0 = arith.constant 0 : i32
    %c0_i32_1 = arith.constant 0 : i32
    return %c0_i32, %c0_i32_0 : i32, i32
  }
  func.func @transform_3(%arg0: i32, %arg1: i32) -> (i32, i32) {
    %c0_i32 = arith.constant 0 : i32
    %c0_i32_0 = arith.constant 0 : i32
    %c0_i32_1 = arith.constant 0 : i32
    return %c0_i32, %c0_i32_0 : i32, i32
  }
  func.func @transform_4(%arg0: i32, %arg1: i32) -> (i32, i32) {
    %c0_i32 = arith.constant 0 : i32
    %c0_i32_0 = arith.constant 0 : i32
    %c0_i32_1 = arith.constant 0 : i32
    return %c0_i32, %c0_i32_0 : i32, i32
  }
  func.func @transform_5(%arg0: i32, %arg1: i32) -> (i32, i32, i32, i32) {
    %c0_i32 = arith.constant 0 : i32
    %c0_i32_0 = arith.constant 0 : i32
    %c0_i32_1 = arith.constant 0 : i32
    return %arg0, %arg1, %c0_i32, %c0_i32_0 : i32, i32, i32, i32
  }
  func.func @transform_6(%arg0: i32, %arg1: i32) -> (i32, i32) {
    %c1_i32 = arith.constant 1 : i32
    %0 = arith.muli %arg0, %c1_i32 : i32
    %1 = arith.addi %0, %arg1 : i32
    %c0_i32 = arith.constant 0 : i32
    %c0_i32_0 = arith.constant 0 : i32
    return %1, %c0_i32 : i32, i32
  }
}

module attributes {stable_mosaic.version = 11 : i64} {
  func.func @_conv2_conv3_res_kernel(%arg0: i32, %arg1: i32, %arg2: memref<1x1x18x64xbf16, #tpu.memory_space<vmem>>, %arg3: memref<1x16x18x64xbf16, #tpu.memory_space<vmem>>, %arg4: memref<1x1x18x64xbf16, #tpu.memory_space<vmem>>, %arg5: memref<576x64xbf16, #tpu.memory_space<vmem>>, %arg6: memref<1x64xf32, #tpu.memory_space<vmem>>, %arg7: memref<64x256xbf16, #tpu.memory_space<vmem>>, %arg8: memref<1x256xf32, #tpu.memory_space<vmem>>, %arg9: memref<256x256xbf16, #tpu.memory_space<vmem>>, %arg10: memref<256x256xf32, #tpu.memory_space<vmem>>) attributes {dimension_semantics = [#tpu.dimension_semantics<parallel>, #tpu.dimension_semantics<parallel>], iteration_bounds = array<i64: 2, 1>, scalar_prefetch = 0 : i64, scratch_operands = 0 : i64, tpu.core_type = #tpu.core_type<tc>, window_params = [{transform_indices = @transform_0, window_bounds = array<i64: 1, 1, 18, 64>}, {transform_indices = @transform_1, window_bounds = array<i64: 1, 16, 18, 64>}, {transform_indices = @transform_2, window_bounds = array<i64: 1, 1, 18, 64>}, {pipeline_mode = #tpu.pipeline_mode<synchronous>, transform_indices = @transform_3, window_bounds = array<i64: 576, 64>}, {pipeline_mode = #tpu.pipeline_mode<synchronous>, transform_indices = @transform_4, window_bounds = array<i64: 1, 64>}, {pipeline_mode = #tpu.pipeline_mode<synchronous>, transform_indices = @transform_5, window_bounds = array<i64: 64, 256>}, {pipeline_mode = #tpu.pipeline_mode<synchronous>, transform_indices = @transform_6, window_bounds = array<i64: 1, 256>}, {transform_indices = @transform_7, window_bounds = array<i64: 256, 256>}, {transform_indices = @transform_8, window_bounds = array<i64: 256, 256>}]} {
    %c0 = arith.constant 0 : index
    %c0_0 = arith.constant 0 : index
    %c0_1 = arith.constant 0 : index
    %c0_2 = arith.constant 0 : index
    %0 = vector.load %arg2[%c0, %c0_0, %c0_1, %c0_2] : memref<1x1x18x64xbf16, #tpu.memory_space<vmem>>, vector<1x1x18x64xbf16>
    %1 = vector.shape_cast %0 : vector<1x1x18x64xbf16> to vector<1x18x64xbf16>
    %c0_i32 = arith.constant 0 : i32
    %2 = arith.cmpi sgt, %arg1, %c0_i32 : i32
    %cst = arith.constant 0.000000e+00 : bf16
    %3 = vector.broadcast %cst : bf16 to vector<1x18x64xbf16>
    %4 = arith.select %2, %1, %3 : vector<1x18x64xbf16>
    %c0_3 = arith.constant 0 : index
    %c0_4 = arith.constant 0 : index
    %c0_5 = arith.constant 0 : index
    %c0_6 = arith.constant 0 : index
    %5 = vector.load %arg3[%c0_3, %c0_4, %c0_5, %c0_6] : memref<1x16x18x64xbf16, #tpu.memory_space<vmem>>, vector<1x16x18x64xbf16>
    %6 = vector.shape_cast %5 : vector<1x16x18x64xbf16> to vector<16x18x64xbf16>
    %c0_7 = arith.constant 0 : index
    %c0_8 = arith.constant 0 : index
    %c0_9 = arith.constant 0 : index
    %c0_10 = arith.constant 0 : index
    %7 = vector.load %arg4[%c0_7, %c0_8, %c0_9, %c0_10] : memref<1x1x18x64xbf16, #tpu.memory_space<vmem>>, vector<1x1x18x64xbf16>
    %8 = vector.shape_cast %7 : vector<1x1x18x64xbf16> to vector<1x18x64xbf16>
    %c0_i32_11 = arith.constant 0 : i32
    %9 = arith.cmpi slt, %arg1, %c0_i32_11 : i32
    %cst_12 = arith.constant 0.000000e+00 : bf16
    %10 = vector.broadcast %cst_12 : bf16 to vector<1x18x64xbf16>
    %11 = arith.select %9, %8, %10 : vector<1x18x64xbf16>
    %12 = tpu.concatenate %4, %6, %11 in 0 : vector<1x18x64xbf16>, vector<16x18x64xbf16>, vector<1x18x64xbf16> -> vector<18x18x64xbf16>
    %13 = vector.extract_strided_slice %12 {offsets = [0, 0, 0], sizes = [16, 16, 64], strides = [1, 1, 1]} : vector<18x18x64xbf16> to vector<16x16x64xbf16>
    %14 = vector.extract_strided_slice %12 {offsets = [0, 1, 0], sizes = [16, 16, 64], strides = [1, 1, 1]} : vector<18x18x64xbf16> to vector<16x16x64xbf16>
    %15 = vector.extract_strided_slice %12 {offsets = [0, 2, 0], sizes = [16, 16, 64], strides = [1, 1, 1]} : vector<18x18x64xbf16> to vector<16x16x64xbf16>
    %16 = vector.extract_strided_slice %12 {offsets = [1, 0, 0], sizes = [16, 16, 64], strides = [1, 1, 1]} : vector<18x18x64xbf16> to vector<16x16x64xbf16>
    %17 = vector.extract_strided_slice %12 {offsets = [1, 1, 0], sizes = [16, 16, 64], strides = [1, 1, 1]} : vector<18x18x64xbf16> to vector<16x16x64xbf16>
    %18 = vector.extract_strided_slice %12 {offsets = [1, 2, 0], sizes = [16, 16, 64], strides = [1, 1, 1]} : vector<18x18x64xbf16> to vector<16x16x64xbf16>
    %19 = vector.extract_strided_slice %12 {offsets = [2, 0, 0], sizes = [16, 16, 64], strides = [1, 1, 1]} : vector<18x18x64xbf16> to vector<16x16x64xbf16>
    %20 = vector.extract_strided_slice %12 {offsets = [2, 1, 0], sizes = [16, 16, 64], strides = [1, 1, 1]} : vector<18x18x64xbf16> to vector<16x16x64xbf16>
    %21 = vector.extract_strided_slice %12 {offsets = [2, 2, 0], sizes = [16, 16, 64], strides = [1, 1, 1]} : vector<18x18x64xbf16> to vector<16x16x64xbf16>
    %22 = tpu.concatenate %13, %14, %15, %16, %17, %18, %19, %20, %21 in 2 : vector<16x16x64xbf16>, vector<16x16x64xbf16>, vector<16x16x64xbf16>, vector<16x16x64xbf16>, vector<16x16x64xbf16>, vector<16x16x64xbf16>, vector<16x16x64xbf16>, vector<16x16x64xbf16>, vector<16x16x64xbf16> -> vector<16x16x576xbf16>
    %23 = vector.shape_cast %22 : vector<16x16x576xbf16> to vector<256x576xbf16>
    %c0_13 = arith.constant 0 : index
    %c0_14 = arith.constant 0 : index
    %24 = vector.load %arg5[%c0_13, %c0_14] : memref<576x64xbf16, #tpu.memory_space<vmem>>, vector<576x64xbf16>
    %cst_15 = arith.constant dense<0.000000e+00> : vector<256x64xf32>
    %25 = tpu.matmul %23, %24, %cst_15 {dimension_numbers = #tpu.dot_dimension_numbers<[1], [0], [0], [1], [0, 0, 1, 1], [], []>} : vector<256x576xbf16>, vector<576x64xbf16>, vector<256x64xf32> -> vector<256x64xf32>
    %c0_16 = arith.constant 0 : index
    %c0_17 = arith.constant 0 : index
    %26 = vector.load %arg6[%c0_16, %c0_17] : memref<1x64xf32, #tpu.memory_space<vmem>>, vector<1x64xf32>
    %27 = vector.broadcast %26 : vector<1x64xf32> to vector<256x64xf32>
    %28 = arith.addf %25, %27 : vector<256x64xf32>
    %cst_18 = arith.constant 0.000000e+00 : f32
    %29 = vector.broadcast %cst_18 : f32 to vector<256x64xf32>
    %30 = arith.maximumf %28, %29 : vector<256x64xf32>
    %31 = arith.truncf %30 : vector<256x64xf32> to vector<256x64xbf16>
    %c0_19 = arith.constant 0 : index
    %c0_20 = arith.constant 0 : index
    %32 = vector.load %arg7[%c0_19, %c0_20] : memref<64x256xbf16, #tpu.memory_space<vmem>>, vector<64x256xbf16>
    %cst_21 = arith.constant dense<0.000000e+00> : vector<256x256xf32>
    %33 = tpu.matmul %31, %32, %cst_21 {dimension_numbers = #tpu.dot_dimension_numbers<[1], [0], [0], [1], [0, 0, 1, 1], [], []>} : vector<256x64xbf16>, vector<64x256xbf16>, vector<256x256xf32> -> vector<256x256xf32>
    %c0_22 = arith.constant 0 : index
    %c0_23 = arith.constant 0 : index
    %34 = vector.load %arg8[%c0_22, %c0_23] : memref<1x256xf32, #tpu.memory_space<vmem>>, vector<1x256xf32>
    %35 = vector.broadcast %34 : vector<1x256xf32> to vector<256x256xf32>
    %36 = arith.addf %33, %35 : vector<256x256xf32>
    %cst_24 = arith.constant 0.000000e+00 : f32
    %37 = vector.broadcast %cst_24 : f32 to vector<256x256xf32>
    %38 = arith.maximumf %36, %37 : vector<256x256xf32>
    %c0_25 = arith.constant 0 : index
    %c0_26 = arith.constant 0 : index
    %39 = vector.load %arg9[%c0_25, %c0_26] : memref<256x256xbf16, #tpu.memory_space<vmem>>, vector<256x256xbf16>
    %40 = arith.extf %39 : vector<256x256xbf16> to vector<256x256xf32>
    %41 = arith.addf %38, %40 : vector<256x256xf32>
    %cst_27 = arith.constant 0.000000e+00 : f32
    %42 = vector.broadcast %cst_27 : f32 to vector<256x256xf32>
    %43 = arith.maximumf %41, %42 : vector<256x256xf32>
    %c0_28 = arith.constant 0 : index
    %c0_29 = arith.constant 0 : index
    %44 = vector.load %arg10[%c0_28, %c0_29] : memref<256x256xf32, #tpu.memory_space<vmem>>, vector<256x256xf32>
    tpu.vector_store %arg10[%c0_28, %c0_29], %43 {strides = array<i32>} : memref<256x256xf32, #tpu.memory_space<vmem>>, vector<256x256xf32>,
    return
  }
  func.func @transform_0(%arg0: i32, %arg1: i32) -> (i32, i32, i32, i32) {
    %c16_i32 = arith.constant 16 : i32
    %0 = arith.muli %arg1, %c16_i32 : i32
    %c1_i32 = arith.constant 1 : i32
    %1 = arith.muli %0, %c1_i32 : i32
    %c1_i32_0 = arith.constant 1 : i32
    %2 = arith.subi %1, %c1_i32_0 : i32
    %c0_i32 = arith.constant 0 : i32
    %3 = arith.maxsi %2, %c0_i32 : i32
    %c0_i32_1 = arith.constant 0 : i32
    %c0_i32_2 = arith.constant 0 : i32
    %c0_i32_3 = arith.constant 0 : i32
    return %arg0, %3, %c0_i32_1, %c0_i32_2 : i32, i32, i32, i32
  }
  func.func @transform_1(%arg0: i32, %arg1: i32) -> (i32, i32, i32, i32) {
    %c0_i32 = arith.constant 0 : i32
    %c0_i32_0 = arith.constant 0 : i32
    %c0_i32_1 = arith.constant 0 : i32
    return %arg0, %arg1, %c0_i32, %c0_i32_0 : i32, i32, i32, i32
  }
  func.func @transform_2(%arg0: i32, %arg1: i32) -> (i32, i32, i32, i32) {
    %c16_i32 = arith.constant 16 : i32
    %0 = arith.muli %arg1, %c16_i32 : i32
    %c1_i32 = arith.constant 1 : i32
    %1 = arith.muli %0, %c1_i32 : i32
    %c16_i32_0 = arith.constant 16 : i32
    %2 = arith.addi %1, %c16_i32_0 : i32
    %c15_i32 = arith.constant 15 : i32
    %3 = arith.minsi %2, %c15_i32 : i32
    %c0_i32 = arith.constant 0 : i32
    %c0_i32_1 = arith.constant 0 : i32
    %c0_i32_2 = arith.constant 0 : i32
    return %arg0, %3, %c0_i32, %c0_i32_1 : i32, i32, i32, i32
  }
  func.func @transform_3(%arg0: i32, %arg1: i32) -> (i32, i32) {
    %c0_i32 = arith.constant 0 : i32
    %c0_i32_0 = arith.constant 0 : i32
    %c0_i32_1 = arith.constant 0 : i32
    return %c0_i32, %c0_i32_0 : i32, i32
  }
  func.func @transform_4(%arg0: i32, %arg1: i32) -> (i32, i32) {
    %c0_i32 = arith.constant 0 : i32
    %c0_i32_0 = arith.constant 0 : i32
    %c0_i32_1 = arith.constant 0 : i32
    return %c0_i32, %c0_i32_0 : i32, i32
  }
  func.func @transform_5(%arg0: i32, %arg1: i32) -> (i32, i32) {
    %c0_i32 = arith.constant 0 : i32
    %c0_i32_0 = arith.constant 0 : i32
    %c0_i32_1 = arith.constant 0 : i32
    return %c0_i32, %c0_i32_0 : i32, i32
  }
  func.func @transform_6(%arg0: i32, %arg1: i32) -> (i32, i32) {
    %c0_i32 = arith.constant 0 : i32
    %c0_i32_0 = arith.constant 0 : i32
    %c0_i32_1 = arith.constant 0 : i32
    return %c0_i32, %c0_i32_0 : i32, i32
  }
  func.func @transform_7(%arg0: i32, %arg1: i32) -> (i32, i32) {
    %c1_i32 = arith.constant 1 : i32
    %0 = arith.muli %arg0, %c1_i32 : i32
    %1 = arith.addi %0, %arg1 : i32
    %c0_i32 = arith.constant 0 : i32
    %c0_i32_0 = arith.constant 0 : i32
    return %1, %c0_i32 : i32, i32
  }
  func.func @transform_8(%arg0: i32, %arg1: i32) -> (i32, i32) {
    %c1_i32 = arith.constant 1 : i32
    %0 = arith.muli %arg0, %c1_i32 : i32
    %1 = arith.addi %0, %arg1 : i32
    %c0_i32 = arith.constant 0 : i32
    %c0_i32_0 = arith.constant 0 : i32
    return %1, %c0_i32 : i32, i32
  }
}

</mosaic_0001>

<bundles_post_ra>
// kernel: bottleneck_forward.2
= control target key start
LH: loop header
LB: loop body
LE: loop exit
PB: predicated region body
PF: predicated region fallthrough
CT: control target
= control target key end

     0   :  { %s2348_s21 = smov 0   ;;  %s2350_s22 = smov 0   ;;  %s3244_s0 = inlined_call_operand.vmem [shape: bf16[2,16,16,64], index: 0, kind: input, shape index: {}]   ;;  %s3245_s1 = inlined_call_operand.vmem [shape: bf16[64,64], index: 1, kind: input, shape index: {}]   ;;  %s3246_s2 = inlined_call_operand.vmem [shape: f32[1,64], index: 2, kind: input, shape index: {}]   ;;  %s3247_s3 = inlined_call_operand.vmem [shape: bf16[64,256], index: 3, kind: input, shape index: {}]   ;;  %s3248_s4 = inlined_call_operand.vmem [shape: f32[1,256], index: 4, kind: input, shape index: {}]   ;;  %s3249_s5 = inlined_call_operand.vmem [shape: bf16[2,16,18,64], index: 5, kind: output, shape index: {0}]   ;;  %s3250_s6 = inlined_call_operand.vmem [shape: bf16[512,256], index: 6, kind: output, shape index: {1}]  }
   0x1   :  { %s2352_s23 = smov 0  }
   0x2 LB: > { %s29_s24 = sadd.s32 1, %s2306_s22  ;;  %p1961_p0 = scmp.ge.s32.totalorder %s2310_s23, 1  ;;  %s2310_s23 = sphi %s2352_s23, %s17_s23   ;;  %s2306_s22 = sphi %s2350_s22, %s3260_s22   ;;  %s2302_s21 = sphi %s2348_s21, %s3259_s21  }
   0x3   : > { %p31_p1 = scmp.ge.s32.totalorder %s29_s24, 2  ;;  %p239_p2 = scmp.lt.s32.totalorder %s2310_s23, 3 }
   0x5   : > { %s3262_s24 = smov (%p31_p1, %s29_s24), 0  ;;  %p240_p3 = pnand %p1961_p0, %p239_p2 }
   0x6   : > { %p287_p4 = scmp.lt.s32.totalorder (!%p240_p3), %s2302_s21, 1 }
   0x7   : > { %243 = sbr.rel (%p240_p3) target bundleno = 336 (0x150), region = 40 }
   0xc   : > { %v2255_v0 = vld [vmem:[%s3245_s1 + $0x18] sm:$0xff]   ;;  %v2312_v3 = vmov 0   ;;  %v2259_v4 = vld [vmem:[%s3245_s1 + $0x10] sm:$0xff]   ;;  %s2383_s9 = scalar_select %p287_p4, %s2302_s21, 1  ;;  %v2260_v5 = vld [vmem:[%s3247_s3 + $0x24] ss:$8 sps:$4 sm:$0xff]   ;;  %v1355_v62 = vlaneseq }
   0xd   : > { %v2256_v1 = vld [vmem:[%s3247_s3 + $0x34] ss:$8 sps:$4 sm:$0xff]   ;;  %2181 = vmatprep.subr.bf16.mxu0 %v2255_v0  ;;  %v2258_v2 = vld [vmem:[%s3247_s3 + $0x30] ss:$8 sps:$4 sm:$0xff]   ;;  %1477 = vmatprep.mubr.bf16.mxu1 %v2312_v3  ;;  %v2262_v6 = vld [vmem:[%s3247_s3 + $0x20] ss:$8 sps:$4 sm:$0xff]  }
   0xe   : > { %2221 = vmatprep.subr.bf16.mxu1 %v2256_v1  ;;  %2182 = vmatpush3.bf16.msra.mxu0 %v2255_v0  ;;  %v2263_v7 = vld [vmem:[%s3245_s1 + $0x8] sm:$0xff]   ;;  %s2095_s16 = sshll.u32 %s2383_s9, 7  ;;  %v2264_v8 = vld [vmem:[%s3247_s3 + $0x14] ss:$8 sps:$4 sm:$0xff]   ;;  %v2266_v9 = vld [vmem:[%s3247_s3 + $0x10] ss:$8 sps:$4 sm:$0xff]  }
   0xf   : > { %2225 = vmatpush1.bf16.msra.mxu1 %v2258_v2  ;;  %2183 = vmatprep.subr.bf16.mxu0 %v2259_v4  ;;  %s2404_s27 = scalar_lea.vmem %s3244_s0, %s2095_s16  ;;  %v2267_v10 = vld [vmem:[%s3245_s1] sm:$0xff]   ;;  %vm469_vm0 = vcmask 523264   ;;  %s2229_s11 = smul.u32 192, %s2383_s9  ;;  %vm727_vm1 = vcmask 516096   ;;  %vm728_vm2 = vsmask.f32 256 }
  0x10   : > { %2222 = vmatprep.subr.bf16.mxu1 %v2260_v5  ;;  %v2268_v11 = vld [vmem:[%s3247_s3 + $0x4] ss:$8 sps:$4 sm:$0xff]   ;;  %v2270_v13 = vld [vmem:[%s3247_s3] ss:$8 sps:$4 sm:$0xff]   ;;  %v2425_v16 = vld [vmem:[%s2404_s27 + $0x10] sm:$0xff]   ;;  %s1965_s9 = sshll.u32 %s2302_s21, 5 }
  0x11   : > { %v2413_v12 = vld [vmem:[%s2404_s27] sm:$0xff]   ;;  %v2421_v14 = vld [vmem:[%s2404_s27 + $0x8] sm:$0xff]   ;;  %v2434_v17 = vld [vmem:[%s2404_s27 + $0x18] sm:$0xff]   ;;  %s2480_s14 = scalar_lea.vmem %s3249_s5, %s2229_s11  ;;  %v1356_v63 = vshrl.u32 %v1355_v62, 7  ;;  %p310_p5 = scmp.lt.s32.totalorder %s1965_s9, 63  ;;  %vm1180_vm4 = vcmask 519168  }
  0x12   : > { %2184 = vmatpush3.bf16.msra.mxu0 %v2259_v4  ;;  %2189 = vmatprep.mubr.msk.bf16.mxu0 %vm469_vm0, %v2413_v12  ;;  %v2273_v15 = vld [vmem:[%s2404_s27 + $0x20] sm:$0xff]   ;;  %v2276_v18 = vld [vmem:[%s2404_s27 + $0x28] sm:$0xff]   ;;  %v2277_v19 = vld [vmem:[%s2404_s27 + $0x30] sm:$0xff]   ;;  %vm1181_vm5 = vsmask.f32 7938 }
  0x13   : > { %2226 = vmatpush1.bf16.msra.mxu1 %v2262_v6  ;;  %2185 = vmatprep.subr.bf16.mxu0 %v2263_v7  ;;  %v2278_v20 = vld [vmem:[%s2404_s27 + $0x38] sm:$0xff]   ;;  %v2279_v21 = vld [vmem:[%s2404_s27 + $0x40] sm:$0xff]   ;;  %v2280_v22 = vld [vmem:[%s2404_s27 + $0x48] sm:$0xff]   ;;  %v1357_v0 = vsub.s32 0, %v1356_v63  ;;  %s3264_s9 = smov (!%p310_p5, %s1965_s9), 63 }
  0x14   : > { %2223 = vmatprep.subr.bf16.mxu1 %v2264_v8  ;;  %v2281_v23 = vld [vmem:[%s2404_s27 + $0x50] sm:$0xff]   ;;  %v2282_v24 = vld [vmem:[%s2404_s27 + $0x58] sm:$0xff]   ;;  %v2283_v25 = vld [vmem:[%s2404_s27 + $0x60] sm:$0xff]   ;;  %s2096_s21 = sshll.u32 %s3264_s9, 3  ;;  %vm858_vm6 = vsmask.f32 4368 }
  0x15   : > { %v2284_v26 = vld [vmem:[%s2404_s27 + $0x68] sm:$0xff]   ;;  %v2285_v27 = vld [vmem:[%s2404_s27 + $0x70] sm:$0xff]   ;;  %v2286_v28 = vld [vmem:[%s2404_s27 + $0x78] sm:$0xff]   ;;  %s2590_s25 = scalar_lea.vmem %s3250_s6, %s2096_s21 }
  0x16   : > { %2186 = vmatpush3.bf16.msra.mxu0 %v2263_v7  ;;  %v733_v29 = vld [vmem:[%s2480_s14 + $0xc] sm:$0x1]  ;;  %vm2490_vm3 = vmand %vm727_vm1, %vm728_vm2  ;;  %v730_v32 = vld [vmem:[%s2480_s14] sm:$0x1] }
  0x17   : > { %2227 = vmatpush1.bf16.msra.mxu1 %v2266_v9  ;;  %2187 = vmatprep.subr.bf16.mxu0 %v2267_v10  ;;  %v734_v31 = vsel %vm2490_vm3, 0, %v733_v29  ;;  %v731_v33 = vsel %vm2490_vm3, 0, %v730_v32  ;;  %v739_v34 = vld [vmem:[%s2480_s14 + $0x24] sm:$0x1]  ;;  %v736_v36 = vld [vmem:[%s2480_s14 + $0x18] sm:$0x1]  ;;  %vm2599_vm7 = vmand %vm1180_vm4, %vm1181_vm5 }
  0x18   : > { %2224 = vmatprep.subr.bf16.mxu1 %v2268_v11  ;;  %735 = vst [vmem:[%s2480_s14 + $0xc] sm:$0x1] %v734_v31  ;;  %732 = vst [vmem:[%s2480_s14] sm:$0x1] %v731_v33  ;;  %v740_v35 = vsel %vm2490_vm3, 0, %v739_v34  ;;  %v737_v37 = vsel %vm2490_vm3, 0, %v736_v36 }
  0x19   : > { %741 = vst [vmem:[%s2480_s14 + $0x24] sm:$0x1] %v740_v35  ;;  %738 = vst [vmem:[%s2480_s14 + $0x18] sm:$0x1] %v737_v37  ;;  %v745_v38 = vld [vmem:[%s2480_s14 + $0x3c] sm:$0x1] }
  0x1a   : > { %2188 = vmatpush3.bf16.msra.mxu0 %v2267_v10  ;;  %v746_v39 = vsel %vm2490_vm3, 0, %v745_v38  ;;  %v742_v40 = vld [vmem:[%s2480_s14 + $0x30] sm:$0x1]  ;;  %v751_v42 = vld [vmem:[%s2480_s14 + $0x54] sm:$0x1]  ;;  %vm2614_vm8 = vmor %vm728_vm2, %vm858_vm6 }
  0x1b   : > { %2228 = vmatpush1.bf16.msra.mxu1 %v2270_v13  ;;  %1413 = vmatprep.subr.bf16.mxu0 %v2256_v1  ;;  %747 = vst [vmem:[%s2480_s14 + $0x3c] sm:$0x1] %v746_v39  ;;  %v743_v41 = vsel %vm2490_vm3, 0, %v742_v40  ;;  %v752_v43 = vsel %vm2490_vm3, 0, %v751_v42  ;;  %v748_v44 = vld [vmem:[%s2480_s14 + $0x48] sm:$0x1]  ;;  %vm2660_vm9 = vmand %vm727_vm1, %vm1181_vm5 }
  0x1c   : > { %744 = vst [vmem:[%s2480_s14 + $0x30] sm:$0x1] %v743_v41  ;;  %753 = vst [vmem:[%s2480_s14 + $0x54] sm:$0x1] %v752_v43  ;;  %v749_v45 = vsel %vm2490_vm3, 0, %v748_v44  ;;  %v1361_v1 = vsub.s32 1, %v1356_v63 }
  0x1d   : > { %2190 = vmatmul.mubr.msk.bf16.vlgmr.msra.gmra.mxu0 %vm469_vm0, %v2421_v14  ;;  %750 = vst [vmem:[%s2480_s14 + $0x48] sm:$0x1] %v749_v45  ;;  %v757_v46 = vld [vmem:[%s2480_s14 + $0x6c] sm:$0x1]  ;;  %v754_v48 = vld [vmem:[%s2480_s14 + $0x60] sm:$0x1] }
  0x1e   : > { %2049 = vmatmul.mubr.msk.bf16.vlgmr.msra.gmra.mxu1 %vm469_vm0, %v2273_v15  ;;  %1414 = vmatpush1.bf16.msra.mxu0 %v2258_v2  ;;  %v758_v47 = vsel %vm2490_vm3, 0, %v757_v46  ;;  %v755_v49 = vsel %vm2490_vm3, 0, %v754_v48  ;;  %v763_v50 = vld [vmem:[%s2480_s14 + $0x84] sm:$0x1]  ;;  %v760_v52 = vld [vmem:[%s2480_s14 + $0x78] sm:$0x1] }
  0x1f   : > { %2193 = vmatprep.mubr.msk.bf16.mxu0 %vm469_vm0, %v2425_v16  ;;  %1487 = vmatprep.mubr.bf16.mxu1 %v2312_v3  ;;  %759 = vst [vmem:[%s2480_s14 + $0x6c] sm:$0x1] %v758_v47  ;;  %756 = vst [vmem:[%s2480_s14 + $0x60] sm:$0x1] %v755_v49  ;;  %v764_v51 = vsel %vm2490_vm3, 0, %v763_v50  ;;  %v761_v53 = vsel %vm2490_vm3, 0, %v760_v52 }
  0x20   : > { %1415 = vmatprep.subr.bf16.mxu0 %v2260_v5  ;;  %765 = vst [vmem:[%s2480_s14 + $0x84] sm:$0x1] %v764_v51  ;;  %762 = vst [vmem:[%s2480_s14 + $0x78] sm:$0x1] %v761_v53  ;;  %v769_v54 = vld [vmem:[%s2480_s14 + $0x9c] sm:$0x1] }
  0x21   : > { %v770_v55 = vsel %vm2490_vm3, 0, %v769_v54  ;;  %v766_v56 = vld [vmem:[%s2480_s14 + $0x90] sm:$0x1]  ;;  %v775_v58 = vld [vmem:[%s2480_s14 + $0xb4] sm:$0x1] }
  0x22   : > { %1416 = vmatpush1.bf16.msra.mxu0 %v2262_v6  ;;  %771 = vst [vmem:[%s2480_s14 + $0x9c] sm:$0x1] %v770_v55  ;;  %v767_v57 = vsel %vm2490_vm3, 0, %v766_v56  ;;  %v776_v59 = vsel %vm2490_vm3, 0, %v775_v58  ;;  %v772_v60 = vld [vmem:[%s2480_s14 + $0xa8] sm:$0x1] }
  0x23   : > { %1417 = vmatprep.subr.bf16.mxu0 %v2264_v8  ;;  %768 = vst [vmem:[%s2480_s14 + $0x90] sm:$0x1] %v767_v57  ;;  %777 = vst [vmem:[%s2480_s14 + $0xb4] sm:$0x1] %v776_v59  ;;  %v773_v61 = vsel %vm2490_vm3, 0, %v772_v60 }
  0x24   : > { %774 = vst [vmem:[%s2480_s14 + $0xa8] sm:$0x1] %v773_v61  ;;  %v1353_v2 = vld [vmem:[%s3248_s4] sm:$0x3]  ;;  %v1191_v38 = vld [vmem:[%s2480_s14 + $0xc] sm:$0xf] }
  0x25   : > { %2194 = vmatmul.mubr.msk.bf16.gmra.mxu0 %vm469_vm0, %v2434_v17  ;;  %v2579_v5 = vrot.slane %v1353_v2, %v1357_v0  ;;  %v2581_v6 = vrot.slane %v1353_v2, %v1361_v1  ;;  %v1183_v49 = vld [vmem:[%s2480_s14] sm:$0xf]  ;;  %v1195_v61 = vld [vmem:[%s2480_s14 + $0x14] sm:$0x1] }
  0x26   : > { %2050 = vmatmul.mubr.msk.bf16.gmra.mxu1 %vm469_vm0, %v2276_v18  ;;  %2197 = vmatprep.mubr.msk.bf16.mxu0 %vm469_vm0, %v2273_v15 }
  0x27   : > { %1497 = vmatprep.mubr.bf16.mxu1 %v2312_v3  ;;  %1418 = vmatpush1.bf16.msra.mxu0 %v2266_v9 }
  0x28   : > { %1419 = vmatprep.subr.bf16.mxu0 %v2268_v11 }
  0x2b   : > { %1420 = vmatpush1.bf16.msra.mxu0 %v2270_v13 }
  0x2d   : > { %2198 = vmatmul.mubr.msk.bf16.gmra.mxu0 %vm469_vm0, %v2276_v18 }
  0x2e   : > { %2051 = vmatmul.mubr.msk.bf16.gmra.mxu1 %vm469_vm0, %v2277_v19  ;;  %2201 = vmatprep.mubr.msk.bf16.mxu0 %vm469_vm0, %v2277_v19 }
  0x2f   : > { %1507 = vmatprep.mubr.bf16.mxu1 %v2312_v3 }
  0x35   : > { %2202 = vmatmul.mubr.msk.bf16.gmra.mxu0 %vm469_vm0, %v2278_v20 }
  0x36   : > { %2052 = vmatmul.mubr.msk.bf16.gmra.mxu1 %vm469_vm0, %v2278_v20  ;;  %2205 = vmatprep.mubr.msk.bf16.mxu0 %vm469_vm0, %v2279_v21 }
  0x37   : > { %1517 = vmatprep.mubr.bf16.mxu1 %v2312_v3 }
  0x3d   : > { %2206 = vmatmul.mubr.msk.bf16.gmra.mxu0 %vm469_vm0, %v2280_v22 }
  0x3e   : > { %2053 = vmatmul.mubr.msk.bf16.gmra.mxu1 %vm469_vm0, %v2279_v21  ;;  %2209 = vmatprep.mubr.msk.bf16.mxu0 %vm469_vm0, %v2281_v23 }
  0x3f   : > { %1527 = vmatprep.mubr.bf16.mxu1 %v2312_v3 }
  0x45   : > { %2210 = vmatmul.mubr.msk.bf16.gmra.mxu0 %vm469_vm0, %v2282_v24 }
  0x46   : > { %2054 = vmatmul.mubr.msk.bf16.gmra.mxu1 %vm469_vm0, %v2280_v22  ;;  %2213 = vmatprep.mubr.msk.bf16.mxu0 %vm469_vm0, %v2283_v25 }
  0x47   : > { %1537 = vmatprep.mubr.bf16.mxu1 %v2312_v3 }
  0x4d   : > { %2214 = vmatmul.mubr.msk.bf16.gmra.mxu0 %vm469_vm0, %v2284_v26 }
  0x4e   : > { %2055 = vmatmul.mubr.msk.bf16.gmra.mxu1 %vm469_vm0, %v2281_v23  ;;  %2217 = vmatprep.mubr.msk.bf16.mxu0 %vm469_vm0, %v2285_v27 }
  0x4f   : > { %1547 = vmatprep.mubr.bf16.mxu1 %v2312_v3 }
  0x55   : > { %2218 = vmatmul.mubr.msk.bf16.gmra.mxu0 %vm469_vm0, %v2286_v28 }
  0x56   : > { %2056 = vmatmul.mubr.msk.bf16.gmra.mxu1 %vm469_vm0, %v2282_v24  ;;  %1437 = vmatprep.mubr.bf16.mxu0 %v2312_v3 }
  0x57   : > { %1557 = vmatprep.mubr.bf16.mxu1 %v2312_v3 }
  0x5d   : > { %2045 = vmatmul.mubr.msk.bf16.vlgmr.msra.gmra.mxu0 %vm469_vm0, %v2413_v12 }
  0x5e   : > { %2057 = vmatmul.mubr.msk.bf16.gmra.mxu1 %vm469_vm0, %v2283_v25  ;;  %1447 = vmatprep.mubr.bf16.mxu0 %v2312_v3 }
  0x5f   : > { %1567 = vmatprep.mubr.bf16.mxu1 %v2312_v3 }
  0x65   : > { %2046 = vmatmul.mubr.msk.bf16.gmra.mxu0 %vm469_vm0, %v2421_v14 }
  0x66   : > { %2058 = vmatmul.mubr.msk.bf16.gmra.mxu1 %vm469_vm0, %v2284_v26  ;;  %1457 = vmatprep.mubr.bf16.mxu0 %v2312_v3 }
  0x67   : > { %1577 = vmatprep.mubr.bf16.mxu1 %v2312_v3 }
  0x6d   : > { %2047 = vmatmul.mubr.msk.bf16.gmra.mxu0 %vm469_vm0, %v2425_v16 }
  0x6e   : > { %2059 = vmatmul.mubr.msk.bf16.gmra.mxu1 %vm469_vm0, %v2285_v27  ;;  %1467 = vmatprep.mubr.bf16.mxu0 %v2312_v3 }
  0x6f   : > { %1587 = vmatprep.mubr.bf16.mxu1 %v2312_v3  ;;  %v2577_v3 = vld [vmem:[%s3246_s2] ss:$0 sm:$0xff] }
  0x75   : > { %2048 = vmatmul.mubr.msk.bf16.gmra.mxu0 %vm469_vm0, %v2434_v17 }
  0x76   : > { %2060 = vmatmul.mubr.msk.bf16.gmra.mxu1 %vm469_vm0, %v2286_v28 }
  0xdd   : > { %v2191_v4 = vpop.f32.mrf.mxu0 }
  0xde   : > { %v561_v7 = vadd.f32 %v2191_v4, %v2577_v3  ;;  %v1479_v8 = vpop.f32.mrf.mxu1 }
  0xdf   : > { %v552_v9 = vpop.f32.mrf.mxu0  ;;  %v1480_v13 = vadd.f32 %v1479_v8, %v2579_v5 }
  0xe0   : > { %v681_v10 = vmax.f32 %v561_v7, 0.0  ;;  %v553_v11 = vadd.f32 %v2577_v3, %v552_v9  ;;  %v1481_v12 = vpop.f32.mrf.mxu1 }
  0xe1   : > { %v1482_v14 = vadd.f32 %v1481_v12, %v2581_v6  ;;  %v2192_v15 = vpop.f32.mrf.mxu0 }
  0xe2   : > { %v2099_v16 = vpack.c.bf16 %v681_v10, %v681_v10  ;;  %v679_v17 = vmax.f32 %v553_v11, 0.0  ;;  %v564_v18 = vadd.f32 %v2192_v15, %v2577_v3  ;;  %v1483_v19 = vpop.f32.mrf.mxu1 }
  0xe3   : > { %v2137_v20 = vpack.c.bf16 %v1482_v14, %v1480_v13  ;;  %v555_v21 = vpop.f32.mrf.mxu0  ;;  %v1484_v27 = vadd.f32 %v1483_v19, %v2579_v5 }
  0xe4   : > { %v878_v22 = vshrl.u32 %v2099_v16, 16  ;;  %v2097_v23 = vpack.c.bf16 %v679_v17, %v679_v17  ;;  %v682_v24 = vmax.f32 %v564_v18, 0.0  ;;  %v1485_v25 = vpop.f32.mrf.mxu1  ;;  %v881_v26 = vshll.u32 %v2099_v16, 16  ;;  %v1188_v18 = vld [vmem:[%s2480_s14 + $0x8] sm:$0x1] }
  0xe5   : > { %1798 = vst [vmem:[%s2590_s25 + $0x40] sm:$0xff] %v2137_v20  ;;  %v556_v28 = vadd.f32 %v2577_v3, %v555_v21  ;;  %v1486_v29 = vadd.f32 %v1485_v25, %v2581_v6  ;;  %v2195_v31 = vpop.f32.mrf.mxu0 }
  0xe6   : > { %v880_v32 = vrot.slane %v878_v22, 7  ;;  %v861_v33 = vshrl.u32 %v2097_v23, 16  ;;  %v864_v34 = vshll.u32 %v2097_v23, 16  ;;  %v2100_v35 = vpack.c.bf16 %v682_v24, %v682_v24  ;;  %v1489_v36 = vpop.f32.mrf.mxu1 }
  0xe7   : > { %v680_v39 = vmax.f32 %v556_v28, 0.0  ;;  %v2138_v40 = vpack.c.bf16 %v1486_v29, %v1484_v27  ;;  %v577_v41 = vadd.f32 %v2195_v31, %v2577_v3  ;;  %v1490_v42 = vadd.f32 %v1489_v36, %v2579_v5  ;;  %v568_v43 = vpop.f32.mrf.mxu0  ;;  %v1205_v27 = vld [vmem:[%s2480_s14 + $0x24] sm:$0xf] }
  0xe8   : > { %v883_v44 = vor.u32 %v881_v26, %v880_v32  ;;  %v884_v45 = vrot.slane %v880_v32, 4  ;;  %v863_v46 = vrot.slane %v861_v33, 7  ;;  %v886_v47 = vshrl.u32 %v2100_v35, 16  ;;  %v1491_v48 = vpop.f32.mrf.mxu1 }
  0xe9   : > { %v889_v50 = vshll.u32 %v2100_v35, 16  ;;  %v2098_v51 = vpack.c.bf16 %v680_v39, %v680_v39  ;;  %1799 = vst [vmem:[%s2590_s25 + $0x48] sm:$0xff] %v2138_v40  ;;  %v685_v52 = vmax.f32 %v577_v41, 0.0  ;;  %v569_v53 = vadd.f32 %v2577_v3, %v568_v43  ;;  %v2196_v54 = vpop.f32.mrf.mxu0 }
  0xea   : > { %v1192_v55 = vsel %vm2599_vm7, %v883_v44, %v1191_v38  ;;  %v866_v56 = vor.u32 %v864_v34, %v863_v46  ;;  %v867_v57 = vrot.slane %v863_v46, 4  ;;  %v888_v58 = vrot.slane %v886_v47, 7  ;;  %v1493_v59 = vpop.f32.mrf.mxu1  ;;  %v1198_v46 = vld [vmem:[%s2480_s14 + $0x18] sm:$0xf] }
  0xeb   : > { %1193 = vst [vmem:[%s2480_s14 + $0xc] sm:$0xf] %v1192_v55  ;;  %v869_v62 = vshrl.u32 %v2098_v51, 16  ;;  %v872_v63 = vshll.u32 %v2098_v51, 16  ;;  %v2103_v0 = vpack.c.bf16 %v685_v52, %v685_v52  ;;  %v683_v1 = vmax.f32 %v569_v53, 0.0  ;;  %v571_v2 = vpop.f32.mrf.mxu0 }
  0xec   : > { %v1184_v4 = vsel %vm2599_vm7, %v866_v56, %v1183_v49  ;;  %v891_v7 = vor.u32 %v889_v50, %v888_v58  ;;  %v893_v8 = vrot.slane %v888_v58, 4  ;;  %v1492_v9 = vadd.f32 %v1491_v48, %v2581_v6  ;;  %v1495_v10 = vpop.f32.mrf.mxu1 }
  0xed   : > { %1185 = vst [vmem:[%s2480_s14] sm:$0xf] %v1184_v4  ;;  %v871_v11 = vrot.slane %v869_v62, 7  ;;  %v912_v12 = vshrl.u32 %v2103_v0, 16  ;;  %v915_v13 = vshll.u32 %v2103_v0, 16  ;;  %v2101_v14 = vpack.c.bf16 %v683_v1, %v683_v1  ;;  %v2199_v15 = vpop.f32.mrf.mxu0 }
  0xee   : > { %v892_v16 = vsel %vm2614_vm8, %v884_v45, %v891_v7  ;;  %v1196_v17 = vsel %vm2490_vm3, %v893_v8, %v1195_v61  ;;  %v2139_v19 = vpack.c.bf16 %v1492_v9, %v1490_v42  ;;  %v580_v20 = vadd.f32 %v2196_v54, %v2577_v3  ;;  %v1499_v21 = vpop.f32.mrf.mxu1  ;;  %v1209_v9 = vld [vmem:[%s2480_s14 + $0x2c] sm:$0x1] }
  0xef   : > { %1194 = vst.msk [vmem:[%s2480_s14 + $0x10] sm:$0xf] %vm1180_vm4, %v892_v16  ;;  %1197 = vst [vmem:[%s2480_s14 + $0x14] sm:$0x1] %v1196_v17  ;;  %v874_v22 = vor.u32 %v872_v63, %v871_v11  ;;  %v876_v23 = vrot.slane %v871_v11, 4  ;;  %v2632_v24 = vrot.slane %v912_v12, 7  ;;  %v584_v26 = vpop.f32.mrf.mxu0  ;;  %v1494_v31 = vadd.f32 %v1493_v59, %v2579_v5 }
  0xf0   : > { %v895_v25 = vshrl.u32 %v2101_v14, 16  ;;  %v898_v28 = vshll.u32 %v2101_v14, 16  ;;  %1800 = vst [vmem:[%s2590_s25 + $0x50] sm:$0xff] %v2139_v19  ;;  %v686_v29 = vmax.f32 %v580_v20, 0.0  ;;  %v572_v32 = vadd.f32 %v2577_v3, %v571_v2  ;;  %v1501_v33 = vpop.f32.mrf.mxu1 }
  0xf1   : > { %v875_v34 = vsel %vm2614_vm8, %v867_v57, %v874_v22  ;;  %v1189_v35 = vsel %vm2490_vm3, %v876_v23, %v1188_v18  ;;  %v917_v36 = vor.u32 %v915_v13, %v2632_v24  ;;  %v918_v38 = vrot.slane %v2632_v24, 4  ;;  %v2200_v39 = vpop.f32.mrf.mxu0 }
  0xf2   : > { %1187 = vst.msk [vmem:[%s2480_s14 + $0x4] sm:$0xf] %vm1180_vm4, %v875_v34  ;;  %1190 = vst [vmem:[%s2480_s14 + $0x8] sm:$0x1] %v1189_v35  ;;  %v2647_v40 = vrot.slane %v895_v25, 7  ;;  %v2104_v41 = vpack.c.bf16 %v686_v29, %v686_v29  ;;  %v684_v42 = vmax.f32 %v572_v32, 0.0  ;;  %v1496_v43 = vadd.f32 %v1495_v10, %v2581_v6  ;;  %v2650_v44 = vpop.f32.mrf.mxu1 }
  0xf3   : > { %v1206_v45 = vsel %vm2599_vm7, %v917_v36, %v1205_v27  ;;  %v593_v47 = vadd.f32 %v2199_v15, %v2577_v3  ;;  %v1500_v48 = vadd.f32 %v1499_v21, %v2579_v5  ;;  %v585_v49 = vadd.f32 %v2577_v3, %v584_v26  ;;  %v587_v50 = vpop.f32.mrf.mxu0 }
  0xf4   : > { %1207 = vst [vmem:[%s2480_s14 + $0x24] sm:$0xf] %v1206_v45  ;;  %v900_v52 = vor.u32 %v898_v28, %v2647_v40  ;;  %v901_v53 = vrot.slane %v2647_v40, 4  ;;  %v920_v54 = vshrl.u32 %v2104_v41, 16  ;;  %v923_v55 = vshll.u32 %v2104_v41, 16  ;;  %v2667_v56 = vpop.f32.mrf.mxu1 }
  0xf5   : > { %v2102_v57 = vpack.c.bf16 %v684_v42, %v684_v42  ;;  %v2140_v58 = vpack.c.bf16 %v1496_v43, %v1494_v31  ;;  %v689_v59 = vmax.f32 %v593_v47, 0.0  ;;  %v687_v61 = vmax.f32 %v585_v49, 0.0  ;;  %v2669_v62 = vpop.f32.mrf.mxu0  ;;  %v1202_v28 = vld [vmem:[%s2480_s14 + $0x20] sm:$0x1]  ;;  %v1212_v49 = vld [vmem:[%s2480_s14 + $0x30] sm:$0xf] }
  0xf6   : > { %v1300_v63 = vld [vmem:[%s2480_s14 + $0x14] sm:$0x1]  ;;  %v1199_v0 = vsel %vm2599_vm7, %v900_v52, %v1198_v46  ;;  %v922_v1 = vrot.slane %v920_v54, 7  ;;  %v1502_v2 = vadd.f32 %v1501_v33, %v2581_v6  ;;  %v596_v4 = vadd.f32 %v2200_v39, %v2577_v3  ;;  %v2676_v7 = vpop.f32.mrf.mxu1 }
  0xf7   : > { %v1301_v8 = vsel %vm2660_vm9, 0, %v1300_v63  ;;  %1200 = vst [vmem:[%s2480_s14 + $0x18] sm:$0xf] %v1199_v0  ;;  %v903_v10 = vshrl.u32 %v2102_v57, 16  ;;  %v906_v11 = vshll.u32 %v2102_v57, 16  ;;  %1801 = vst [vmem:[%s2590_s25 + $0x58] sm:$0xff] %v2140_v58  ;;  %v2107_v12 = vpack.c.bf16 %v689_v59, %v689_v59  ;;  %v600_v13 = vpop.f32.mrf.mxu0 }
  0xf8   : > { %1302 = vst [vmem:[%s2480_s14 + $0x14] sm:$0x1] %v1301_v8  ;;  %v925_v14 = vor.u32 %v923_v55, %v922_v1  ;;  %v927_v15 = vrot.slane %v922_v1, 4  ;;  %v2105_v16 = vpack.c.bf16 %v687_v61, %v687_v61  ;;  %v2141_v17 = vpack.c.bf16 %v1502_v2, %v1500_v48  ;;  %v1511_v18 = vpop.f32.mrf.mxu1 }
  0xf9   : > { %v1297_v19 = vld [vmem:[%s2480_s14 + $0x8] sm:$0x1]  ;;  %v905_v20 = vrot.slane %v903_v10, 7  ;;  %v946_v21 = vshrl.u32 %v2107_v12, 16  ;;  %v949_v22 = vshll.u32 %v2107_v12, 16  ;;  %v690_v23 = vmax.f32 %v596_v4, 0.0  ;;  %v2204_v24 = vpop.f32.mrf.mxu0 }
  0xfa   : > { %v1298_v25 = vsel %vm2660_vm9, 0, %v1297_v19  ;;  %v926_v26 = vsel %vm2614_vm8, %v918_v38, %v925_v14  ;;  %v1210_v27 = vsel %vm2490_vm3, %v927_v15, %v1209_v9  ;;  %v929_v29 = vshrl.u32 %v2105_v16, 16  ;;  %1802 = vst [vmem:[%s2590_s25 + $0x60] sm:$0xff] %v2141_v17  ;;  %v2693_v31 = vpop.f32.mrf.mxu1  ;;  %v1219_v38 = vld [vmem:[%s2480_s14 + $0x3c] sm:$0xf] }
  0xfb   : > { %1299 = vst [vmem:[%s2480_s14 + $0x8] sm:$0x1] %v1298_v25  ;;  %1208 = vst.msk [vmem:[%s2480_s14 + $0x28] sm:$0xf] %vm1180_vm4, %v926_v26  ;;  %v908_v32 = vor.u32 %v906_v11, %v905_v20  ;;  %v910_v33 = vrot.slane %v905_v20, 4  ;;  %v948_v34 = vrot.slane %v946_v21, 7  ;;  %v2699_v36 = vpop.f32.mrf.mxu0  ;;  %v2108_v40 = vpack.c.bf16 %v690_v23, %v690_v23 }
  0xfc   : > { %1211 = vst [vmem:[%s2480_s14 + $0x2c] sm:$0x1] %v1210_v27  ;;  %v932_v35 = vshll.u32 %v2105_v16, 16  ;;  %v2702_v39 = vrot.slane %v929_v29, 7  ;;  %v1504_v41 = vadd.f32 %v2650_v44, %v2579_v5  ;;  %v588_v42 = vadd.f32 %v2577_v3, %v587_v50  ;;  %v2707_v43 = vpop.f32.mrf.mxu1 }
  0xfd   : > { %v909_v45 = vsel %vm2614_vm8, %v901_v53, %v908_v32  ;;  %v1203_v46 = vsel %vm2490_vm3, %v910_v33, %v1202_v28  ;;  %v951_v47 = vor.u32 %v949_v22, %v948_v34  ;;  %v952_v48 = vrot.slane %v948_v34, 4  ;;  %v2714_v52 = vpop.f32.mrf.mxu0 }
  0xfe   : > { %1201 = vst.msk [vmem:[%s2480_s14 + $0x1c] sm:$0xf] %vm1180_vm4, %v909_v45  ;;  %1204 = vst [vmem:[%s2480_s14 + $0x20] sm:$0x1] %v1203_v46  ;;  %v934_v44 = vor.u32 %v932_v35, %v2702_v39  ;;  %v935_v50 = vrot.slane %v2702_v39, 4  ;;  %v954_v54 = vshrl.u32 %v2108_v40, 16  ;;  %v2721_v55 = vpop.f32.mrf.mxu1  ;;  %v1506_v59 = vadd.f32 %v2667_v56, %v2581_v6 }
  0xff   : > { %v957_v53 = vshll.u32 %v2108_v40, 16  ;;  %v1220_v57 = vsel %vm2599_vm7, %v951_v47, %v1219_v38  ;;  %v688_v58 = vmax.f32 %v588_v42, 0.0  ;;  %v609_v61 = vadd.f32 %v2669_v62, %v2577_v3  ;;  %v2729_v63 = vpop.f32.mrf.mxu0  ;;  %v1223_v56 = vld [vmem:[%s2480_s14 + $0x44] sm:$0x1]  ;;  %v1216_v40 = vld [vmem:[%s2480_s14 + $0x38] sm:$0x1] }
 0x100   : > { %1221 = vst [vmem:[%s2480_s14 + $0x3c] sm:$0xf] %v1220_v57  ;;  %v1213_v0 = vsel %vm2599_vm7, %v934_v44, %v1212_v49  ;;  %v956_v1 = vrot.slane %v954_v54, 7  ;;  %v1510_v2 = vadd.f32 %v2676_v7, %v2579_v5  ;;  %v601_v4 = vadd.f32 %v2577_v3, %v600_v13  ;;  %v2737_v8 = vpop.f32.mrf.mxu1 }
 0x101   : > { %1214 = vst [vmem:[%s2480_s14 + $0x30] sm:$0xf] %v1213_v0  ;;  %v2106_v9 = vpack.c.bf16 %v688_v58, %v688_v58  ;;  %v2142_v10 = vpack.c.bf16 %v1506_v59, %v1504_v41  ;;  %v693_v62 = vmax.f32 %v609_v61, 0.0  ;;  %v1512_v11 = vadd.f32 %v1511_v18, %v2581_v6  ;;  %v2742_v12 = vpop.f32.mrf.mxu0 }
 0x102   : > { %v959_v15 = vor.u32 %v957_v53, %v956_v1  ;;  %v961_v16 = vrot.slane %v956_v1, 4  ;;  %v691_v7 = vmax.f32 %v601_v4, 0.0  ;;  %v612_v13 = vadd.f32 %v2204_v24, %v2577_v3  ;;  %v2746_v17 = vpop.f32.mrf.mxu1  ;;  %v1233_v53 = vld [vmem:[%s2480_s14 + $0x54] sm:$0xf] }
 0x103   : > { %v1306_v14 = vld [vmem:[%s2480_s14 + $0x2c] sm:$0x1]  ;;  %v937_v20 = vshrl.u32 %v2106_v9, 16  ;;  %v940_v21 = vshll.u32 %v2106_v9, 16  ;;  %1803 = vst [vmem:[%s2590_s25 + $0x68] sm:$0xff] %v2142_v10  ;;  %v2111_v18 = vpack.c.bf16 %v693_v62, %v693_v62  ;;  %v2751_v22 = vpop.f32.mrf.mxu0  ;;  %v2143_v26 = vpack.c.bf16 %v1512_v11, %v1510_v2 }
 0x104   : > { %v1307_v19 = vsel %vm2660_vm9, 0, %v1306_v14  ;;  %v960_v23 = vsel %vm2614_vm8, %v952_v48, %v959_v15  ;;  %v1224_v24 = vsel %vm2490_vm3, %v961_v16, %v1223_v56  ;;  %v2109_v25 = vpack.c.bf16 %v691_v7, %v691_v7  ;;  %v2758_v27 = vpop.f32.mrf.mxu1 }
 0x105   : > { %1308 = vst [vmem:[%s2480_s14 + $0x2c] sm:$0x1] %v1307_v19  ;;  %v1303_v28 = vld [vmem:[%s2480_s14 + $0x20] sm:$0x1]  ;;  %1222 = vst.msk [vmem:[%s2480_s14 + $0x40] sm:$0xf] %vm1180_vm4, %v960_v23  ;;  %v2764_v35 = vpop.f32.mrf.mxu0  ;;  %v1514_v45 = vadd.f32 %v2693_v31, %v2579_v5  ;;  %v604_v58 = vadd.f32 %v2577_v3, %v2699_v36  ;;  %v1516_v31 = vadd.f32 %v2707_v43, %v2581_v6 }
 0x106   : > { %1225 = vst [vmem:[%s2480_s14 + $0x44] sm:$0x1] %v1224_v24  ;;  %v939_v29 = vrot.slane %v937_v20, 7  ;;  %v980_v32 = vshrl.u32 %v2111_v18, 16  ;;  %v983_v33 = vshll.u32 %v2111_v18, 16  ;;  %v694_v34 = vmax.f32 %v612_v13, 0.0  ;;  %v2772_v46 = vpop.f32.mrf.mxu1 }
 0x107   : > { %v1304_v38 = vsel %vm2660_vm9, 0, %v1303_v28  ;;  %v963_v41 = vshrl.u32 %v2109_v25, 16  ;;  %v966_v42 = vshll.u32 %v2109_v25, 16  ;;  %1804 = vst [vmem:[%s2590_s25 + $0x70] sm:$0xff] %v2143_v26  ;;  %v2775_v54 = vpop.f32.mrf.mxu0  ;;  %v625_v59 = vadd.f32 %v2714_v52, %v2577_v3  ;;  %v1226_v36 = vld [vmem:[%s2480_s14 + $0x48] sm:$0xf] }
 0x108   : > { %1305 = vst [vmem:[%s2480_s14 + $0x20] sm:$0x1] %v1304_v38  ;;  %v942_v47 = vor.u32 %v940_v21, %v939_v29  ;;  %v944_v48 = vrot.slane %v939_v29, 4  ;;  %v982_v49 = vrot.slane %v980_v32, 7  ;;  %v2112_v44 = vpack.c.bf16 %v694_v34, %v694_v34  ;;  %v2786_v61 = vpop.f32.mrf.mxu1  ;;  %v1237_v23 = vld [vmem:[%s2480_s14 + $0x5c] sm:$0x1] }
 0x109   : > { %v2778_v57 = vrot.slane %v963_v41, 7  ;;  %v2795_v56 = vpop.f32.mrf.mxu0  ;;  %v692_v62 = vmax.f32 %v604_v58, 0.0  ;;  %v2144_v11 = vpack.c.bf16 %v1516_v31, %v1514_v45  ;;  %v697_v14 = vmax.f32 %v625_v59, 0.0 }
 0x10a   : > { %v943_v0 = vsel %vm2614_vm8, %v935_v50, %v942_v47  ;;  %v1217_v1 = vsel %vm2490_vm3, %v944_v48, %v1216_v40  ;;  %v985_v2 = vor.u32 %v983_v33, %v982_v49  ;;  %v986_v4 = vrot.slane %v982_v49, 4  ;;  %v2802_v9 = vpop.f32.mrf.mxu1  ;;  %v1230_v47 = vld [vmem:[%s2480_s14 + $0x50] sm:$0x1] }
 0x10b   : > { %1215 = vst.msk [vmem:[%s2480_s14 + $0x34] sm:$0xf] %vm1180_vm4, %v943_v0  ;;  %1218 = vst [vmem:[%s2480_s14 + $0x38] sm:$0x1] %v1217_v1  ;;  %v968_v43 = vor.u32 %v966_v42, %v2778_v57  ;;  %v969_v39 = vrot.slane %v2778_v57, 4  ;;  %v988_v52 = vshrl.u32 %v2112_v44, 16  ;;  %v2806_v15 = vpop.f32.mrf.mxu0  ;;  %v1520_v19 = vadd.f32 %v2721_v55, %v2579_v5 }
 0x10c   : > { %v991_v50 = vshll.u32 %v2112_v44, 16  ;;  %v1234_v10 = vsel %vm2599_vm7, %v985_v2, %v1233_v53  ;;  %v617_v20 = vadd.f32 %v2577_v3, %v2729_v63  ;;  %v2816_v21 = vpop.f32.mrf.mxu1  ;;  %v2110_v24 = vpack.c.bf16 %v692_v62, %v692_v62  ;;  %1805 = vst [vmem:[%s2590_s25 + $0x78] sm:$0xff] %v2144_v11  ;;  %v1247_v2 = vld [vmem:[%s2480_s14 + $0x6c] sm:$0xf] }
 0x10d   : > { %v1312_v16 = vld [vmem:[%s2480_s14 + $0x44] sm:$0x1]  ;;  %1235 = vst [vmem:[%s2480_s14 + $0x54] sm:$0xf] %v1234_v10  ;;  %v1227_v7 = vsel %vm2599_vm7, %v968_v43, %v1226_v36  ;;  %v990_v13 = vrot.slane %v988_v52, 7  ;;  %v2115_v25 = vpack.c.bf16 %v697_v14, %v697_v14  ;;  %v1522_v26 = vadd.f32 %v2737_v8, %v2581_v6  ;;  %v2825_v28 = vpop.f32.mrf.mxu0 }
 0x10e   : > { %v1313_v18 = vsel %vm2660_vm9, 0, %v1312_v16  ;;  %1228 = vst [vmem:[%s2480_s14 + $0x48] sm:$0xf] %v1227_v7  ;;  %v695_v29 = vmax.f32 %v617_v20, 0.0  ;;  %v628_v32 = vadd.f32 %v2742_v12, %v2577_v3  ;;  %v2830_v33 = vpop.f32.mrf.mxu1  ;;  %v971_v34 = vshrl.u32 %v2110_v24, 16 }
 0x10f   : > { %1314 = vst [vmem:[%s2480_s14 + $0x44] sm:$0x1] %v1313_v18  ;;  %v993_v55 = vor.u32 %v991_v50, %v990_v13  ;;  %v995_v63 = vrot.slane %v990_v13, 4  ;;  %v974_v38 = vshll.u32 %v2110_v24, 16  ;;  %v1014_v40 = vshrl.u32 %v2115_v25, 16  ;;  %v2832_v42 = vpop.f32.mrf.mxu0 }
 0x110   : > { %v1017_v41 = vshll.u32 %v2115_v25, 16  ;;  %v2113_v48 = vpack.c.bf16 %v695_v29, %v695_v29  ;;  %v2145_v49 = vpack.c.bf16 %v1522_v26, %v1520_v19  ;;  %v2839_v12 = vpop.f32.mrf.mxu1  ;;  %v973_v53 = vrot.slane %v971_v34, 7 }
 0x111   : > { %v994_v8 = vsel %vm2614_vm8, %v986_v4, %v993_v55  ;;  %v1238_v45 = vsel %vm2490_vm3, %v995_v63, %v1237_v23  ;;  %v2845_v58 = vrot.slane %v1014_v40, 7  ;;  %v698_v31 = vmax.f32 %v628_v32, 0.0  ;;  %v2849_v0 = vpop.f32.mrf.mxu0  ;;  %v1240_v23 = vld [vmem:[%s2480_s14 + $0x60] sm:$0xf] }
 0x112   : > { %v1309_v44 = vld [vmem:[%s2480_s14 + $0x38] sm:$0x1]  ;;  %1236 = vst.msk [vmem:[%s2480_s14 + $0x58] sm:$0xf] %vm1180_vm4, %v994_v8  ;;  %1239 = vst [vmem:[%s2480_s14 + $0x5c] sm:$0x1] %v1238_v45  ;;  %v1524_v59 = vadd.f32 %v2746_v17, %v2579_v5  ;;  %v620_v43 = vadd.f32 %v2577_v3, %v2751_v22  ;;  %v2857_v52 = vpop.f32.mrf.mxu1  ;;  %v976_v50 = vor.u32 %v974_v38, %v973_v53 }
 0x113   : > { %v1310_v1 = vsel %vm2660_vm9, 0, %v1309_v44  ;;  %v997_v4 = vshrl.u32 %v2113_v48, 16  ;;  %v1000_v36 = vshll.u32 %v2113_v48, 16  ;;  %1806 = vst [vmem:[%s2590_s25 + $0x80] sm:$0xff] %v2145_v49  ;;  %v978_v10 = vrot.slane %v973_v53, 4  ;;  %v2862_v11 = vpop.f32.mrf.mxu0 }
 0x114   : > { %1311 = vst [vmem:[%s2480_s14 + $0x38] sm:$0x1] %v1310_v1  ;;  %v1019_v17 = vor.u32 %v1017_v41, %v2845_v58  ;;  %v1020_v62 = vrot.slane %v2845_v58, 4  ;;  %v2116_v16 = vpack.c.bf16 %v698_v31, %v698_v31  ;;  %v696_v7 = vmax.f32 %v620_v43, 0.0  ;;  %v2868_v13 = vpop.f32.mrf.mxu1 }
 0x115   : > { %v2864_v14 = vrot.slane %v997_v4, 7  ;;  %v1526_v22 = vadd.f32 %v2758_v27, %v2581_v6  ;;  %v977_v19 = vsel %vm2614_vm8, %v969_v39, %v976_v50  ;;  %v1231_v20 = vsel %vm2490_vm3, %v978_v10, %v1230_v47  ;;  %v2881_v25 = vpop.f32.mrf.mxu0 }
 0x116   : > { %v1248_v18 = vsel %vm2599_vm7, %v1019_v17, %v1247_v2  ;;  %v641_v24 = vadd.f32 %v2764_v35, %v2577_v3  ;;  %1229 = vst.msk [vmem:[%s2480_s14 + $0x4c] sm:$0xf] %vm1180_vm4, %v977_v19  ;;  %1232 = vst [vmem:[%s2480_s14 + $0x50] sm:$0x1] %v1231_v20  ;;  %v1022_v39 = vshrl.u32 %v2116_v16, 16  ;;  %v1025_v26 = vshll.u32 %v2116_v16, 16  ;;  %v2889_v55 = vpop.f32.mrf.mxu1 }
 0x117   : > { %1249 = vst [vmem:[%s2480_s14 + $0x6c] sm:$0xf] %v1248_v18  ;;  %v1002_v27 = vor.u32 %v1000_v36, %v2864_v14  ;;  %v1003_v57 = vrot.slane %v2864_v14, 4  ;;  %v2114_v63 = vpack.c.bf16 %v696_v7, %v696_v7  ;;  %v2146_v29 = vpack.c.bf16 %v1526_v22, %v1524_v59  ;;  %v2893_v34 = vpop.f32.mrf.mxu0  ;;  %v1244_v14 = vld [vmem:[%s2480_s14 + $0x68] sm:$0x1] }
 0x118   : > { %v701_v35 = vmax.f32 %v641_v24, 0.0  ;;  %v1530_v32 = vadd.f32 %v2772_v46, %v2579_v5  ;;  %v1024_v41 = vrot.slane %v1022_v39, 7  ;;  %v633_v8 = vadd.f32 %v2577_v3, %v2775_v54  ;;  %v2902_v47 = vpop.f32.mrf.mxu1  ;;  %v1251_v46 = vld [vmem:[%s2480_s14 + $0x74] sm:$0x1] }
 0x119   : > { %v1318_v38 = vld [vmem:[%s2480_s14 + $0x5c] sm:$0x1]  ;;  %v1241_v40 = vsel %vm2599_vm7, %v1002_v27, %v1240_v23  ;;  %v1532_v45 = vadd.f32 %v2786_v61, %v2581_v6  ;;  %v1005_v49 = vshrl.u32 %v2114_v63, 16  ;;  %v1008_v44 = vshll.u32 %v2114_v63, 16  ;;  %1807 = vst [vmem:[%s2590_s25 + $0x88] sm:$0xff] %v2146_v29  ;;  %v2909_v58 = vpop.f32.mrf.mxu0 }
 0x11a   : > { %v1319_v48 = vsel %vm2660_vm9, 0, %v1318_v38  ;;  %1242 = vst [vmem:[%s2480_s14 + $0x60] sm:$0xf] %v1241_v40  ;;  %v2119_v53 = vpack.c.bf16 %v701_v35, %v701_v35  ;;  %v1027_v54 = vor.u32 %v1025_v26, %v1024_v41  ;;  %v1029_v31 = vrot.slane %v1024_v41, 4  ;;  %v2912_v1 = vpop.f32.mrf.mxu1 }
 0x11b   : > { %1320 = vst [vmem:[%s2480_s14 + $0x5c] sm:$0x1] %v1319_v48  ;;  %v699_v61 = vmax.f32 %v633_v8, 0.0  ;;  %v2147_v59 = vpack.c.bf16 %v1532_v45, %v1530_v32  ;;  %v1007_v2 = vrot.slane %v1005_v49, 7  ;;  %v644_v43 = vadd.f32 %v2795_v56, %v2577_v3  ;;  %v2916_v50 = vpop.f32.mrf.mxu0 }
 0x11c   : > { %v1048_v4 = vshrl.u32 %v2119_v53, 16  ;;  %v1051_v36 = vshll.u32 %v2119_v53, 16  ;;  %v1028_v10 = vsel %vm2614_vm8, %v1020_v62, %v1027_v54  ;;  %v1252_v17 = vsel %vm2490_vm3, %v1029_v31, %v1251_v46  ;;  %v2926_v22 = vpop.f32.mrf.mxu1  ;;  %v1254_v46 = vld [vmem:[%s2480_s14 + $0x78] sm:$0xf] }
 0x11d   : > { %v2117_v16 = vpack.c.bf16 %v699_v61, %v699_v61  ;;  %1808 = vst [vmem:[%s2590_s25 + $0x90] sm:$0xff] %v2147_v59  ;;  %v1534_v7 = vadd.f32 %v2802_v9, %v2579_v5  ;;  %v1315_v19 = vld [vmem:[%s2480_s14 + $0x50] sm:$0x1]  ;;  %1250 = vst.msk [vmem:[%s2480_s14 + $0x70] sm:$0xf] %vm1180_vm4, %v1028_v10  ;;  %v1010_v56 = vor.u32 %v1008_v44, %v1007_v2  ;;  %v1012_v20 = vrot.slane %v1007_v2, 4  ;;  %v2934_v23 = vpop.f32.mrf.mxu0 }
 0x11e   : > { %1253 = vst [vmem:[%s2480_s14 + $0x74] sm:$0x1] %v1252_v17  ;;  %v2932_v62 = vrot.slane %v1048_v4, 7  ;;  %v702_v18 = vmax.f32 %v644_v43, 0.0  ;;  %v1316_v24 = vsel %vm2660_vm9, 0, %v1315_v19  ;;  %v636_v26 = vadd.f32 %v2577_v3, %v2806_v15  ;;  %v2941_v63 = vpop.f32.mrf.mxu1 }
 0x11f   : > { %v1261_v9 = vld [vmem:[%s2480_s14 + $0x84] sm:$0xf]  ;;  %v1031_v27 = vshrl.u32 %v2117_v16, 16  ;;  %v1034_v39 = vshll.u32 %v2117_v16, 16  ;;  %1317 = vst [vmem:[%s2480_s14 + $0x50] sm:$0x1] %v1316_v24  ;;  %v1011_v29 = vsel %vm2614_vm8, %v1003_v57, %v1010_v56  ;;  %v1245_v35 = vsel %vm2490_vm3, %v1012_v20, %v1244_v14  ;;  %v2950_v40 = vpop.f32.mrf.mxu0 }
 0x120   : > { %v1053_v32 = vor.u32 %v1051_v36, %v2932_v62  ;;  %v1054_v38 = vrot.slane %v2932_v62, 4  ;;  %1243 = vst.msk [vmem:[%s2480_s14 + $0x64] sm:$0xf] %vm1180_vm4, %v1011_v29  ;;  %1246 = vst [vmem:[%s2480_s14 + $0x68] sm:$0x1] %v1245_v35  ;;  %v2120_v41 = vpack.c.bf16 %v702_v18, %v702_v18  ;;  %v700_v8 = vmax.f32 %v636_v26, 0.0  ;;  %v2959_v45 = vpop.f32.mrf.mxu1 }
 0x121   : > { %v2955_v15 = vrot.slane %v1031_v27, 7  ;;  %v1536_v57 = vadd.f32 %v2816_v21, %v2581_v6  ;;  %v657_v49 = vadd.f32 %v2825_v28, %v2577_v3  ;;  %v1540_v44 = vadd.f32 %v2830_v33, %v2579_v5  ;;  %v2970_v54 = vpop.f32.mrf.mxu0  ;;  %v1265_v56 = vld [vmem:[%s2480_s14 + $0x8c] sm:$0x1] }
 0x122   : > { %v1262_v48 = vsel %vm2599_vm7, %v1053_v32, %v1261_v9  ;;  %v649_v53 = vadd.f32 %v2577_v3, %v2832_v42  ;;  %v1056_v61 = vshrl.u32 %v2120_v41, 16  ;;  %v1059_v59 = vshll.u32 %v2120_v41, 16  ;;  %v2975_v2 = vpop.f32.mrf.mxu1 }
 0x123   : > { %1263 = vst [vmem:[%s2480_s14 + $0x84] sm:$0xf] %v1262_v48  ;;  %v1036_v21 = vor.u32 %v1034_v39, %v2955_v15  ;;  %v1037_v31 = vrot.slane %v2955_v15, 4  ;;  %v2118_v28 = vpack.c.bf16 %v700_v8, %v700_v8  ;;  %v2148_v4 = vpack.c.bf16 %v1536_v57, %v1534_v7  ;;  %v2977_v42 = vpop.f32.mrf.mxu0 }
 0x124   : > { %v705_v33 = vmax.f32 %v657_v49, 0.0  ;;  %v703_v36 = vmax.f32 %v649_v53, 0.0  ;;  %v1058_v17 = vrot.slane %v1056_v61, 7  ;;  %v1542_v14 = vadd.f32 %v2839_v12, %v2581_v6  ;;  %v2986_v19 = vpop.f32.mrf.mxu1 }
 0x125   : > { %v1324_v43 = vld [vmem:[%s2480_s14 + $0x74] sm:$0x1]  ;;  %v1255_v10 = vsel %vm2599_vm7, %v1036_v21, %v1254_v46  ;;  %v660_v16 = vadd.f32 %v2849_v0, %v2577_v3  ;;  %v1039_v20 = vshrl.u32 %v2118_v28, 16  ;;  %v1042_v62 = vshll.u32 %v2118_v28, 16  ;;  %1809 = vst [vmem:[%s2590_s25 + $0x98] sm:$0xff] %v2148_v4  ;;  %v2993_v24 = vpop.f32.mrf.mxu0 }
 0x126   : > { %v1325_v7 = vsel %vm2660_vm9, 0, %v1324_v43  ;;  %1256 = vst [vmem:[%s2480_s14 + $0x78] sm:$0xf] %v1255_v10  ;;  %v2123_v18 = vpack.c.bf16 %v705_v33, %v705_v33  ;;  %v1061_v12 = vor.u32 %v1059_v59, %v1058_v17  ;;  %v1063_v9 = vrot.slane %v1058_v17, 4  ;;  %v2996_v39 = vpop.f32.mrf.mxu1  ;;  %v1258_v46 = vld [vmem:[%s2480_s14 + $0x80] sm:$0x1] }
 0x127   : > { %1326 = vst [vmem:[%s2480_s14 + $0x74] sm:$0x1] %v1325_v7  ;;  %v2121_v0 = vpack.c.bf16 %v703_v36, %v703_v36  ;;  %v2149_v27 = vpack.c.bf16 %v1542_v14, %v1540_v44  ;;  %v1321_v26 = vld [vmem:[%s2480_s14 + $0x68] sm:$0x1]  ;;  %v1041_v29 = vrot.slane %v1039_v20, 7  ;;  %v706_v15 = vmax.f32 %v660_v16, 0.0  ;;  %v2999_v41 = vpop.f32.mrf.mxu0 }
 0x128   : > { %v1082_v35 = vshrl.u32 %v2123_v18, 16  ;;  %v1085_v32 = vshll.u32 %v2123_v18, 16  ;;  %v1322_v8 = vsel %vm2660_vm9, 0, %v1321_v26  ;;  %v1062_v57 = vsel %vm2614_vm8, %v1054_v38, %v1061_v12  ;;  %v3009_v44 = vpop.f32.mrf.mxu1  ;;  %v1275_v28 = vld [vmem:[%s2480_s14 + $0x9c] sm:$0xf] }
 0x129   : > { %v1266_v48 = vsel %vm2490_vm3, %v1063_v9, %v1265_v56  ;;  %v1065_v49 = vshrl.u32 %v2121_v0, 16  ;;  %1810 = vst [vmem:[%s2590_s25 + $0xa0] sm:$0xff] %v2149_v27  ;;  %1323 = vst [vmem:[%s2480_s14 + $0x68] sm:$0x1] %v1322_v8  ;;  %v1044_v53 = vor.u32 %v1042_v62, %v1041_v29  ;;  %v1046_v21 = vrot.slane %v1041_v29, 4  ;;  %v3015_v38 = vpop.f32.mrf.mxu0 }
 0x12a   : > { %1264 = vst.msk [vmem:[%s2480_s14 + $0x88] sm:$0xf] %vm1180_vm4, %v1062_v57  ;;  %1267 = vst [vmem:[%s2480_s14 + $0x8c] sm:$0x1] %v1266_v48  ;;  %v1084_v61 = vrot.slane %v1082_v35, 7  ;;  %v1068_v59 = vshll.u32 %v2121_v0, 16  ;;  %v2124_v33 = vpack.c.bf16 %v706_v15, %v706_v15  ;;  %v1544_v36 = vadd.f32 %v2857_v52, %v2579_v5  ;;  %v3024_v10 = vpop.f32.mrf.mxu1 }
 0x12b   : > { %v3018_v4 = vrot.slane %v1065_v49, 7  ;;  %v652_v43 = vadd.f32 %v2577_v3, %v2862_v11  ;;  %v1045_v17 = vsel %vm2614_vm8, %v1037_v31, %v1044_v53  ;;  %v1259_v14 = vsel %vm2490_vm3, %v1046_v21, %v1258_v46  ;;  %v1268_v56 = vld [vmem:[%s2480_s14 + $0x90] sm:$0xf]  ;;  %v3031_v20 = vpop.f32.mrf.mxu0 }
 0x12c   : > { %v1087_v16 = vor.u32 %v1085_v32, %v1084_v61  ;;  %v1088_v7 = vrot.slane %v1084_v61, 4  ;;  %1257 = vst.msk [vmem:[%s2480_s14 + $0x7c] sm:$0xf] %vm1180_vm4, %v1045_v17  ;;  %1260 = vst [vmem:[%s2480_s14 + $0x80] sm:$0x1] %v1259_v14  ;;  %v1090_v62 = vshrl.u32 %v2124_v33, 16  ;;  %v3038_v18 = vpop.f32.mrf.mxu1  ;;  %v1546_v0 = vadd.f32 %v2868_v13, %v2581_v6 }
 0x12d   : > { %v1070_v52 = vor.u32 %v1068_v59, %v3018_v4  ;;  %v1071_v11 = vrot.slane %v3018_v4, 4  ;;  %v1093_v31 = vshll.u32 %v2124_v33, 16  ;;  %v704_v9 = vmax.f32 %v652_v43, 0.0  ;;  %v3046_v26 = vpop.f32.mrf.mxu0  ;;  %v1279_v13 = vld [vmem:[%s2480_s14 + $0xa4] sm:$0x1] }
 0x12e   : > { %v1276_v12 = vsel %vm2599_vm7, %v1087_v16, %v1275_v28  ;;  %v673_v27 = vadd.f32 %v2881_v25, %v2577_v3  ;;  %v1092_v35 = vrot.slane %v1090_v62, 7  ;;  %v1550_v32 = vadd.f32 %v2889_v55, %v2579_v5  ;;  %v3055_v8 = vpop.f32.mrf.mxu1 }
 0x12f   : > { %1277 = vst [vmem:[%s2480_s14 + $0x9c] sm:$0xf] %v1276_v12  ;;  %v1269_v29 = vsel %vm2599_vm7, %v1070_v52, %v1268_v56  ;;  %v665_v15 = vadd.f32 %v2577_v3, %v2893_v34  ;;  %v2122_v57 = vpack.c.bf16 %v704_v9, %v704_v9  ;;  %v2150_v25 = vpack.c.bf16 %v1546_v0, %v1544_v36  ;;  %v3061_v49 = vpop.f32.mrf.mxu0  ;;  %v1272_v9 = vld [vmem:[%s2480_s14 + $0x98] sm:$0x1] }
 0x130   : > { %1270 = vst [vmem:[%s2480_s14 + $0x90] sm:$0xf] %v1269_v29  ;;  %v709_v48 = vmax.f32 %v673_v27, 0.0  ;;  %v1552_v46 = vadd.f32 %v2902_v47, %v2581_v6  ;;  %v1095_v21 = vor.u32 %v1093_v31, %v1092_v35  ;;  %v1097_v55 = vrot.slane %v1092_v35, 4  ;;  %v3066_v59 = vpop.f32.mrf.mxu1 }
 0x131   : > { %v1330_v53 = vld [vmem:[%s2480_s14 + $0x8c] sm:$0x1]  ;;  %v707_v61 = vmax.f32 %v665_v15, 0.0  ;;  %v676_v34 = vadd.f32 %v2909_v58, %v2577_v3  ;;  %v1073_v33 = vshrl.u32 %v2122_v57, 16  ;;  %v1076_v36 = vshll.u32 %v2122_v57, 16  ;;  %1811 = vst [vmem:[%s2590_s25 + $0xa8] sm:$0xff] %v2150_v25  ;;  %v3071_v43 = vpop.f32.mrf.mxu0 }
 0x132   : > { %v1331_v28 = vsel %vm2660_vm9, 0, %v1330_v53  ;;  %v2127_v47 = vpack.c.bf16 %v709_v48, %v709_v48  ;;  %v1096_v17 = vsel %vm2614_vm8, %v1088_v7, %v1095_v21  ;;  %v1280_v3 = vsel %vm2490_vm3, %v1097_v55, %v1279_v13  ;;  %v3078_v16 = vpop.f32.mrf.mxu1  ;;  %v1289_v25 = vld [vmem:[%s2480_s14 + $0xb4] sm:$0xf] }
 0x133   : > { %1332 = vst [vmem:[%s2480_s14 + $0x8c] sm:$0x1] %v1331_v28  ;;  %v2125_v58 = vpack.c.bf16 %v707_v61, %v707_v61  ;;  %v2151_v14 = vpack.c.bf16 %v1552_v46, %v1550_v32  ;;  %v1327_v56 = vld [vmem:[%s2480_s14 + $0x80] sm:$0x1]  ;;  %1278 = vst.msk [vmem:[%s2480_s14 + $0xa0] sm:$0xf] %vm1180_vm4, %v1096_v17  ;;  %v1554_v29 = vadd.f32 %v2912_v1, %v2579_v5  ;;  %v3091_v57 = vpop.f32.mrf.mxu0 }
 0x134   : > { %1281 = vst [vmem:[%s2480_s14 + $0xa4] sm:$0x1] %v1280_v3  ;;  %v1075_v52 = vrot.slane %v1073_v33, 7  ;;  %v1116_v62 = vshrl.u32 %v2127_v47, 16  ;;  %v1119_v31 = vshll.u32 %v2127_v47, 16  ;;  %v710_v12 = vmax.f32 %v676_v34, 0.0  ;;  %v3104_v55 = vpop.f32.mrf.mxu1 }
 0x135   : > { %v1328_v7 = vsel %vm2660_vm9, 0, %v1327_v56  ;;  %v1099_v0 = vshrl.u32 %v2125_v58, 16  ;;  %v1102_v27 = vshll.u32 %v2125_v58, 16  ;;  %1812 = vst [vmem:[%s2590_s25 + $0xb0] sm:$0xff] %v2151_v14  ;;  %v2287_v46 = vld [vmem:[%s3246_s2] ss:$0 sm:$0xff]  ;;  %v1556_v1 = vadd.f32 %v2926_v22, %v2581_v6  ;;  %v3122_v58 = vpop.f32.mrf.mxu0 }
 0x136   : > { %1329 = vst [vmem:[%s2480_s14 + $0x80] sm:$0x1] %v1328_v7  ;;  %v1078_v35 = vor.u32 %v1076_v36, %v1075_v52  ;;  %v1080_v32 = vrot.slane %v1075_v52, 4  ;;  %v1118_v15 = vrot.slane %v1116_v62, 7  ;;  %v2128_v13 = vpack.c.bf16 %v710_v12, %v710_v12  ;;  %v1282_v33 = vld [vmem:[%s2480_s14 + $0xa8] sm:$0xf]  ;;  %v3132_v12 = vpop.f32.mrf.mxu1 }
 0x137   : > { %v3094_v48 = vrot.slane %v1099_v0, 7  ;;  %v668_v53 = vadd.f32 %v2287_v46, %v2916_v50  ;;  %v1440_v21 = vadd.f32 %v2934_v23, %v2579_v5  ;;  %v2152_v17 = vpack.c.bf16 %v1556_v1, %v1554_v29  ;;  %v1293_v7 = vld [vmem:[%s2480_s14 + $0xbc] sm:$0x1] }
 0x138   : > { %v1079_v61 = vsel %vm2614_vm8, %v1071_v11, %v1078_v35  ;;  %v1273_v34 = vsel %vm2490_vm3, %v1080_v32, %v1272_v9  ;;  %v1121_v28 = vor.u32 %v1119_v31, %v1118_v15  ;;  %v1122_v50 = vrot.slane %v1118_v15, 4 }
 0x139   : > { %1271 = vst.msk [vmem:[%s2480_s14 + $0x94] sm:$0xf] %vm1180_vm4, %v1079_v61  ;;  %1274 = vst [vmem:[%s2480_s14 + $0x98] sm:$0x1] %v1273_v34  ;;  %v1104_v22 = vor.u32 %v1102_v27, %v3094_v48  ;;  %v1105_v23 = vrot.slane %v3094_v48, 4  ;;  %v1124_v4 = vshrl.u32 %v2128_v13, 16  ;;  %v1560_v3 = vadd.f32 %v2941_v63, %v2579_v5 }
 0x13a   : > { %v1127_v36 = vshll.u32 %v2128_v13, 16  ;;  %v1290_v11 = vsel %vm2599_vm7, %v1121_v28, %v1289_v25  ;;  %v708_v47 = vmax.f32 %v668_v53, 0.0  ;;  %v1442_v62 = vadd.f32 %v2950_v40, %v2581_v6  ;;  %1813 = vst [vmem:[%s2590_s25 + $0xb8] sm:$0xff] %v2152_v17  ;;  %v1591_v53 = vpop.f32.mrf.mxu1 }
 0x13b   : > { %v1336_v14 = vld [vmem:[%s2480_s14 + $0xa4] sm:$0x1]  ;;  %1291 = vst [vmem:[%s2480_s14 + $0xb4] sm:$0xf] %v1290_v11  ;;  %v1283_v56 = vsel %vm2599_vm7, %v1104_v22, %v1282_v33  ;;  %v1126_v52 = vrot.slane %v1124_v4, 7  ;;  %v1562_v31 = vadd.f32 %v2959_v45, %v2581_v6  ;;  %v1444_v37 = vadd.f32 %v2970_v54, %v2579_v5  ;;  %v1471_v54 = vpop.f32.mrf.mxu0 }
 0x13c   : > { %v1337_v63 = vsel %vm2660_vm9, 0, %v1336_v14  ;;  %1284 = vst [vmem:[%s2480_s14 + $0xa8] sm:$0xf] %v1283_v56  ;;  %v2126_v9 = vpack.c.bf16 %v708_v47, %v708_v47  ;;  %v1564_v40 = vadd.f32 %v2975_v2, %v2579_v5  ;;  %v2129_v27 = vpack.c.bf16 %v1442_v62, %v1440_v21  ;;  %v1593_v17 = vpop.f32.mrf.mxu1 }
 0x13d   : > { %1338 = vst [vmem:[%s2480_s14 + $0xa4] sm:$0x1] %v1337_v63  ;;  %v1129_v0 = vor.u32 %v1127_v36, %v1126_v52  ;;  %v1131_v45 = vrot.slane %v1126_v52, 4  ;;  %v2153_v29 = vpack.c.bf16 %v1562_v31, %v1560_v3  ;;  %v1446_v15 = vadd.f32 %v2977_v42, %v2581_v6 }
 0x13e   : > { %v1107_v35 = vshrl.u32 %v2126_v9, 16  ;;  %v1110_v32 = vshll.u32 %v2126_v9, 16  ;;  %v1566_v13 = vadd.f32 %v2986_v19, %v2581_v6  ;;  %1790 = vst [vmem:[%s2590_s25] sm:$0xff] %v2129_v27  ;;  %v1450_v46 = vadd.f32 %v2993_v24, %v2579_v5  ;;  %v1286_v24 = vld [vmem:[%s2480_s14 + $0xb0] sm:$0x1]  ;;  %v1595_v31 = vpop.f32.mrf.mxu1 }
 0x13f   : > { %v1130_v2 = vsel %vm2614_vm8, %v1122_v50, %v1129_v0  ;;  %v1294_v25 = vsel %vm2490_vm3, %v1131_v45, %v1293_v7  ;;  %1814 = vst [vmem:[%s2590_s25 + $0xc0] sm:$0xff] %v2153_v29  ;;  %v1570_v42 = vadd.f32 %v2996_v39, %v2579_v5  ;;  %v2130_v21 = vpack.c.bf16 %v1446_v15, %v1444_v37 }
 0x140   : > { %v1333_v19 = vld [vmem:[%s2480_s14 + $0x98] sm:$0x1]  ;;  %1292 = vst.msk [vmem:[%s2480_s14 + $0xb8] sm:$0xf] %vm1180_vm4, %v1130_v2  ;;  %1295 = vst [vmem:[%s2480_s14 + $0xbc] sm:$0x1] %v1294_v25  ;;  %v2154_v61 = vpack.c.bf16 %v1566_v13, %v1564_v40  ;;  %v1452_v34 = vadd.f32 %v2999_v41, %v2581_v6  ;;  %v1572_v39 = vadd.f32 %v3009_v44, %v2581_v6  ;;  %v1473_v44 = vpop.f32.mrf.mxu0 }
 0x141   : > { %v1109_v1 = vrot.slane %v1107_v35, 7  ;;  %v1334_v28 = vsel %vm2660_vm9, 0, %v1333_v19  ;;  %v1454_v50 = vadd.f32 %v3015_v38, %v2579_v5  ;;  %v1574_v33 = vadd.f32 %v3024_v10, %v2579_v5  ;;  %1791 = vst [vmem:[%s2590_s25 + $0x8] sm:$0xff] %v2130_v21 }
 0x142   : > { %1335 = vst [vmem:[%s2480_s14 + $0x98] sm:$0x1] %v1334_v28  ;;  %1815 = vst [vmem:[%s2590_s25 + $0xc8] sm:$0xff] %v2154_v61  ;;  %v2131_v41 = vpack.c.bf16 %v1452_v34, %v1450_v46  ;;  %v1456_v36 = vadd.f32 %v3031_v20, %v2581_v6  ;;  %v2155_v11 = vpack.c.bf16 %v1572_v39, %v1570_v42  ;;  %v1475_v56 = vpop.f32.mrf.mxu0 }
 0x143   : > { %v1112_v22 = vor.u32 %v1110_v32, %v1109_v1  ;;  %v1114_v4 = vrot.slane %v1109_v1, 4  ;;  %v1576_v38 = vadd.f32 %v3038_v18, %v2581_v6  ;;  %v1460_v10 = vadd.f32 %v3046_v26, %v2579_v5 }
 0x144   : > { %v1580_v47 = vadd.f32 %v3055_v8, %v2579_v5  ;;  %1792 = vst [vmem:[%s2590_s25 + $0x10] sm:$0xff] %v2131_v41  ;;  %v2132_v14 = vpack.c.bf16 %v1456_v36, %v1454_v50  ;;  %v1462_v18 = vadd.f32 %v3061_v49, %v2581_v6  ;;  %1816 = vst [vmem:[%s2590_s25 + $0xd0] sm:$0xff] %v2155_v11 }
 0x145   : > { %v1113_v3 = vsel %vm2614_vm8, %v1105_v23, %v1112_v22  ;;  %v1287_v20 = vsel %vm2490_vm3, %v1114_v4, %v1286_v24  ;;  %v2156_v26 = vpack.c.bf16 %v1576_v38, %v1574_v33  ;;  %v1582_v8 = vadd.f32 %v3066_v59, %v2581_v6 }
 0x146   : > { %1285 = vst.msk [vmem:[%s2480_s14 + $0xac] sm:$0xf] %vm1180_vm4, %v1113_v3  ;;  %1288 = vst [vmem:[%s2480_s14 + $0xb0] sm:$0x1] %v1287_v20  ;;  %v1464_v60 = vadd.f32 %v3071_v43, %v2579_v5  ;;  %v1584_v30 = vadd.f32 %v3078_v16, %v2579_v5  ;;  %v2133_v48 = vpack.c.bf16 %v1462_v18, %v1460_v10 }
 0x147   : > { %1793 = vst [vmem:[%s2590_s25 + $0x18] sm:$0xff] %v2132_v14  ;;  %v1466_v49 = vadd.f32 %v3091_v57, %v2581_v6  ;;  %v1586_v23 = vadd.f32 %v3104_v55, %v2581_v6  ;;  %v1470_v59 = vadd.f32 %v3122_v58, %v2579_v5  ;;  %v1342_v52 = vld [vmem:[%s2480_s14 + $0xbc] sm:$0x1]  ;;  %1817 = vst [vmem:[%s2590_s25 + $0xd8] sm:$0xff] %v2156_v26 }
 0x148   : > { %v2157_v43 = vpack.c.bf16 %v1582_v8, %v1580_v47  ;;  %v1590_v16 = vadd.f32 %v3132_v12, %v2579_v5  ;;  %v1472_v62 = vadd.f32 %v1471_v54, %v2581_v6  ;;  %v1592_v57 = vadd.f32 %v1591_v53, %v2581_v6  ;;  %1794 = vst [vmem:[%s2590_s25 + $0x20] sm:$0xff] %v2133_v48 }
 0x149   : > { %v1343_v55 = vsel %vm2660_vm9, 0, %v1342_v52  ;;  %v2134_v58 = vpack.c.bf16 %v1466_v49, %v1464_v60  ;;  %v2158_v63 = vpack.c.bf16 %v1586_v23, %v1584_v30  ;;  %v1474_v9 = vadd.f32 %v1473_v44, %v2579_v5 }
 0x14a   : > { %1344 = vst [vmem:[%s2480_s14 + $0xbc] sm:$0x1] %v1343_v55  ;;  %1818 = vst [vmem:[%s2590_s25 + $0xe0] sm:$0xff] %v2157_v43  ;;  %v2135_v7 = vpack.c.bf16 %v1472_v62, %v1470_v59  ;;  %v2159_v12 = vpack.c.bf16 %v1592_v57, %v1590_v16  ;;  %v1476_v37 = vadd.f32 %v1475_v56, %v2581_v6 }
 0x14b   : > { %1795 = vst [vmem:[%s2590_s25 + $0x28] sm:$0xff] %v2134_v58  ;;  %1819 = vst [vmem:[%s2590_s25 + $0xe8] sm:$0xff] %v2158_v63  ;;  %v1594_v40 = vadd.f32 %v1593_v17, %v2579_v5  ;;  %v1596_v0 = vadd.f32 %v1595_v31, %v2581_v6 }
 0x14c   : > { %1796 = vst [vmem:[%s2590_s25 + $0x30] sm:$0xff] %v2135_v7  ;;  %1820 = vst [vmem:[%s2590_s25 + $0xf0] sm:$0xff] %v2159_v12  ;;  %v2136_v45 = vpack.c.bf16 %v1476_v37, %v1474_v9 }
 0x14d   : > { %v1339_v27 = vld [vmem:[%s2480_s14 + $0xb0] sm:$0x1]  ;;  %v2160_v29 = vpack.c.bf16 %v1596_v0, %v1594_v40 }
 0x14e   : > { %v1340_v35 = vsel %vm2660_vm9, 0, %v1339_v27  ;;  %1797 = vst [vmem:[%s2590_s25 + $0x38] sm:$0xff] %v2136_v45 }
 0x14f   : > { %1341 = vst [vmem:[%s2480_s14 + $0xb0] sm:$0x1] %v1340_v35  ;;  %1821 = vst [vmem:[%s2590_s25 + $0xf8] sm:$0xff] %v2160_v29 }
 0x150 PF: > { %s17_s23 = sadd.s32 1, %s2310_s23   ;;  %s3259_s21 = smov %s2306_s22 }
 0x151   : > { %p14_p6 = scmp.ge.s32.totalorder %s17_s23, 4   ;;  %s3260_s22 = smov %s3262_s24 }
 0x153   :  { %16 = sbr.rel (!%p14_p6) target bundleno = 2 (0x2), region = 82 }

// kernel: bottleneck_forward.3
= control target key start
LH: loop header
LB: loop body
LE: loop exit
PB: predicated region body
PF: predicated region fallthrough
CT: control target
= control target key end

     0   :  { %13 = vsyncpa [#allocation3], 0  ;;  %s4984_s0 = inlined_call_operand.vmem [shape: bf16[2,16,18,64], index: 0, kind: input, shape index: {}, may-alias: {0,1,2}]   ;;  %s4985_s1 = inlined_call_operand.vmem [shape: bf16[2,16,18,64], index: 1, kind: input, shape index: {}, may-alias: {0,1,2}]   ;;  %s4986_s2 = inlined_call_operand.vmem [shape: bf16[2,16,18,64], index: 2, kind: input, shape index: {}, may-alias: {0,1,2}]   ;;  %s4987_s3 = inlined_call_operand.vmem [shape: bf16[576,64], index: 3, kind: input, shape index: {}]   ;;  %s4988_s4 = inlined_call_operand.vmem [shape: f32[1,64], index: 4, kind: input, shape index: {}]   ;;  %s4989_s5 = inlined_call_operand.vmem [shape: bf16[64,256], index: 5, kind: input, shape index: {}]   ;;  %s4990_s6 = inlined_call_operand.vmem [shape: f32[1,256], index: 6, kind: input, shape index: {}]   ;;  %s4991_s7 = inlined_call_operand.vmem [shape: bf16[512,256], index: 7, kind: input, shape index: {}]   ;;  %s4992_s8 = inlined_call_operand.hbm [shape: f32[512,256], index: 8, kind: output, shape index: {}]  }
   0x1   :  { %15 = vsyncpa [#allocation3 + $0x1], 0  ;;  %s3630_s2 = smov 0   ;;  %s3632_s26 = smov 0  }
   0x2   :  { %s3634_s27 = smov 0   ;;  %s3636_s28 = smov 0  }
   0x3   :  { %s3638_s29 = smov 0   ;;  %s3640_s30 = smov 0  }
   0x4 LB: > { %s2926_s9 = sadd.s32 4294967295, %s3578_s30   ;;  %s2927_s10 = sadd.s32 4294967294, %s3578_s30   ;;  %s3578_s30 = sphi %s3640_s30, %s21_s30   ;;  %s3574_s29 = sphi %s3638_s29, %s5099_s29   ;;  %s3570_s28 = sphi %s3636_s28, %s5098_s28   ;;  %s3566_s27 = sphi %s3634_s27, %s5097_s27   ;;  %s3562_s26 = sphi %s3632_s26, %s5096_s26   ;;  %s3558_s2 = sphi %s3630_s2, %s5095_s2  }
   0x5   : > { %s33_s11 = sadd.s32 1, %s3574_s29  ;;  %s254_s12 = sadd.s32 1, %s3566_s27 }
   0x6   : > { %p35_p0 = scmp.ge.s32.totalorder %s33_s11, 2  ;;  %p264_p1 = scmp.ne.s32.totalorder %s3566_s27, %s3562_s26 }
   0x7   : > { %p265_p2 = scmp.eq.s32.totalorder %s2926_s9, 1  ;;  %p270_p3 = scmp.ne.s32.totalorder %s3562_s26, %s3558_s2 }
   0x8   : > { %s5101_s11 = smov (%p35_p0, %s33_s11), 0  ;;  %p271_p5 = scmp.eq.s32.totalorder %s2927_s10, 1 }
   0x9   : > { %p3670_p4 = por %p265_p2, %p264_p1  ;;  %s251_s14 = ssub.s32 %s3574_s29, %s5101_s11 }
   0xa   : > { %p2930_p6 = scmp.ge.s32.totalorder %s3578_s30, 1  ;;  %p252_p7 = scmp.eq.s32.totalorder %s251_s14, 0 }
   0xb   : > { %p3677_p8 = por %p271_p5, %p270_p3  ;;  %p367_p9 = scmp.lt.s32.totalorder %s3578_s30, 3 }
   0xc   : > { %s3683_s16 = scalar_select %p252_p7, %s3566_s27, %s254_s12  }
   0xd   : > { %p368_p10 = pnand %p2930_p6, %p367_p9 }
   0xf   : > { %371 = sbr.rel (%p368_p10) target bundleno = 854 (0x356), region = 52 }
  0x14   : > { %p457_p11 = scmp.lt.s32.totalorder %s3570_s28, 1  ;;  %vm692_vm0 = vsmask.f32 7424  ;;  %v4993_v0 = vmov 0   ;;  %v3453_v2 = vld [vmem:[%s4987_s3 + $0x78] sm:$0xff]   ;;  %v3455_v6 = vld [vmem:[%s4987_s3 + $0x70] sm:$0xff]  }
  0x15   : > { %v3688_v1 = vcombine.low %v4993_v0, %v4993_v0  ;;  %v3454_v3 = vld [vmem:[%s4987_s3 + $0x38] sm:$0xff]   ;;  %3062 = vmatprep.subr.bf16.mxu0 %v3453_v2  ;;  %v3456_v8 = vld [vmem:[%s4987_s3 + $0x30] sm:$0xff]   ;;  %v3457_v9 = vld [vmem:[%s4987_s3 + $0x68] sm:$0xff]   ;;  %s3581_s18 = smov 64   ;;  %vm917_vm1 = vcmask 1046528   ;;  %vm1080_vm2 = vcmask 523264  }
  0x16   : > { %s458_s19 = scalar_select %p457_p11, %s3570_s28, 1  ;;  %3063 = vmatpush3.bf16.msra.mxu0 %v3454_v3 }
  0x17   : > { %v694_v4 = vshrl.u32 %v3688_v1, 16  ;;  %v696_v5 = vshll.u32 %v3688_v1, 16  ;;  %3064 = vmatprep.subr.bf16.mxu0 %v3455_v6  ;;  %s2935_s21 = sshll.u32 %s3570_s28, 5  ;;  %s3061_s14 = sshll.u32 %s3570_s28, 13 }
  0x18   : > { %s3362_s22 = smul.u32 192, %s458_s19  ;;  %p486_p12 = scmp.lt.s32.totalorder %s2935_s21, 63 }
  0x19   : > { %v698_v7 = vrot.slane %v696_v5, 1 }
  0x1a   : > { %s3708_s12 = scalar_lea.vmem %s4985_s1, %s3362_s22  ;;  %3065 = vmatpush3.bf16.msra.mxu0 %v3456_v8  ;;  %s5103_s21 = smov (!%p486_p12, %s2935_s21), 63 }
  0x1b   : > { %v3714_v10 = vld [vmem:[%s3708_s12] sm:$0xff]   ;;  %v699_v11 = vor.u32 %v698_v7, %v694_v4  ;;  %v3717_v12 = vld [vmem:[%s3708_s12 + $0xc] sm:$0xff]   ;;  %3066 = vmatprep.subr.bf16.mxu0 %v3457_v9  ;;  %v3729_v16 = vld [vmem:[%s3708_s12 + $0x8] ss:$0 sps:$4 sm:$0x11]   ;;  %s3059_s22 = sshll.u32 %s5103_s21, 3  ;;  %s4931_s21 = scalar_lea.hbm %s4992_s8, %s3061_s14 }
  0x1c   : > { %971 = vrot.lane.b32.xlu0 %v3714_v10, %s3581_s18  ;;  %973 = vrot.lane.b32.xlu1 %v3717_v12, %s3581_s18  ;;  %v706_v14 = vshrl.u32 %v3714_v10, 16  ;;  %v708_v15 = vshll.u32 %v3714_v10, 16  ;;  %v3732_v17 = vld [vmem:[%s3708_s12 + $0x18] sm:$0xff]   ;;  %v713_v19 = vshll.u32 %v3729_v16, 16  ;;  %v718_v22 = vshrl.u32 %v3717_v12, 16  ;;  %v3751_v30 = vld [vmem:[%s3708_s12 + $0x24] sm:$0xff]   ;;  %s4757_s25 = scalar_lea.vmem %s4991_s7, %s3059_s22 }
  0x1d   : > { %v3722_v13 = vsel %vm692_vm0, %v699_v11, %v698_v7  ;;  %v3738_v20 = vld [vmem:[%s3708_s12 + $0x14] ss:$0 sps:$4 sm:$0x11]   ;;  %v720_v23 = vshll.u32 %v3717_v12, 16  ;;  %v730_v26 = vshrl.u32 %v3732_v17, 16  ;;  %v732_v27 = vshll.u32 %v3732_v17, 16 }
  0x1e   : > { %v710_v18 = vrot.slane %v708_v15, 1  ;;  %v715_v24 = vrot.slane %v713_v19, 1  ;;  %v725_v25 = vshll.u32 %v3738_v20, 16  ;;  %v3746_v29 = vld [vmem:[%s3708_s12 + $0x20] ss:$0 sps:$4 sm:$0x11]  }
  0x1f   : > { %v722_v28 = vrot.slane %v720_v23, 1  ;;  %v3757_v32 = vld [vmem:[%s3708_s12 + $0x30] sm:$0xff]   ;;  %v734_v34 = vrot.slane %v732_v27, 1  ;;  %v737_v36 = vshll.u32 %v3746_v29, 16  ;;  %v742_v39 = vshrl.u32 %v3751_v30, 16  ;;  %v3771_v42 = vld [vmem:[%s3708_s12 + $0x3c] sm:$0xff]  }
  0x20   : > { %885 = vrot.lane.b32.xlu0 %v3722_v13, %s3581_s18  ;;  %v711_v21 = vor.u32 %v710_v18, %v706_v14  ;;  %v727_v33 = vrot.slane %v725_v25, 1  ;;  %v3763_v37 = vld [vmem:[%s3708_s12 + $0x2c] ss:$0 sps:$4 sm:$0x11]   ;;  %v744_v40 = vshll.u32 %v3751_v30, 16  ;;  %v754_v47 = vshrl.u32 %v3757_v32, 16 }
  0x21   : > { %v723_v35 = vor.u32 %v722_v28, %v718_v22  ;;  %v735_v38 = vor.u32 %v734_v34, %v730_v26  ;;  %v739_v43 = vrot.slane %v737_v36, 1  ;;  %v749_v44 = vshll.u32 %v3763_v37, 16  ;;  %v3777_v46 = vld [vmem:[%s3708_s12 + $0x38] ss:$0 sps:$4 sm:$0x11]   ;;  %v3789_v55 = vld [vmem:[%s3708_s12 + $0x48] sm:$0xff]  }
  0x22   : > { %v3754_v31 = vsel %vm692_vm0, %v711_v21, %v715_v24  ;;  %v746_v45 = vrot.slane %v744_v40, 1  ;;  %v756_v48 = vshll.u32 %v3757_v32, 16  ;;  %v768_v50 = vshll.u32 %v3771_v42, 16  ;;  %v3792_v56 = vld [vmem:[%s3708_s12 + $0x44] ss:$0 sps:$4 sm:$0x11]  }
  0x23   : > { %5006 = vst [vmem:[#allocation5_spill] sm:$0xff] %v3754_v31  ;;  %887 = vrot.lane.b32.xlu1 %v3754_v31, %s3581_s18  ;;  %v3768_v41 = vsel %vm692_vm0, %v723_v35, %v727_v33  ;;  %v751_v49 = vrot.slane %v749_v44, 1  ;;  %v3785_v51 = vsel %vm692_vm0, %v735_v38, %v739_v43  ;;  %v761_v54 = vshll.u32 %v3777_v46, 16  ;;  %v3801_v61 = vld [vmem:[%s3708_s12 + $0x50] ss:$0 sps:$4 sm:$0x11]  }
  0x24   : > { %975 = vrot.lane.b32.xlu0 %v3732_v17, %s3581_s18  ;;  %5007 = vst [vmem:[#allocation6_spill] sm:$0xff] %v3768_v41  ;;  %5008 = vst [vmem:[#allocation7_spill] sm:$0xff] %v3785_v51  ;;  %v747_v52 = vor.u32 %v746_v45, %v742_v39  ;;  %v758_v53 = vrot.slane %v756_v48, 1  ;;  %v766_v57 = vshrl.u32 %v3771_v42, 16  ;;  %v770_v58 = vrot.slane %v768_v50, 1  ;;  %v3808_v3 = vld [vmem:[%s3708_s12 + $0x54] sm:$0xff]  }
  0x25   : > { %v763_v59 = vrot.slane %v761_v54, 1  ;;  %v773_v60 = vshll.u32 %v3792_v56, 16  ;;  %v780_v62 = vshll.u32 %v3789_v55, 16  ;;  %v3811_v4 = vld [vmem:[%s3708_s12 + $0x5c] ss:$0 sps:$4 sm:$0x11]  }
  0x26   : > { %v3805_v63 = vsel %vm692_vm0, %v747_v52, %v751_v49  ;;  %v759_v2 = vor.u32 %v758_v53, %v754_v47  ;;  %v771_v5 = vor.u32 %v770_v58, %v766_v57  ;;  %v778_v6 = vshrl.u32 %v3789_v55, 16  ;;  %v3824_v15 = vld [vmem:[%s3708_s12 + $0x60] sm:$0xff]   ;;  %v3831_v21 = vld [vmem:[%s3708_s12 + $0x68] ss:$0 sps:$4 sm:$0x11]   ;;  %v3845_v28 = vld [vmem:[%s3708_s12 + $0x6c] sm:$0xff]  }
  0x27   : > { %889 = vrot.lane.b32.xlu1 %v3768_v41, %s3581_s18  ;;  %5009 = vst [vmem:[#allocation8_spill] sm:$0xff] %v3805_v63  ;;  %v792_v7 = vshll.u32 %v3808_v3, 16  ;;  %v775_v9 = vrot.slane %v773_v60, 1  ;;  %v782_v11 = vrot.slane %v780_v62, 1  ;;  %v785_v14 = vshll.u32 %v3801_v61, 16  ;;  %v3858_v43 = vld [vmem:[%s3708_s12 + $0x78] sm:$0xff]  }
  0x28   : > { %977 = vrot.lane.b32.xlu0 %v3751_v30, %s3581_s18  ;;  %v3820_v8 = vsel %vm692_vm0, %v759_v2, %v763_v59  ;;  %v790_v18 = vshrl.u32 %v3808_v3, 16  ;;  %v797_v19 = vshll.u32 %v3811_v4, 16  ;;  %v804_v23 = vshll.u32 %v3824_v15, 16  ;;  %v3840_v27 = vld [vmem:[%s3708_s12 + $0x74] ss:$0 sps:$4 sm:$0x11]  }
  0x29   : > { %v794_v22 = vrot.slane %v792_v7, 1  ;;  %v3837_v24 = vsel %vm692_vm0, %v771_v5, %v775_v9  ;;  %v783_v25 = vor.u32 %v782_v11, %v778_v6  ;;  %v787_v26 = vrot.slane %v785_v14, 1  ;;  %v3868_v48 = vld [vmem:[%s3708_s12 + $0x80] ss:$0 sps:$4 sm:$0x11]   ;;  %v3458_v54 = vld [vmem:[%s4987_s3 + $0x28] sm:$0xff]  }
  0x2a   : > { %v799_v34 = vrot.slane %v797_v19, 1  ;;  %v802_v35 = vshrl.u32 %v3824_v15, 16  ;;  %v806_v36 = vrot.slane %v804_v23, 1  ;;  %v809_v39 = vshll.u32 %v3831_v21, 16  ;;  %v3875_v57 = vld [vmem:[%s3708_s12 + $0x84] sm:$0xff]   ;;  %v3878_v58 = vld [vmem:[%s3708_s12 + $0x90] sm:$0xff]   ;;  %3067 = vmatpush3.bf16.msra.mxu0 %v3458_v54 }
  0x2b   : > { %891 = vrot.lane.b32.xlu1 %v3785_v51, %s3581_s18  ;;  %v795_v33 = vor.u32 %v794_v22, %v790_v18  ;;  %v3851_v38 = vsel %vm692_vm0, %v783_v25, %v787_v26  ;;  %v816_v40 = vshll.u32 %v3845_v28, 16  ;;  %v821_v44 = vshll.u32 %v3840_v27, 16  ;;  %v3881_v59 = vld [vmem:[%s3708_s12 + $0x8c] ss:$0 sps:$4 sm:$0x11]   ;;  %v3459_v6 = vld [vmem:[%s4987_s3 + $0x60] sm:$0xff]  }
  0x2c   : > { %979 = vrot.lane.b32.xlu0 %v3757_v32, %s3581_s18  ;;  %v814_v47 = vshrl.u32 %v3845_v28, 16  ;;  %v807_v49 = vor.u32 %v806_v36, %v802_v35  ;;  %v811_v50 = vrot.slane %v809_v39, 1  ;;  %v828_v53 = vshll.u32 %v3858_v43, 16  ;;  %v3890_v5 = vld [vmem:[%s3708_s12 + $0x98] ss:$0 sps:$4 sm:$0x11]   ;;  %3068 = vmatprep.subr.bf16.mxu0 %v3459_v6 }
  0x2d   : > { %v3864_v45 = vsel %vm692_vm0, %v795_v33, %v799_v34  ;;  %v818_v52 = vrot.slane %v816_v40, 1  ;;  %v823_v60 = vrot.slane %v821_v44, 1  ;;  %v826_v62 = vshrl.u32 %v3858_v43, 16  ;;  %v3460_v7 = vld [vmem:[%s4987_s3 + $0x20] sm:$0xff]   ;;  %v3461_v23 = vld [vmem:[%s4987_s3 + $0x58] sm:$0xff]   ;;  %v4020_v51 = vld [vmem:[%s4987_s3 + $0xa8] sm:$0xff]  }
  0x2e   : > { %v833_v2 = vshll.u32 %v3868_v48, 16  ;;  %v3899_v9 = vsel %vm692_vm0, %v807_v49, %v811_v50  ;;  %v830_v14 = vrot.slane %v828_v53, 1  ;;  %v840_v18 = vshll.u32 %v3875_v57, 16  ;;  %v3910_v25 = vld [vmem:[%s3708_s12 + $0x9c] sm:$0xff]   ;;  %3069 = vmatpush3.bf16.msra.mxu0 %v3460_v7 }
  0x2f   : > { %893 = vrot.lane.b32.xlu1 %v3805_v63, %s3581_s18  ;;  %v819_v11 = vor.u32 %v818_v52, %v814_v47  ;;  %v845_v19 = vshll.u32 %v3881_v59, 16  ;;  %v852_v22 = vshll.u32 %v3878_v58, 16  ;;  %v838_v26 = vshrl.u32 %v3875_v57, 16  ;;  %3070 = vmatprep.subr.bf16.mxu0 %v3461_v23  ;;  %v3462_v34 = vld [vmem:[%s4987_s3 + $0x18] sm:$0xff]   ;;  %v3463_v52 = vld [vmem:[%s4987_s3 + $0x50] sm:$0xff]  }
  0x30   : > { %981 = vrot.lane.b32.xlu0 %v3771_v42, %s3581_s18  ;;  %v835_v33 = vrot.slane %v833_v2, 1  ;;  %v831_v36 = vor.u32 %v830_v14, %v826_v62  ;;  %v842_v39 = vrot.slane %v840_v18, 1  ;;  %v850_v40 = vshrl.u32 %v3878_v58, 16  ;;  %v3923_v44 = vld [vmem:[%s3708_s12 + $0xa4] ss:$0 sps:$4 sm:$0x11]  }
  0x31   : > { %v3919_v35 = vsel %vm692_vm0, %v819_v11, %v823_v60  ;;  %v847_v47 = vrot.slane %v845_v19, 1  ;;  %v854_v49 = vrot.slane %v852_v22, 1  ;;  %v857_v50 = vshll.u32 %v3890_v5, 16  ;;  %v3464_v60 = vld [vmem:[%s4987_s3 + $0x10] sm:$0xff]   ;;  %v3465_v62 = vld [vmem:[%s4987_s3 + $0x48] sm:$0xff]   ;;  %v3467_v19 = vld [vmem:[%s4987_s3 + $0x40] sm:$0xff]  }
  0x32   : > { %v862_v53 = vshrl.u32 %v3910_v25, 16  ;;  %v864_v54 = vshll.u32 %v3910_v25, 16  ;;  %3071 = vmatpush3.bf16.msra.mxu0 %v3462_v34  ;;  %v3942_v2 = vld [vmem:[%s3708_s12 + $0xa8] sm:$0xff]   ;;  %v3945_v6 = vsel %vm692_vm0, %v831_v36, %v835_v33  ;;  %v843_v7 = vor.u32 %v842_v39, %v838_v26  ;;  %v3948_v11 = vld [vmem:[%s3708_s12 + $0xb0] ss:$0 sps:$4 sm:$0x11]  }
  0x33   : > { %895 = vrot.lane.b32.xlu1 %v3820_v8, %s3581_s18  ;;  %3072 = vmatprep.subr.bf16.mxu0 %v3463_v52  ;;  %5010 = vst [vmem:[#allocation9_spill] sm:$0xff] %v3945_v6  ;;  %v3466_v14 = vld [vmem:[%s4987_s3 + $0x8] sm:$0xff]   ;;  %v869_v18 = vshll.u32 %v3923_v44, 16  ;;  %v876_v22 = vshll.u32 %v3942_v2, 16  ;;  %v3469_v23 = vld [vmem:[%s4987_s3 + $0xf8] sm:$0xff]   ;;  %v855_v33 = vor.u32 %v854_v49, %v850_v40  ;;  %v859_v34 = vrot.slane %v857_v50, 1 }
  0x34   : > { %983 = vrot.lane.b32.xlu0 %v3789_v55, %s3581_s18  ;;  %v3966_v26 = vsel %vm692_vm0, %v843_v7, %v847_v47  ;;  %v866_v36 = vrot.slane %v864_v54, 1  ;;  %v3971_v39 = vld [vmem:[%s4987_s3 + $0xb8] sm:$0xff]   ;;  %v3976_v52 = vld [vmem:[%s4987_s3 + $0xf0] sm:$0xff]   ;;  %3346 = vmatprep.subr.bf16.mxu1 %v3469_v23  ;;  %v874_v47 = vshrl.u32 %v3942_v2, 16  ;;  %v881_v49 = vshll.u32 %v3948_v11, 16  ;;  %v3468_v50 = vld [vmem:[%s4987_s3] sm:$0xff]  }
  0x35   : > { %5011 = vst [vmem:[#allocation10_spill] sm:$0xff] %v3966_v26  ;;  %v871_v40 = vrot.slane %v869_v18, 1  ;;  %v878_v54 = vrot.slane %v876_v22, 1  ;;  %v3996_v7 = vsel %vm692_vm0, %v855_v33, %v859_v34  ;;  %v4004_v0 = vld [vmem:[%s3708_s12 + $0xbc] ss:$0 sps:$4 sm:$0x11]   ;;  %3354 = vmatpush3.bf16.msra.mxu1 %v3971_v39 }
  0x36   : > { %3073 = vmatpush3.bf16.msra.mxu0 %v3464_v60  ;;  %v3979_v60 = vld [vmem:[%s3708_s12 + $0xb4] sm:$0xff]   ;;  %5012 = vst [vmem:[#allocation11_spill] sm:$0xff] %v3996_v7  ;;  %v867_v18 = vor.u32 %v866_v36, %v862_v53  ;;  %3347 = vmatprep.subr.bf16.mxu1 %v3976_v52  ;;  %v921_v53 = vrot.slane %v3714_v10, 1  ;;  %v1014_v33 = vshll.u32 %v4004_v0, 16  ;;  %v922_v34 = vrot.slane %v3729_v16, 1  ;;  %s436_s12 = sand.u32 1, %s3562_s26  }
  0x37   : > { %897 = vrot.lane.b32.xlu1 %v3837_v24, %s3581_s18  ;;  %3074 = vmatprep.subr.bf16.mxu0 %v3465_v62  ;;  %v3993_v62 = vld [vmem:[%s4987_s3 + $0xb0] sm:$0xff]   ;;  %v1009_v22 = vshll.u32 %v3979_v60, 16  ;;  %v883_v36 = vrot.slane %v881_v49, 1  ;;  %v879_v31 = vor.u32 %v878_v54, %v874_v47  ;;  %v928_v47 = vrot.slane %v3746_v29, 1  ;;  %v4059_v29 = vld [vmem:[%s4987_s3 + $0xd8] sm:$0xff]   ;;  %s2931_s9 = sshll.u32 %s436_s12, 9 }
  0x38   : > { %985 = vrot.lane.b32.xlu0 %v3808_v3, %s3581_s18  ;;  %v4023_v41 = vsel %vm692_vm0, %v867_v18, %v871_v40  ;;  %v4036_v40 = vsel %vm917_vm1, %v921_v53, %v922_v34  ;;  %v924_v49 = vrot.slane %v3717_v12, 1  ;;  %v925_v18 = vrot.slane %v3738_v20, 1  ;;  %s4773_s10 = scalar_lea.vmem [#allocation2], %s2931_s9  ;;  %s4939_s22 = scalar_lea.sflag [#allocation3], %s436_s12 }
  0x39   : > { %v1011_v63 = vrot.slane %v1009_v22, 1  ;;  %5013 = vst [vmem:[#allocation12_spill] sm:$0xff] %v4023_v41  ;;  %3355 = vmatpush3.bf16.msra.mxu1 %v3993_v62  ;;  %v934_v20 = vrot.slane %v3777_v46, 1  ;;  %v930_v53 = vrot.slane %v3751_v30, 1  ;;  %v4084_v46 = vld [vmem:[%s4987_s3 + $0xd0] sm:$0xff]   ;;  %s2792_s17 = sshll.u32 %s4773_s10, 4  ;;  %s4933_s17 = int_to_ptr.vmem [resolvable:$true] %s2792_s17 }
  0x3a   : > { %3075 = vmatpush3.bf16.msra.mxu0 %v3466_v14  ;;  %v4001_v14 = vld [vmem:[%s4987_s3 + $0xe8] sm:$0xff]   ;;  %v4077_v34 = vsel %vm917_vm1, %v924_v49, %v925_v18  ;;  %v936_v18 = vrot.slane %v3771_v42, 1  ;;  %s3502_s28 = scalar_lea.vmem %s4933_s17, 8192 }
  0x3b   : > { %899 = vrot.lane.b32.xlu1 %v3851_v38, %s3581_s18  ;;  %3076 = vmatprep.subr.bf16.mxu0 %v3467_v19  ;;  %v1007_v19 = vshrl.u32 %v3979_v60, 16  ;;  %p3503_p13 = scmp.ne.s32.totalorder %s4933_s17, %s3502_s28 }
  0x3c   : > { %987 = vrot.lane.b32.xlu0 %v3824_v15, %s3581_s18  ;;  %3348 = vmatprep.subr.bf16.mxu1 %v4001_v14 }
  0x3d   : > { %v1012_v16 = vor.u32 %v1011_v63, %v1007_v19  ;;  %v4046_v63 = vsel %vm692_vm0, %v879_v31, %v883_v36  ;;  %3356 = vmatpush3.bf16.msra.mxu1 %v4020_v51  ;;  %v4053_v19 = vld [vmem:[%s4987_s3 + $0xa0] sm:$0xff]   ;;  %v933_v31 = vrot.slane %v3757_v32, 1  ;;  %v931_v36 = vrot.slane %v3763_v37, 1  ;;  %p3504_p0 = pnand %p3503_p13, %p3670_p4 }
  0x3e   : > { %3077 = vmatpush3.bf16.msra.mxu0 %v3468_v50  ;;  %v1016_v50 = vrot.slane %v1014_v33, 1  ;;  %5014 = vst [vmem:[#allocation13_spill] sm:$0xff] %v4046_v63  ;;  %v4074_v33 = vld [vmem:[%s4987_s3 + $0x98] sm:$0xff]   ;;  %v939_v37 = vrot.slane %v3789_v55, 1 }
  0x3f   : > { %901 = vrot.lane.b32.xlu1 %v3864_v45, %s3581_s18  ;;  %3174 = vmatprep.subr.bf16.mxu0 %v3469_v23  ;;  %v927_v23 = vrot.slane %v3732_v17, 1  ;;  %v4107_v49 = vsel %vm917_vm1, %v930_v53, %v931_v36  ;;  %v946_v53 = vrot.slane %v3831_v21, 1  ;;  %v4137_v21 = vld [vmem:[%s4987_s3 + $0xc0] sm:$0xff]   ;;  %p3505_p1 = pneg %p3504_p0 }
  0x40   : > { %989 = vrot.lane.b32.xlu0 %v3845_v28, %s3581_s18  ;;  %v4043_v54 = vsel %vm692_vm0, %v1012_v16, %v1016_v50  ;;  %v4092_v50 = vld [vmem:[%s4987_s3 + $0x90] sm:$0xff]   ;;  %v4095_v16 = vsel %vm917_vm1, %v933_v31, %v934_v20  ;;  %v937_v31 = vrot.slane %v3792_v56, 1  ;;  %v945_v20 = vrot.slane %v3824_v15, 1 }
  0x41   : > { %v4066_v22 = vsel %vm917_vm1, %v927_v23, %v928_v47  ;;  %v940_v23 = vrot.slane %v3801_v61, 1  ;;  %v4104_v47 = vld [vmem:[%s4987_s3 + $0xc8] sm:$0xff]   ;;  %v942_v56 = vrot.slane %v3808_v3, 1 }
  0x42   : > { %v4123_v36 = vsel %vm917_vm1, %v936_v18, %v937_v31  ;;  %v948_v31 = vrot.slane %v3845_v28, 1 }
  0x43   : > { %903 = vrot.lane.b32.xlu1 %v3899_v9, %s3581_s18  ;;  %v4118_v61 = vsel %vm917_vm1, %v939_v37, %v940_v23  ;;  %v951_v37 = vrot.slane %v3858_v43, 1  ;;  %v952_v23 = vrot.slane %v3868_v48, 1 }
  0x44   : > { %991 = vrot.lane.b32.xlu0 %v3858_v43, %s3581_s18 }
  0x45   : > { %v4165_v48 = vsel %vm917_vm1, %v951_v37, %v952_v23  ;;  %v961_v23 = vrot.slane %v3923_v44, 1 }
  0x47   : > { %905 = vrot.lane.b32.xlu1 %v3919_v35, %s3581_s18 }
  0x48   : > { %993 = vrot.lane.b32.xlu0 %v3875_v57, %s3581_s18 }
  0x4b   : > { %907 = vrot.lane.b32.xlu1 %v3945_v6, %s3581_s18  ;;  %v4157_v6 = vld [vmem:[%s4987_s3 + $0x80] sm:$0xff]  }
  0x4c   : > { %995 = vrot.lane.b32.xlu0 %v3878_v58, %s3581_s18 }
  0x4f   : > { %909 = vrot.lane.b32.xlu1 %v3966_v26, %s3581_s18  ;;  %v949_v26 = vrot.slane %v3840_v27, 1  ;;  %v957_v27 = vrot.slane %v3878_v58, 1 }
  0x50   : > { %997 = vrot.lane.b32.xlu0 %v3910_v25, %s3581_s18 }
  0x53   : > { %911 = vrot.lane.b32.xlu1 %v3996_v7, %s3581_s18  ;;  %v4029_v7 = vld [vmem:[%s4987_s3 + $0xe0] sm:$0xff]  }
  0x54   : > { %999 = vrot.lane.b32.xlu0 %v3942_v2, %s3581_s18  ;;  %3349 = vmatprep.subr.bf16.mxu1 %v4029_v7 }
  0x55   : > { %3357 = vmatpush3.bf16.msra.mxu1 %v4053_v19 }
  0x56   : > { %3350 = vmatprep.subr.bf16.mxu1 %v4059_v29 }
  0x57   : > { %913 = vrot.lane.b32.xlu1 %v4023_v41, %s3581_s18  ;;  %v4131_v41 = vld [vmem:[%s4987_s3 + $0x88] sm:$0xff]  }
  0x58   : > { %1001 = vrot.lane.b32.xlu0 %v3979_v60, %s3581_s18 }
  0x59   : > { %3358 = vmatpush3.bf16.msra.mxu1 %v4074_v33 }
  0x5a   : > { %3351 = vmatprep.subr.bf16.mxu1 %v4084_v46 }
  0x5b   : > { %915 = vrot.lane.b32.xlu1 %v4046_v63, %s3581_s18  ;;  %v943_v63 = vrot.slane %v3811_v4, 1  ;;  %v4144_v4 = vsel %vm917_vm1, %v945_v20, %v946_v53  ;;  %v4170_v20 = vsel %vm917_vm1, %v948_v31, %v949_v26  ;;  %v954_v53 = vrot.slane %v3875_v57, 1 }
  0x5c   : > { %1021 = vrot.lane.b32.xlu0 %v4036_v40, %s3581_s18  ;;  %v960_v26 = vrot.slane %v3910_v25, 1  ;;  %v963_v31 = vrot.slane %v3942_v2, 1 }
  0x5d   : > { %3359 = vmatpush3.bf16.msra.mxu1 %v4092_v50  ;;  %v4149_v18 = vsel %vm917_vm1, %v942_v56, %v943_v63  ;;  %v958_v63 = vrot.slane %v3890_v5, 1  ;;  %v955_v56 = vrot.slane %v3881_v59, 1 }
  0x5e   : > { %3352 = vmatprep.subr.bf16.mxu1 %v4104_v47  ;;  %v4192_v59 = vsel %vm917_vm1, %v960_v26, %v961_v23 }
  0x5f   : > { %1023 = vrot.lane.b32.xlu1 %v4077_v34, %s3581_s18  ;;  %v4180_v37 = vsel %vm917_vm1, %v957_v27, %v958_v63  ;;  %v4183_v5 = vsel %vm917_vm1, %v954_v53, %v955_v56  ;;  %v964_v27 = vrot.slane %v3948_v11, 1  ;;  %v1018_v63 = vrot.slane %v3979_v60, 1 }
  0x60   : > { %1025 = vrot.lane.b32.xlu0 %v4066_v22, %s3581_s18  ;;  %v1019_v53 = vrot.slane %v4004_v0, 1  ;;  %v918_v56 = vrot.slane %v3688_v1, 1 }
  0x61   : > { %3360 = vmatpush3.bf16.msra.mxu1 %v4131_v41  ;;  %v4201_v44 = vsel %vm917_vm1, %v963_v31, %v964_v27 }
  0x62   : > { %3353 = vmatprep.subr.bf16.mxu1 %v4137_v21  ;;  %v4210_v11 = vsel %vm917_vm1, %v1018_v63, %v1019_v53 }
  0x63   : > { %1027 = vrot.lane.b32.xlu1 %v4107_v49, %s3581_s18 }
  0x64   : > { %1029 = vrot.lane.b32.xlu0 %v4095_v16, %s3581_s18 }
  0x65   : > { %3361 = vmatpush3.bf16.msra.mxu1 %v4157_v6 }
  0x67   : > { %1031 = vrot.lane.b32.xlu1 %v4123_v36, %s3581_s18 }
  0x68   : > { %1033 = vrot.lane.b32.xlu0 %v4118_v61, %s3581_s18 }
  0x6b   : > { %1035 = vrot.lane.b32.xlu1 %v4149_v18, %s3581_s18 }
  0x6c   : > { %1037 = vrot.lane.b32.xlu0 %v4144_v4, %s3581_s18 }
  0x6f   : > { %1039 = vrot.lane.b32.xlu1 %v4170_v20, %s3581_s18 }
  0x70   : > { %1041 = vrot.lane.b32.xlu0 %v4165_v48, %s3581_s18 }
  0x73   : > { %1043 = vrot.lane.b32.xlu1 %v4183_v5, %s3581_s18 }
  0x74   : > { %1045 = vrot.lane.b32.xlu0 %v4180_v37, %s3581_s18 }
  0x77   : > { %1047 = vrot.lane.b32.xlu1 %v4192_v59, %s3581_s18 }
  0x78   : > { %1073 = vrot.lane.b32.xlu0 %v4043_v54, %s3581_s18 }
  0x7b   : > { %1049 = vrot.lane.b32.xlu1 %v4201_v44, %s3581_s18 }
  0x7c   : > { %1075 = vrot.lane.b32.xlu0 %v3722_v13, %s3581_s18 }
  0x7f   : > { %1051 = vrot.lane.b32.xlu1 %v4210_v11, %s3581_s18  ;;  %s3582_s18 = smov [#allocation2]  }
  0x80   : > { %s3506_s23 = sshll.u32 %s3582_s18, 4  ;;  %s3507_s23 = int_to_ptr.vmem [resolvable:$false] %s3506_s23 }
  0x81   : > { %s3508_s0 = scalar_lea.vmem %s3507_s23, 16384  ;;  %p3509_p2 = scmp.lt.s32.totalorder %s4933_s17, %s3507_s23 }
  0x82   : > { %p3510_p3 = scmp.lt.s32.totalorder %s3508_s0, %s3502_s28 }
  0x84   : > { %p3511_p5 = por %p3510_p3, %p3509_p2 }
  0x86   : > { %p3512_p6 = pnand %p3511_p5, %p3505_p1 }
  0x8e   : > { %v972_v26 = vpop.permute.xlu0 %971  ;;  %v974_v23 = vpop.permute.xlu1 %973 }
  0x8f   : > { %v1131_v0 = vsel %vm1080_vm2, %v918_v56, %v972_v26  ;;  %v1135_v31 = vsel %vm1080_vm2, %v4036_v40, %v974_v23 }
  0x90   : > { %1624 = vmatprep.mubr.bf16.mxu0 %v1131_v0 }
  0x92   : > { %v886_v13 = vpop.permute.xlu0 %885 }
  0x93   : > { %v1082_v27 = vsel %vm1080_vm2, %v3688_v1, %v886_v13 }
  0x94   : > { %1625 = vmatmul.mubr.bf16.vlgmr.msra.gmra.mxu0 %v1082_v27 }
  0x95   : > { %3175 = vmatpush3.bf16.msra.mxu0 %v3971_v39  ;;  %1632 = vmatprep.mubr.bf16.mxu0 %v1135_v31  ;;  %v888_v53 = vpop.permute.xlu1 %887 }
  0x96   : > { %v976_v63 = vpop.permute.xlu0 %975  ;;  %3176 = vmatprep.subr.bf16.mxu0 %v3976_v52  ;;  %v1085_v26 = vsel %vm1080_vm2, %v3714_v10, %v888_v53 }
  0x97   : > { %v1139_v40 = vsel %vm1080_vm2, %v4077_v34, %v976_v63 }
  0x99   : > { %3177 = vmatpush3.bf16.msra.mxu0 %v3993_v62  ;;  %v890_v23 = vpop.permute.xlu1 %889 }
  0x9a   : > { %v978_v0 = vpop.permute.xlu0 %977  ;;  %3178 = vmatprep.subr.bf16.mxu0 %v4001_v14  ;;  %v4234_v10 = vsel %vm1080_vm2, %v3717_v12, %v890_v23 }
  0x9b   : > { %v1143_v13 = vsel %vm1080_vm2, %v4066_v22, %v978_v0 }
  0x9c   : > { %1633 = vmatmul.mubr.bf16.gmra.mxu0 %v1085_v26 }
  0x9d   : > { %1640 = vmatprep.mubr.bf16.mxu0 %v1139_v40  ;;  %3179 = vmatpush3.bf16.msra.mxu0 %v4020_v51  ;;  %v892_v52 = vpop.permute.xlu1 %891 }
  0x9e   : > { %v980_v39 = vpop.permute.xlu0 %979  ;;  %3180 = vmatprep.subr.bf16.mxu0 %v4029_v7  ;;  %v4245_v12 = vsel %vm1080_vm2, %v3732_v17, %v892_v52 }
  0xa1   : > { %3181 = vmatpush3.bf16.msra.mxu0 %v4053_v19  ;;  %v894_v14 = vpop.permute.xlu1 %893 }
  0xa2   : > { %v982_v62 = vpop.permute.xlu0 %981  ;;  %3182 = vmatprep.subr.bf16.mxu0 %v4059_v29  ;;  %v1147_v29 = vsel %vm1080_vm2, %v4107_v49, %v980_v39 }
  0xa4   : > { %1641 = vmatmul.mubr.bf16.gmra.mxu0 %v4234_v10 }
  0xa5   : > { %1648 = vmatprep.mubr.bf16.mxu0 %v1143_v13  ;;  %3183 = vmatpush3.bf16.msra.mxu0 %v4074_v33  ;;  %v896_v7 = vpop.permute.xlu1 %895 }
  0xa6   : > { %v984_v51 = vpop.permute.xlu0 %983  ;;  %3184 = vmatprep.subr.bf16.mxu0 %v4084_v46  ;;  %v4272_v53 = vsel %vm1080_vm2, %v3757_v32, %v896_v7 }
  0xa7   : > { %v1155_v26 = vsel %vm1080_vm2, %v4123_v36, %v984_v51 }
  0xa9   : > { %3185 = vmatpush3.bf16.msra.mxu0 %v4092_v50  ;;  %v898_v31 = vpop.permute.xlu1 %897  ;;  %v4259_v50 = vld [vmem:[%s4987_s3 + $0x118] sm:$0xff]  }
  0xaa   : > { %v986_v19 = vpop.permute.xlu0 %985  ;;  %3186 = vmatprep.subr.bf16.mxu0 %v4104_v47  ;;  %v1100_v33 = vsel %vm1080_vm2, %v3771_v42, %v898_v31  ;;  %v4263_v47 = vsel %vm1080_vm2, %v3751_v30, %v894_v14  ;;  %v1151_v42 = vsel %vm1080_vm2, %v4095_v16, %v982_v62 }
  0xab   : > { %1817 = vmatprep.mubr.bf16.mxu1 %v1100_v33  ;;  %v1159_v39 = vsel %vm1080_vm2, %v4118_v61, %v986_v19 }
  0xac   : > { %1649 = vmatmul.mubr.bf16.gmra.mxu0 %v4245_v12 }
  0xad   : > { %1656 = vmatprep.mubr.bf16.mxu0 %v1147_v29  ;;  %3187 = vmatpush3.bf16.msra.mxu0 %v4131_v41  ;;  %v900_v17 = vpop.permute.xlu1 %899 }
  0xae   : > { %v988_v46 = vpop.permute.xlu0 %987  ;;  %3188 = vmatprep.subr.bf16.mxu0 %v4137_v21  ;;  %v1103_v13 = vsel %vm1080_vm2, %v3789_v55, %v900_v17 }
  0xaf   : > { %v1163_v51 = vsel %vm1080_vm2, %v4149_v18, %v988_v46 }
  0xb1   : > { %3189 = vmatpush3.bf16.msra.mxu0 %v4157_v6  ;;  %v902_v63 = vpop.permute.xlu1 %901 }
  0xb2   : > { %v990_v27 = vpop.permute.xlu0 %989  ;;  %3306 = vmatprep.subr.bf16.mxu0 %v4259_v50  ;;  %v1106_v19 = vsel %vm1080_vm2, %v3808_v3, %v902_v63 }
  0xb4   : > { %1657 = vmatmul.mubr.bf16.gmra.mxu0 %v4263_v47 }
  0xb5   : > { %1664 = vmatprep.mubr.bf16.mxu0 %v1151_v42  ;;  %v904_v21 = vpop.permute.xlu1 %903  ;;  %v1167_v42 = vsel %vm1080_vm2, %v4144_v4, %v990_v27 }
  0xb6   : > { %v992_v41 = vpop.permute.xlu0 %991  ;;  %v1109_v3 = vsel %vm1080_vm2, %v3824_v15, %v904_v21 }
  0xb7   : > { %v1171_v63 = vsel %vm1080_vm2, %v4170_v20, %v992_v41 }
  0xb9   : > { %v906_v0 = vpop.permute.xlu1 %905 }
  0xba   : > { %v994_v30 = vpop.permute.xlu0 %993 }
  0xbc   : > { %1665 = vmatmul.mubr.bf16.gmra.mxu0 %v4272_v53 }
  0xbd   : > { %1672 = vmatprep.mubr.bf16.mxu0 %v1155_v26  ;;  %v908_v40 = vpop.permute.xlu1 %907 }
  0xbe   : > { %v996_v6 = vpop.permute.xlu0 %995 }
  0xbf   : > { %v1179_v21 = vsel %vm1080_vm2, %v4183_v5, %v996_v6 }
  0xc1   : > { %v910_v52 = vpop.permute.xlu1 %909 }
  0xc2   : > { %v998_v23 = vpop.permute.xlu0 %997 }
  0xc4   : > { %1673 = vmatmul.mubr.bf16.gmra.mxu0 %v1100_v33 }
  0xc5   : > { %1680 = vmatprep.mubr.bf16.mxu0 %v1159_v39  ;;  %v912_v32 = vpop.permute.xlu1 %911 }
  0xc6   : > { %v1000_v62 = vpop.permute.xlu0 %999 }
  0xc9   : > { %v914_v7 = vpop.permute.xlu1 %913 }
  0xca   : > { %v1002_v14 = vpop.permute.xlu0 %1001 }
  0xcc   : > { %1681 = vmatmul.mubr.bf16.gmra.mxu0 %v1103_v13 }
  0xcd   : > { %1688 = vmatprep.mubr.bf16.mxu0 %v1163_v51  ;;  %v916_v31 = vpop.permute.xlu1 %915 }
  0xce   : > { %v4283_v29 = vpop.permute.xlu0 %1021 }
  0xd1   : > { %v4291_v26 = vpop.permute.xlu1 %1023 }
  0xd2   : > { %v4287_v33 = vpop.permute.xlu0 %1025 }
  0xd4   : > { %1689 = vmatmul.mubr.bf16.gmra.mxu0 %v1106_v19 }
  0xd5   : > { %1696 = vmatprep.mubr.bf16.mxu0 %v1167_v42  ;;  %v4295_v17 = vpop.permute.xlu1 %1027 }
  0xd6   : > { %v1030_v55 = vpop.permute.xlu0 %1029 }
  0xd7   : > { %v1211_v46 = vsel %vm1080_vm2, %v3820_v8, %v1030_v55  ;;  %v1112_v8 = vsel %vm1080_vm2, %v3845_v28, %v906_v0  ;;  %v1183_v0 = vsel %vm1080_vm2, %v4180_v37, %v998_v23  ;;  %v3487_v55 = vld [vmem:[%s4987_s3 + $0x110] sm:$0xff]  }
  0xd8   : > { %1818 = vmatmul.mubr.bf16.vlgmr.msra.gmra.mxu1 %v1211_v46 }
  0xd9   : > { %1825 = vmatprep.mubr.bf16.mxu1 %v1103_v13  ;;  %v1032_v39 = vpop.permute.xlu1 %1031  ;;  %v1175_v13 = vsel %vm1080_vm2, %v4165_v48, %v994_v30 }
  0xda   : > { %v1215_v27 = vsel %vm1080_vm2, %v3837_v24, %v1032_v39  ;;  %v1034_v51 = vpop.permute.xlu0 %1033  ;;  %v1115_v24 = vsel %vm1080_vm2, %v3858_v43, %v908_v40  ;;  %v1187_v40 = vsel %vm1080_vm2, %v4192_v59, %v1000_v62 }
  0xdb   : > { %v1219_v15 = vsel %vm1080_vm2, %v3851_v38, %v1034_v51  ;;  %v1118_v38 = vsel %vm1080_vm2, %v3875_v57, %v910_v52  ;;  %v1191_v52 = vsel %vm1080_vm2, %v4201_v44, %v1002_v14  ;;  %v5017_v14 = vld [vmem:[#allocation5_spill] sm:$0xff]  ;;  %v3490_v51 = vld [vmem:[%s4989_s5 + $0x30] ss:$8 sps:$4 sm:$0xff]  }
  0xdc   : > { %1697 = vmatmul.mubr.bf16.gmra.mxu0 %v1109_v3 }
  0xdd   : > { %1704 = vmatprep.mubr.bf16.mxu0 %v1171_v63  ;;  %v1036_v41 = vpop.permute.xlu1 %1035  ;;  %v5020_v63 = vld [vmem:[#allocation12_spill] sm:$0xff] }
  0xde   : > { %v1223_v28 = vsel %vm1080_vm2, %v3864_v45, %v1036_v41  ;;  %v1038_v30 = vpop.permute.xlu0 %1037  ;;  %v1121_v45 = vsel %vm1080_vm2, %v3878_v58, %v912_v32  ;;  %v5015_v58 = vld [vmem:[#allocation9_spill] sm:$0xff]  ;;  %v5023_v41 = vld [vmem:[#allocation8_spill] sm:$0xff] }
  0xdf   : > { %v1227_v43 = vsel %vm1080_vm2, %v3899_v9, %v1038_v30  ;;  %v1124_v9 = vsel %vm1080_vm2, %v3910_v25, %v914_v7  ;;  %v1195_v7 = vsel %vm1080_vm2, %v5017_v14, %v4283_v29  ;;  %v5019_v29 = vld [vmem:[#allocation6_spill] sm:$0xff] }
  0xe0   : > { %1826 = vmatmul.mubr.bf16.gmra.mxu1 %v1215_v27  ;;  %v1199_v46 = vsel %vm1080_vm2, %v5019_v29, %v4291_v26  ;;  %v5021_v26 = vld [vmem:[#allocation7_spill] sm:$0xff] }
  0xe1   : > { %1833 = vmatprep.mubr.bf16.mxu1 %v1106_v19  ;;  %v1040_v6 = vpop.permute.xlu1 %1039  ;;  %v5016_v19 = vld [vmem:[#allocation10_spill] sm:$0xff] }
  0xe2   : > { %v1231_v57 = vsel %vm1080_vm2, %v3919_v35, %v1040_v6  ;;  %v1042_v23 = vpop.permute.xlu0 %1041  ;;  %v1127_v35 = vsel %vm1080_vm2, %v3942_v2, %v916_v31  ;;  %v5018_v2 = vld [vmem:[#allocation11_spill] sm:$0xff]  ;;  %v3488_v31 = vld [vmem:[%s4987_s3 + $0x108] sm:$0xff]  }
  0xe3   : > { %v1235_v32 = vsel %vm1080_vm2, %v5015_v58, %v1042_v23 }
  0xe4   : > { %1705 = vmatmul.mubr.bf16.gmra.mxu0 %v1112_v8 }
  0xe5   : > { %1712 = vmatprep.mubr.bf16.mxu0 %v1175_v13  ;;  %v1044_v62 = vpop.permute.xlu1 %1043 }
  0xe6   : > { %v1239_v25 = vsel %vm1080_vm2, %v5016_v19, %v1044_v62  ;;  %v1046_v42 = vpop.permute.xlu0 %1045 }
  0xe8   : > { %1834 = vmatmul.mubr.bf16.gmra.mxu1 %v1219_v15 }
  0xe9   : > { %1841 = vmatprep.mubr.bf16.mxu1 %v1109_v3  ;;  %v1048_v3 = vpop.permute.xlu1 %1047 }
  0xea   : > { %v1247_v39 = vsel %vm1080_vm2, %v5020_v63, %v1048_v3 }
  0xec   : > { %1713 = vmatmul.mubr.bf16.gmra.mxu0 %v1115_v24 }
  0xed   : > { %1720 = vmatprep.mubr.bf16.mxu0 %v1179_v21  ;;  %v1050_v13 = vpop.permute.xlu1 %1049  ;;  %v1207_v21 = vsel %vm1080_vm2, %v5023_v41, %v4295_v17  ;;  %v3493_v17 = vld [vmem:[%s4989_s5 + $0x20] ss:$8 sps:$4 sm:$0xff]  }
  0xf0   : > { %1842 = vmatmul.mubr.bf16.gmra.mxu1 %v1223_v28 }
  0xf1   : > { %1849 = vmatprep.mubr.bf16.mxu1 %v1112_v8  ;;  %v1203_v8 = vsel %vm1080_vm2, %v5021_v26, %v4287_v33  ;;  %v1052_v28 = vpop.permute.xlu1 %1051 }
  0xf4   : > { %1721 = vmatmul.mubr.bf16.gmra.mxu0 %v1118_v38 }
  0xf5   : > { %1728 = vmatprep.mubr.bf16.mxu0 %v1183_v0 }
  0xf8   : > { %1850 = vmatmul.mubr.bf16.gmra.mxu1 %v1227_v43 }
  0xf9   : > { %1857 = vmatprep.mubr.bf16.mxu1 %v1115_v24 }
  0xfc   : > { %1729 = vmatmul.mubr.bf16.gmra.mxu0 %v1121_v45 }
  0xfd   : > { %1736 = vmatprep.mubr.bf16.mxu0 %v1187_v40 }
 0x100   : > { %1858 = vmatmul.mubr.bf16.gmra.mxu1 %v1231_v57  ;;  %v3501_v57 = vld [vmem:[%s4989_s5 + $0x4] ss:$8 sps:$4 sm:$0xff]  }
 0x101   : > { %1865 = vmatprep.mubr.bf16.mxu1 %v1118_v38  ;;  %v1255_v38 = vsel %vm1080_vm2, %v4043_v54, %v1052_v28  ;;  %v3495_v54 = vld [vmem:[%s4989_s5 + $0x24] ss:$8 sps:$4 sm:$0xff]  }
 0x104   : > { %1737 = vmatmul.mubr.bf16.gmra.mxu0 %v1124_v9 }
 0x105   : > { %1744 = vmatprep.mubr.bf16.mxu0 %v1191_v52 }
 0x108   : > { %1866 = vmatmul.mubr.bf16.gmra.mxu1 %v1235_v32 }
 0x109   : > { %1873 = vmatprep.mubr.bf16.mxu1 %v1121_v45 }
 0x10c   : > { %1745 = vmatmul.mubr.bf16.gmra.mxu0 %v1127_v35 }
 0x10d   : > { %1785 = vmatprep.mubr.bf16.mxu0 %v4234_v10  ;;  %v1243_v10 = vsel %vm1080_vm2, %v5018_v2, %v1046_v42 }
 0x110   : > { %1874 = vmatmul.mubr.bf16.gmra.mxu1 %v1239_v25 }
 0x111   : > { %1881 = vmatprep.mubr.bf16.mxu1 %v1124_v9 }
 0x114   : > { %1786 = vmatmul.mubr.bf16.vlgmr.msra.gmra.mxu0 %v1195_v7 }
 0x115   : > { %3307 = vmatpush3.bf16.msra.mxu0 %v4259_v50  ;;  %1793 = vmatprep.mubr.bf16.mxu0 %v4245_v12  ;;  %v3489_v12 = vld [vmem:[%s4987_s3 + $0x100] sm:$0xff]   ;;  %v1074_v50 = vpop.permute.xlu0 %1073 }
 0x116   : > { %3308 = vmatprep.subr.bf16.mxu0 %v3487_v55  ;;  %v1258_v27 = vsel %vm1080_vm2, %v3979_v60, %v1074_v50  ;;  %v5022_v60 = vld [vmem:[#allocation13_spill] sm:$0xff] }
 0x117   : > { %v1251_v33 = vsel %vm1080_vm2, %v5022_v60, %v1050_v13 }
 0x118   : > { %1882 = vmatmul.mubr.bf16.gmra.mxu1 %v1243_v10 }
 0x119   : > { %1889 = vmatprep.mubr.bf16.mxu1 %v1127_v35  ;;  %3309 = vmatpush3.bf16.msra.mxu0 %v3487_v55  ;;  %v1076_v15 = vpop.permute.xlu0 %1075 }
 0x11a   : > { %3310 = vmatprep.subr.bf16.mxu0 %v3488_v31  ;;  %v1261_v24 = vsel %vm1080_vm2, %v3688_v1, %v1076_v15 }
 0x11c   : > { %1794 = vmatmul.mubr.bf16.gmra.mxu0 %v1199_v46 }
 0x11d   : > { %1801 = vmatprep.mubr.bf16.mxu0 %v4263_v47  ;;  %3311 = vmatpush3.bf16.msra.mxu0 %v3488_v31  ;;  %v3492_v47 = vld [vmem:[%s4989_s5 + $0x34] ss:$8 sps:$4 sm:$0xff]  }
 0x11e   : > { %3312 = vmatprep.subr.bf16.mxu0 %v3489_v12  ;;  %2239 = vmatprep.subr.bf16.mxu1 %v3492_v47 }
 0x11f   : > { %2240 = vmatpush1.bf16.msra.mxu1 %v3490_v51 }
 0x120   : > { %1890 = vmatmul.mubr.bf16.gmra.mxu1 %v1247_v39  ;;  %2241 = vmatprep.subr.bf16.mxu1 %v3495_v54 }
 0x121   : > { %1897 = vmatprep.mubr.bf16.mxu1 %v1258_v27  ;;  %3313 = vmatpush3.bf16.msra.mxu0 %v3489_v12 }
 0x123   : > { %2242 = vmatpush1.bf16.msra.mxu1 %v3493_v17 }
 0x124   : > { %1802 = vmatmul.mubr.bf16.gmra.mxu0 %v1203_v8 }
 0x125   : > { %1809 = vmatprep.mubr.bf16.mxu0 %v4272_v53  ;;  %v5024_v53 = vmov 0  }
 0x128   : > { %1898 = vmatmul.mubr.bf16.gmra.mxu1 %v1251_v33 }
 0x129   : > { %1905 = vmatprep.mubr.bf16.mxu1 %v1261_v24 }
 0x12c   : > { %1810 = vmatmul.mubr.bf16.gmra.mxu0 %v1207_v21 }
 0x12d   : > { %3314 = vmatprep.mubr.msk.bf16.mxu0 %vm1080_vm2, %v4077_v34  ;;  %v3498_v34 = vld [vmem:[%s4989_s5 + $0x14] ss:$8 sps:$4 sm:$0xff]  }
 0x12e   : > { %2243 = vmatprep.subr.bf16.mxu1 %v3498_v34 }
 0x130   : > { %1906 = vmatmul.mubr.bf16.gmra.mxu1 %v1255_v38 }
 0x131   : > { %2263 = vmatprep.mubr.bf16.mxu1 %v5024_v53 }
 0x134   : > { %3315 = vmatmul.mubr.msk.bf16.vlgmr.msra.gmra.mxu0 %vm1080_vm2, %v4066_v22  ;;  %v3496_v22 = vld [vmem:[%s4989_s5 + $0x10] ss:$8 sps:$4 sm:$0xff]  }
 0x135   : > { %3318 = vmatprep.mubr.msk.bf16.mxu0 %vm1080_vm2, %v4107_v49  ;;  %2244 = vmatpush1.bf16.msra.mxu1 %v3496_v22 }
 0x136   : > { %2245 = vmatprep.subr.bf16.mxu1 %v3501_v57 }
 0x13c   : > { %3319 = vmatmul.mubr.msk.bf16.gmra.mxu0 %vm1080_vm2, %v4095_v16 }
 0x13d   : > { %3322 = vmatprep.mubr.msk.bf16.mxu0 %vm1080_vm2, %v4123_v36 }
 0x144   : > { %3323 = vmatmul.mubr.msk.bf16.gmra.mxu0 %vm1080_vm2, %v4118_v61 }
 0x145   : > { %3326 = vmatprep.mubr.msk.bf16.mxu0 %vm1080_vm2, %v4149_v18 }
 0x14c   : > { %3327 = vmatmul.mubr.msk.bf16.gmra.mxu0 %vm1080_vm2, %v4144_v4 }
 0x14d   : > { %3330 = vmatprep.mubr.msk.bf16.mxu0 %vm1080_vm2, %v4170_v20 }
 0x154   : > { %v3078_v16 = vpop.f32.mrf.mxu0  ;;  %3331 = vmatmul.mubr.msk.bf16.gmra.mxu0 %vm1080_vm2, %v4165_v48 }
 0x155   : > { %3334 = vmatprep.mubr.msk.bf16.mxu0 %vm1080_vm2, %v4183_v5 }
 0x156   : > { %v3079_v49 = vpop.f32.mrf.mxu0 }
 0x157   : > { %v4416_v61 = vadd.f32 %v3079_v49, %v3078_v16 }
 0x158   : > { %v3081_v36 = vpop.f32.mrf.mxu0 }
 0x15a   : > { %v3082_v4 = vpop.f32.mrf.mxu0 }
 0x15b   : > { %v4418_v18 = vadd.f32 %v3082_v4, %v3081_v36 }
 0x15c   : > { %v3084_v20 = vpop.f32.mrf.mxu0  ;;  %3335 = vmatmul.mubr.msk.bf16.gmra.mxu0 %vm1080_vm2, %v4180_v37 }
 0x15d   : > { %3338 = vmatprep.mubr.msk.bf16.mxu0 %vm1080_vm2, %v4192_v59  ;;  %v3499_v59 = vld [vmem:[%s4989_s5] ss:$8 sps:$4 sm:$0xff]  }
 0x15e   : > { %v3085_v30 = vpop.f32.mrf.mxu0  ;;  %2246 = vmatpush1.bf16.msra.mxu1 %v3499_v59 }
 0x15f   : > { %v4424_v48 = vadd.f32 %v3085_v30, %v3084_v20 }
 0x160   : > { %v3087_v0 = vpop.f32.mrf.mxu0 }
 0x162   : > { %v3088_v43 = vpop.f32.mrf.mxu0 }
 0x163   : > { %v4426_v5 = vadd.f32 %v3088_v43, %v3087_v0 }
 0x164   : > { %v3090_v45 = vpop.f32.mrf.mxu0  ;;  %3339 = vmatmul.mubr.msk.bf16.gmra.mxu0 %vm1080_vm2, %v4201_v44 }
 0x165   : > { %3342 = vmatprep.mubr.msk.bf16.mxu0 %vm1080_vm2, %v4210_v11 }
 0x166   : > { %v3091_v6 = vpop.f32.mrf.mxu0 }
 0x167   : > { %v4432_v40 = vadd.f32 %v3091_v6, %v3090_v45 }
 0x168   : > { %v3093_v37 = vpop.f32.mrf.mxu0 }
 0x16a   : > { %v3094_v9 = vpop.f32.mrf.mxu0 }
 0x16b   : > { %v4440_v23 = vadd.f32 %v3094_v9, %v3093_v37 }
 0x16c   : > { %v3096_v44 = vpop.f32.mrf.mxu0  ;;  %3343 = vmatmul.mubr.msk.bf16.gmra.mxu0 %vm1080_vm2, %v918_v56 }
 0x16e   : > { %v3097_v11 = vpop.f32.mrf.mxu0 }
 0x16f   : > { %v4445_v52 = vadd.f32 %v3097_v11, %v3096_v44 }
 0x170   : > { %v3099_v58 = vpop.f32.mrf.mxu0 }
 0x172   : > { %v3100_v32 = vpop.f32.mrf.mxu0 }
 0x173   : > { %v4447_v35 = vadd.f32 %v3100_v32, %v3099_v58 }
 0x174   : > { %v3102_v62 = vpop.f32.mrf.mxu0 }
 0x176   : > { %v3103_v19 = vpop.f32.mrf.mxu0 }
 0x177   : > { %v4449_v25 = vadd.f32 %v3103_v19, %v3102_v62 }
 0x178   : > { %v3105_v14 = vpop.f32.mrf.mxu0 }
 0x17a   : > { %v3106_v7 = vpop.f32.mrf.mxu0 }
 0x17b   : > { %v4451_v42 = vadd.f32 %v3106_v7, %v3105_v14 }
 0x17c   : > { %v3108_v55 = vpop.f32.mrf.mxu0 }
 0x17e   : > { %v3109_v2 = vpop.f32.mrf.mxu0 }
 0x17f   : > { %v4453_v1 = vadd.f32 %v3109_v2, %v3108_v55 }
 0x180   : > { %v3111_v56 = vpop.f32.mrf.mxu0 }
 0x182   : > { %v3112_v10 = vpop.f32.mrf.mxu0 }
 0x183   : > { %v4455_v31 = vadd.f32 %v3112_v10, %v3111_v56 }
 0x184   : > { %v3114_v29 = vpop.f32.mrf.mxu0 }
 0x186   : > { %v3115_v46 = vpop.f32.mrf.mxu0 }
 0x187   : > { %v4457_v3 = vadd.f32 %v3115_v46, %v3114_v29 }
 0x188   : > { %v3117_v12 = vpop.f32.mrf.mxu0 }
 0x18a   : > { %v3118_v50 = vpop.f32.mrf.mxu0 }
 0x18b   : > { %v4459_v63 = vadd.f32 %v3118_v50, %v3117_v12 }
 0x18c   : > { %v3120_v39 = vpop.f32.mrf.mxu0 }
 0x18e   : > { %v3121_v27 = vpop.f32.mrf.mxu0 }
 0x18f   : > { %v4461_v26 = vadd.f32 %v3121_v27, %v3120_v39 }
 0x190   : > { %v3123_v8 = vpop.f32.mrf.mxu0 }
 0x192   : > { %v3124_v51 = vpop.f32.mrf.mxu0 }
 0x193   : > { %v4463_v47 = vadd.f32 %v3124_v51, %v3123_v8 }
 0x194   : > { %v3126_v13 = vpop.f32.mrf.mxu0 }
 0x196   : > { %v3127_v15 = vpop.f32.mrf.mxu0 }
 0x197   : > { %v4465_v60 = vadd.f32 %v3127_v15, %v3126_v13 }
 0x198   : > { %v3129_v33 = vpop.f32.mrf.mxu0  ;;  %v4467_v24 = vpop.f32.mrf.mxu1 }
 0x199   : > { %5025 = vst [vmem:[#allocation9_spill] sm:$0xff] %v4465_v60 }
 0x19a   : > { %v3130_v41 = vpop.f32.mrf.mxu0  ;;  %v4469_v21 = vpop.f32.mrf.mxu1 }
 0x19b   : > { %v4471_v28 = vadd.f32 %v3130_v41, %v3129_v33 }
 0x19c   : > { %v3132_v38 = vpop.f32.mrf.mxu0  ;;  %v4473_v17 = vpop.f32.mrf.mxu1 }
 0x19d   : > { %5026 = vst [vmem:[#allocation10_spill] sm:$0xff] %v4471_v28 }
 0x19e   : > { %v3133_v54 = vpop.f32.mrf.mxu0  ;;  %v4475_v22 = vpop.f32.mrf.mxu1 }
 0x19f   : > { %v4477_v34 = vadd.f32 %v3133_v54, %v3132_v38 }
 0x1a0   : > { %v3135_v16 = vpop.f32.mrf.mxu0  ;;  %v4479_v49 = vpop.f32.mrf.mxu1 }
 0x1a1   : > { %5027 = vst [vmem:[#allocation5_spill] sm:$0xff] %v4477_v34 }
 0x1a2   : > { %v3136_v36 = vpop.f32.mrf.mxu0  ;;  %v4481_v4 = vpop.f32.mrf.mxu1 }
 0x1a3   : > { %v4483_v20 = vadd.f32 %v3136_v36, %v3135_v16 }
 0x1a4   : > { %v3138_v30 = vpop.f32.mrf.mxu0  ;;  %v4485_v0 = vpop.f32.mrf.mxu1 }
 0x1a5   : > { %5028 = vst [vmem:[#allocation11_spill] sm:$0xff] %v4483_v20 }
 0x1a6   : > { %v3139_v43 = vpop.f32.mrf.mxu0  ;;  %v4487_v45 = vpop.f32.mrf.mxu1 }
 0x1a7   : > { %v4489_v6 = vadd.f32 %v3139_v43, %v3138_v30 }
 0x1a8   : > { %v3141_v37 = vpop.f32.mrf.mxu0  ;;  %v4491_v59 = vpop.f32.mrf.mxu1 }
 0x1a9   : > { %5029 = vst [vmem:[#allocation6_spill] sm:$0xff] %v4489_v6 }
 0x1aa   : > { %v3142_v57 = vpop.f32.mrf.mxu0  ;;  %v4493_v9 = vpop.f32.mrf.mxu1 }
 0x1ab   : > { %v4495_v44 = vadd.f32 %v3142_v57, %v3141_v37 }
 0x1ac   : > { %v3144_v11 = vpop.f32.mrf.mxu0  ;;  %v4497_v58 = vpop.f32.mrf.mxu1 }
 0x1ad   : > { %5030 = vst [vmem:[#allocation12_spill] sm:$0xff] %v4495_v44 }
 0x1ae   : > { %v3145_v32 = vpop.f32.mrf.mxu0  ;;  %v4499_v62 = vpop.f32.mrf.mxu1 }
 0x1af   : > { %v4501_v19 = vadd.f32 %v3145_v32, %v3144_v11 }
 0x1b0   : > { %v3147_v14 = vpop.f32.mrf.mxu0  ;;  %v4503_v7 = vpop.f32.mrf.mxu1 }
 0x1b1   : > { %5031 = vst [vmem:[#allocation7_spill] sm:$0xff] %v4501_v19 }
 0x1b2   : > { %v3148_v55 = vpop.f32.mrf.mxu0  ;;  %v4505_v2 = vpop.f32.mrf.mxu1 }
 0x1b3   : > { %v4507_v56 = vadd.f32 %v3148_v55, %v3147_v14 }
 0x1b4   : > { %v3150_v10 = vpop.f32.mrf.mxu0  ;;  %v4509_v29 = vpop.f32.mrf.mxu1 }
 0x1b5   : > { %5032 = vst [vmem:[#allocation13_spill] sm:$0xff] %v4507_v56 }
 0x1b6   : > { %v3151_v46 = vpop.f32.mrf.mxu0  ;;  %v4511_v12 = vpop.f32.mrf.mxu1 }
 0x1b7   : > { %v4513_v50 = vadd.f32 %v3151_v46, %v3150_v10 }
 0x1b8   : > { %v3153_v39 = vpop.f32.mrf.mxu0  ;;  %v4515_v27 = vpop.f32.mrf.mxu1 }
 0x1b9   : > { %5033 = vst [vmem:[#allocation8_spill] sm:$0xff] %v4513_v50  ;;  %5034 = vst [vmem:[#allocation14_spill] sm:$0xff] %v4515_v27 }
 0x1ba   : > { %v3154_v8 = vpop.f32.mrf.mxu0  ;;  %v4517_v51 = vpop.f32.mrf.mxu1 }
 0x1bb   : > { %5035 = vst [vmem:[#allocation15_spill] sm:$0xff] %v4517_v51  ;;  %v4519_v13 = vadd.f32 %v3154_v8, %v3153_v39 }
 0x1bc   : > { %v3156_v15 = vpop.f32.mrf.mxu0  ;;  %v4521_v33 = vpop.f32.mrf.mxu1 }
 0x1bd   : > { %5036 = vst [vmem:[#allocation16_spill] sm:$0xff] %v4519_v13  ;;  %5037 = vst [vmem:[#allocation17_spill] sm:$0xff] %v4521_v33 }
 0x1be   : > { %v3157_v41 = vpop.f32.mrf.mxu0  ;;  %v4523_v38 = vpop.f32.mrf.mxu1 }
 0x1bf   : > { %5038 = vst [vmem:[#allocation18_spill] sm:$0xff] %v4523_v38  ;;  %v4525_v54 = vadd.f32 %v3157_v41, %v3156_v15 }
 0x1c0   : > { %v3159_v16 = vpop.f32.mrf.mxu0  ;;  %v4527_v36 = vpop.f32.mrf.mxu1 }
 0x1c1   : > { %5039 = vst [vmem:[#allocation19_spill] sm:$0xff] %v4525_v54  ;;  %5040 = vst [vmem:[#allocation20_spill] sm:$0xff] %v4527_v36 }
 0x1c2   : > { %v3160_v30 = vpop.f32.mrf.mxu0  ;;  %v4529_v43 = vpop.f32.mrf.mxu1 }
 0x1c3   : > { %5041 = vst [vmem:[#allocation21_spill] sm:$0xff] %v4529_v43  ;;  %v4531_v37 = vadd.f32 %v3160_v30, %v3159_v16 }
 0x1c4   : > { %v3162_v57 = vpop.f32.mrf.mxu0  ;;  %v4533_v11 = vpop.f32.mrf.mxu1 }
 0x1c5   : > { %5042 = vst [vmem:[#allocation22_spill] sm:$0xff] %v4531_v37  ;;  %5043 = vst [vmem:[#allocation23_spill] sm:$0xff] %v4533_v11 }
 0x1c6   : > { %v3163_v32 = vpop.f32.mrf.mxu0  ;;  %v4537_v55 = vpop.f32.mrf.mxu1 }
 0x1c7   : > { %v4535_v14 = vadd.f32 %v3163_v32, %v3162_v57  ;;  %5045 = vst [vmem:[#allocation25_spill] sm:$0xff] %v4537_v55 }
 0x1c8   : > { %v3165_v10 = vpop.f32.mrf.mxu0  ;;  %v4541_v8 = vpop.f32.mrf.mxu1 }
 0x1c9   : > { %5044 = vst [vmem:[#allocation24_spill] sm:$0xff] %v4535_v14  ;;  %5047 = vst [vmem:[#allocation27_spill] sm:$0xff] %v4541_v8 }
 0x1ca   : > { %v3166_v46 = vpop.f32.mrf.mxu0  ;;  %v4545_v16 = vpop.f32.mrf.mxu1 }
 0x1cb   : > { %v4539_v39 = vadd.f32 %v3166_v46, %v3165_v10  ;;  %5049 = vst [vmem:[#allocation29_spill] sm:$0xff] %v4545_v16 }
 0x1cc   : > { %v3168_v15 = vpop.f32.mrf.mxu0  ;;  %v4549_v57 = vpop.f32.mrf.mxu1 }
 0x1cd   : > { %5046 = vst [vmem:[#allocation26_spill] sm:$0xff] %v4539_v39  ;;  %5051 = vst [vmem:[#allocation31_spill] sm:$0xff] %v4549_v57 }
 0x1ce   : > { %v3169_v41 = vpop.f32.mrf.mxu0  ;;  %v4551_v54 = vpop.f32.mrf.mxu1 }
 0x1cf   : > { %v4543_v13 = vadd.f32 %v3169_v41, %v3168_v15  ;;  %5052 = vst [vmem:[#allocation32_spill] sm:$0xff] %v4551_v54 }
 0x1d0   : > { %v3171_v30 = vpop.f32.mrf.mxu0  ;;  %v4553_v39 = vpop.f32.mrf.mxu1 }
 0x1d1   : > { %5048 = vst [vmem:[#allocation28_spill] sm:$0xff] %v4543_v13  ;;  %5053 = vst [vmem:[#allocation33_spill] sm:$0xff] %v4553_v39 }
 0x1d2   : > { %v3172_v37 = vpop.f32.mrf.mxu0  ;;  %v4555_v15 = vpop.f32.mrf.mxu1 }
 0x1d3   : > { %v4547_v50 = vadd.f32 %v3172_v37, %v3171_v30  ;;  %5054 = vst [vmem:[#allocation34_spill] sm:$0xff] %v4555_v15  ;;  %v4568_v15 = vld [vmem:[%s4988_s4] ss:$0 sm:$0xff] }
 0x1d4   : > { %v3190_v32 = vpop.f32.mrf.mxu0  ;;  %v4557_v6 = vpop.f32.mrf.mxu1  ;;  %v1635_v33 = vadd.f32 %v4424_v48, %v4568_v15  ;;  %v1627_v55 = vadd.f32 %v4416_v61, %v4568_v15  ;;  %v1630_v51 = vadd.f32 %v4418_v18, %v4568_v15  ;;  %v1651_v61 = vadd.f32 %v4445_v52, %v4568_v15 }
 0x1d5   : > { %5050 = vst [vmem:[#allocation30_spill] sm:$0xff] %v4547_v50  ;;  %5055 = vst [vmem:[#allocation35_spill] sm:$0xff] %v4557_v6  ;;  %v1643_v18 = vadd.f32 %v4432_v40, %v4568_v15 }
 0x1d6   : > { %v3191_v14 = vpop.f32.mrf.mxu0  ;;  %v4559_v50 = vpop.f32.mrf.mxu1 }
 0x1d7   : > { %5056 = vst [vmem:[#allocation36_spill] sm:$0xff] %v4559_v50  ;;  %v3192_v50 = vadd.f32 %v3191_v14, %v3190_v32 }
 0x1d8   : > { %v3193_v10 = vpop.f32.mrf.mxu0  ;;  %v4561_v8 = vpop.f32.mrf.mxu1 }
 0x1d9   : > { %5057 = vst [vmem:[#allocation37_spill] sm:$0xff] %v4561_v8  ;;  %v1788_v34 = vadd.f32 %v3192_v50, %v1627_v55 }
 0x1da   : > { %v3194_v46 = vpop.f32.mrf.mxu0  ;;  %v4563_v28 = vpop.f32.mrf.mxu1 }
 0x1db   : > { %5058 = vst [vmem:[#allocation38_spill] sm:$0xff] %v4563_v28 }
 0x1dc   : > { %v3196_v44 = vpop.f32.mrf.mxu0  ;;  %v4572_v60 = vpop.f32.mrf.mxu1 }
 0x1dd   : > { %5059 = vst [vmem:[#allocation39_spill] sm:$0xff] %v4572_v60 }
 0x1de   : > { %v3197_v56 = vpop.f32.mrf.mxu0  ;;  %v4580_v14 = vpop.f32.mrf.mxu1 }
 0x1df   : > { %v3198_v38 = vadd.f32 %v3197_v56, %v3196_v44  ;;  %v1638_v44 = vadd.f32 %v4426_v5, %v4568_v15  ;;  %v3195_v56 = vadd.f32 %v3194_v46, %v3193_v10 }
 0x1e0   : > { %v3199_v41 = vpop.f32.mrf.mxu0 }
 0x1e1   : > { %v1796_v28 = vadd.f32 %v3198_v38, %v1635_v33  ;;  %v1791_v43 = vadd.f32 %v3195_v56, %v1630_v51 }
 0x1e2   : > { %v3200_v13 = vpop.f32.mrf.mxu0 }
 0x1e3   : > { %v3201_v20 = vadd.f32 %v3200_v13, %v3199_v41 }
 0x1e4   : > { %v3202_v37 = vpop.f32.mrf.mxu0 }
 0x1e5   : > { %v1799_v48 = vadd.f32 %v3201_v20, %v1638_v44  ;;  %v4588_v20 = vpop.f32.mrf.mxu1 }
 0x1e6   : > { %v3203_v30 = vpop.f32.mrf.mxu0 }
 0x1e7   : > { %v3204_v5 = vadd.f32 %v3203_v30, %v3202_v37  ;;  %v4592_v40 = vpop.f32.mrf.mxu1  ;;  %v3225_v30 = vadd.f32 %v4487_v45, %v4485_v0  ;;  %v1662_v45 = vadd.f32 %v4451_v42, %v4568_v15  ;;  %v3228_v42 = vadd.f32 %v4493_v9, %v4491_v59 }
 0x1e8   : > { %v3205_v57 = vpop.f32.mrf.mxu0 }
 0x1ea   : > { %v3206_v16 = vpop.f32.mrf.mxu0 }
 0x1ec   : > { %v3208_v54 = vpop.f32.mrf.mxu0 }
 0x1ee   : > { %v3209_v19 = vpop.f32.mrf.mxu0 }
 0x1ef   : > { %v3210_v32 = vadd.f32 %v3209_v19, %v3208_v54 }
 0x1f0   : > { %v3211_v39 = vpop.f32.mrf.mxu0 }
 0x1f1   : > { %v1812_v52 = vadd.f32 %v3210_v32, %v1651_v61 }
 0x1f2   : > { %v3212_v6 = vpop.f32.mrf.mxu0 }
 0x1f3   : > { %v3213_v33 = vadd.f32 %v3212_v6, %v3211_v39  ;;  %v1646_v6 = vadd.f32 %v4440_v23, %v4568_v15  ;;  %v3216_v23 = vadd.f32 %v4469_v21, %v4467_v24 }
 0x1f4   : > { %v3316_v8 = vpop.f32.mrf.mxu0 }
 0x1f5   : > { %v1957_v27 = vadd.f32 %v3316_v8, %v1796_v28  ;;  %v1654_v28 = vadd.f32 %v4447_v35, %v4568_v15  ;;  %v3222_v35 = vadd.f32 %v4481_v4, %v4479_v49  ;;  %v1659_v4 = vadd.f32 %v4449_v25, %v4568_v15 }
 0x1f6   : > { %v1948_v11 = vpop.f32.mrf.mxu0 }
 0x1f7   : > { %v1949_v41 = vadd.f32 %v1948_v11, %v1788_v34  ;;  %v2077_v38 = vmax.f32 %v1957_v27, 0.0  ;;  %v3207_v34 = vadd.f32 %v3206_v16, %v3205_v57  ;;  %v1804_v11 = vadd.f32 %v3204_v5, %v1643_v18 }
 0x1f8   : > { %v3317_v13 = vpop.f32.mrf.mxu0  ;;  %v1815_v55 = vadd.f32 %v3213_v33, %v1654_v28  ;;  %v1667_v57 = vadd.f32 %v4453_v1, %v4568_v15  ;;  %v3219_v1 = vadd.f32 %v4475_v22, %v4473_v17  ;;  %v3234_v17 = vadd.f32 %v4505_v2, %v4503_v7 }
 0x1f9   : > { %v1960_v60 = vadd.f32 %v3317_v13, %v1799_v48  ;;  %v2075_v50 = vmax.f32 %v1949_v41, 0.0  ;;  %v1670_v48 = vadd.f32 %v4455_v31, %v4568_v15  ;;  %v4610_v13 = vpop.f32.mrf.mxu1  ;;  %v1683_v28 = vadd.f32 %v4461_v26, %v4568_v15 }
 0x1fa   : > { %v1951_v10 = vpop.f32.mrf.mxu0  ;;  %v1828_v0 = vadd.f32 %v3222_v35, %v1667_v57  ;;  %v1823_v18 = vadd.f32 %v3219_v1, %v1662_v45  ;;  %v1675_v2 = vadd.f32 %v4457_v3, %v4568_v15  ;;  %v3231_v26 = vadd.f32 %v4499_v62, %v4497_v58  ;;  %v5060_v62 = vld [vmem:[#allocation20_spill] sm:$0xff]  ;;  %v5062_v57 = vld [vmem:[#allocation5_spill] sm:$0xff] }
 0x1fb   : > { %v2078_v46 = vmax.f32 %v1960_v60, 0.0  ;;  %v1952_v36 = vadd.f32 %v1951_v10, %v1791_v43  ;;  %v1820_v10 = vadd.f32 %v3216_v23, %v1659_v4  ;;  %v1831_v33 = vadd.f32 %v3225_v30, %v1670_v48  ;;  %v4616_v31 = vpop.f32.mrf.mxu1  ;;  %v5063_v23 = vld [vmem:[#allocation14_spill] sm:$0xff] }
 0x1fc   : > { %v3320_v19 = vpop.f32.mrf.mxu0 }
 0x1fd   : > { %v2108_v51 = vpack.c.bf16 %v2078_v46, %v2077_v38  ;;  %v2076_v54 = vmax.f32 %v1952_v36, 0.0  ;;  %v1973_v43 = vadd.f32 %v3320_v19, %v1812_v52  ;;  %v1807_v36 = vadd.f32 %v3207_v34, %v1646_v6  ;;  %v4634_v52 = vpop.f32.mrf.mxu1 }
 0x1fe   : > { %v1964_v27 = vpop.f32.mrf.mxu0  ;;  %v3237_v19 = vadd.f32 %v4511_v12, %v4509_v29  ;;  %v1844_v29 = vadd.f32 %v3234_v17, %v1683_v28  ;;  %v1678_v12 = vadd.f32 %v4459_v63, %v4568_v15  ;;  %v1699_v63 = vadd.f32 %v5062_v57, %v4568_v15  ;;  %v5079_v57 = vld [vmem:[#allocation6_spill] sm:$0xff] }
 0x1ff   : > { %v2107_v60 = vpack.c.bf16 %v2076_v54, %v2075_v50  ;;  %v1965_v8 = vadd.f32 %v1964_v27, %v1804_v11  ;;  %v2081_v44 = vmax.f32 %v1973_v43, 0.0  ;;  %v1836_v11 = vadd.f32 %v3228_v42, %v1675_v2 }
 0x200   : > { %v3321_v39 = vpop.f32.mrf.mxu0 }
 0x201   : > { %v1976_v16 = vadd.f32 %v3321_v39, %v1815_v55  ;;  %3035 = vmatmul.mubr.msk.bf16.vlgmr.msra.gmra.mxu1 %vm1080_vm2, %v2107_v60  ;;  %v2079_v21 = vmax.f32 %v1965_v8, 0.0  ;;  %v4642_v55 = vpop.f32.mrf.mxu1  ;;  %v5061_v39 = vld [vmem:[#allocation21_spill] sm:$0xff] }
 0x202   : > { %v1967_v37 = vpop.f32.mrf.mxu0  ;;  %2273 = vmatprep.mubr.bf16.mxu1 %v5024_v53  ;;  %v3246_v35 = vadd.f32 %v5061_v39, %v5060_v62  ;;  %v5077_v62 = vld [vmem:[#allocation35_spill] sm:$0xff]  ;;  %v5078_v39 = vld [vmem:[#allocation36_spill] sm:$0xff] }
 0x203   : > { %v2082_v56 = vmax.f32 %v1976_v16, 0.0  ;;  %v1968_v49 = vadd.f32 %v1967_v37, %v1807_v36  ;;  %v1839_v36 = vadd.f32 %v3231_v26, %v1678_v12  ;;  %v5064_v37 = vld [vmem:[#allocation15_spill] sm:$0xff]  ;;  %v5073_v26 = vld [vmem:[#allocation34_spill] sm:$0xff] }
 0x204   : > { %v3324_v24 = vpop.f32.mrf.mxu0  ;;  %v3240_v30 = vadd.f32 %v5064_v37, %v5063_v23  ;;  %v5074_v12 = vld [vmem:[#allocation7_spill] sm:$0xff] }
 0x205   : > { %v4612_v32 = vpack.c.bf16 %v2082_v56, %v2081_v44  ;;  %v2080_v41 = vmax.f32 %v1968_v49, 0.0  ;;  %v1989_v25 = vadd.f32 %v3324_v24, %v1828_v0  ;;  %v5065_v56 = vld [vmem:[#allocation23_spill] sm:$0xff]  ;;  %v5066_v49 = vld [vmem:[#allocation25_spill] sm:$0xff] }
 0x206   : > { %v1980_v61 = vpop.f32.mrf.mxu0  ;;  %v3249_v4 = vadd.f32 %v5066_v49, %v5065_v56  ;;  %v5068_v0 = vld [vmem:[#allocation11_spill] sm:$0xff] }
 0x207   : > { %v2109_v5 = vpack.c.bf16 %v2080_v41, %v2079_v21  ;;  %v1981_v22 = vadd.f32 %v1980_v61, %v1820_v10  ;;  %v2085_v50 = vmax.f32 %v1989_v25, 0.0  ;;  %v5067_v21 = vld [vmem:[#allocation9_spill] sm:$0xff]  ;;  %v1702_v45 = vadd.f32 %v5068_v0, %v4568_v15  ;;  %v4660_v10 = vpop.f32.mrf.mxu1  ;;  %v5081_v37 = vld [vmem:[#allocation31_spill] sm:$0xff] }
 0x208   : > { %v3325_v38 = vpop.f32.mrf.mxu0  ;;  %v1691_v41 = vadd.f32 %v5067_v21, %v4568_v15  ;;  %v5069_v61 = vld [vmem:[#allocation17_spill] sm:$0xff]  ;;  %v5083_v21 = vld [vmem:[#allocation12_spill] sm:$0xff] }
 0x209   : > { %v1992_v46 = vadd.f32 %v3325_v38, %v1831_v33  ;;  %3036 = vmatmul.mubr.msk.bf16.gmra.mxu1 %vm1080_vm2, %v2108_v51  ;;  %v1686_v51 = vadd.f32 %v4463_v47, %v4568_v15  ;;  %v2083_v9 = vmax.f32 %v1981_v22, 0.0 }
 0x20a   : > { %v1983_v34 = vpop.f32.mrf.mxu0  ;;  %2283 = vmatprep.mubr.bf16.mxu1 %v5024_v53 }
 0x20b   : > { %v2086_v54 = vmax.f32 %v1992_v46, 0.0  ;;  %v1984_v7 = vadd.f32 %v1983_v34, %v1823_v18  ;;  %v1847_v47 = vadd.f32 %v3237_v19, %v1686_v51  ;;  %v1860_v46 = vadd.f32 %v3246_v35, %v1699_v63  ;;  %v5071_v18 = vld [vmem:[#allocation10_spill] sm:$0xff]  ;;  %v5072_v51 = vld [vmem:[#allocation33_spill] sm:$0xff] }
 0x20c   : > { %v3328_v59 = vpop.f32.mrf.mxu0  ;;  %v1694_v28 = vadd.f32 %v5071_v18, %v4568_v15  ;;  %v3261_v35 = vadd.f32 %v5078_v39, %v5077_v62  ;;  %v1707_v63 = vadd.f32 %v5079_v57, %v4568_v15 }
 0x20d   : > { %v4636_v6 = vpack.c.bf16 %v2086_v54, %v2085_v50  ;;  %v2084_v27 = vmax.f32 %v1984_v7, 0.0  ;;  %v2005_v3 = vadd.f32 %v3328_v59, %v1844_v29  ;;  %v1852_v50 = vadd.f32 %v3240_v30, %v1691_v41  ;;  %v4668_v7 = vpop.f32.mrf.mxu1  ;;  %v5082_v30 = vld [vmem:[#allocation32_spill] sm:$0xff] }
 0x20e   : > { %v1996_v60 = vpop.f32.mrf.mxu0  ;;  %v1863_v54 = vadd.f32 %v3249_v4, %v1702_v45  ;;  %v3258_v59 = vadd.f32 %v5073_v26, %v5072_v51  ;;  %v1710_v41 = vadd.f32 %v5083_v21, %v4568_v15  ;;  %v3273_v26 = vadd.f32 %v4616_v31, %v4610_v13  ;;  %v5090_v13 = vld [vmem:[#allocation16_spill] sm:$0xff] }
 0x20f   : > { %v4640_v43 = vpack.c.bf16 %v2084_v27, %v2083_v9  ;;  %v1997_v8 = vadd.f32 %v1996_v60, %v1836_v11  ;;  %v2089_v48 = vmax.f32 %v2005_v3, 0.0  ;;  %v1715_v60 = vadd.f32 %v5074_v12, %v4568_v15  ;;  %v5075_v3 = vld [vmem:[#allocation27_spill] sm:$0xff]  ;;  %v5076_v11 = vld [vmem:[#allocation29_spill] sm:$0xff]  ;;  %v3280_v56 = vpop.f32.mrf.mxu1 }
 0x210   : > { %v3329_v58 = vpop.f32.mrf.mxu0  ;;  %v5089_v12 = vld [vmem:[#allocation39_spill] sm:$0xff]  ;;  %v1726_v31 = vadd.f32 %v5090_v13, %v4568_v15 }
 0x211   : > { %v2008_v16 = vadd.f32 %v3329_v58, %v1847_v47  ;;  %3037 = vmatmul.mubr.msk.bf16.gmra.mxu1 %vm1080_vm2, %v2109_v5  ;;  %v5070_v5 = vld [vmem:[#allocation18_spill] sm:$0xff]  ;;  %v2087_v38 = vmax.f32 %v1997_v8, 0.0  ;;  %v3252_v47 = vadd.f32 %v5076_v11, %v5075_v3 }
 0x212   : > { %v1999_v44 = vpop.f32.mrf.mxu0  ;;  %2293 = vmatprep.mubr.bf16.mxu1 %v5024_v53  ;;  %v3243_v25 = vadd.f32 %v5070_v5, %v5069_v61 }
 0x213   : > { %v2090_v1 = vmax.f32 %v2008_v16, 0.0  ;;  %v2000_v24 = vadd.f32 %v1999_v44, %v1839_v36  ;;  %v3255_v44 = vadd.f32 %v5082_v30, %v5081_v37  ;;  %v1868_v5 = vadd.f32 %v3252_v47, %v1707_v63 }
 0x214   : > { %v3332_v33 = vpop.f32.mrf.mxu0  ;;  %v1855_v29 = vadd.f32 %v3243_v25, %v1694_v28 }
 0x215   : > { %v4662_v17 = vpack.c.bf16 %v2090_v1, %v2089_v48  ;;  %v2088_v22 = vmax.f32 %v2000_v24, 0.0  ;;  %v2021_v19 = vadd.f32 %v3332_v33, %v1860_v46  ;;  %v1876_v24 = vadd.f32 %v3258_v59, %v1715_v60  ;;  %v3281_v33 = vpop.f32.mrf.mxu1 }
 0x216   : > { %v2012_v42 = vpop.f32.mrf.mxu0  ;;  %v1871_v28 = vadd.f32 %v3255_v44, %v1710_v41  ;;  %v3267_v60 = vadd.f32 %v4580_v14, %v5089_v12  ;;  %v5091_v44 = vld [vmem:[#allocation28_spill] sm:$0xff]  ;;  %v2488_v12 = vld [vmem:[%s4757_s25] sm:$0xff] }
 0x217   : > { %v4666_v34 = vpack.c.bf16 %v2088_v22, %v2087_v38  ;;  %v2013_v9 = vadd.f32 %v2012_v42, %v1852_v50  ;;  %v2093_v8 = vmax.f32 %v2021_v19, 0.0  ;;  %v3270_v22 = vadd.f32 %v4592_v40, %v4588_v20  ;;  %v5084_v42 = vld [vmem:[#allocation19_spill] sm:$0xff]  ;;  %v5085_v50 = vld [vmem:[#allocation37_spill] sm:$0xff]  ;;  %v3283_v3 = vpop.f32.mrf.mxu1 }
 0x218   : > { %v3333_v2 = vpop.f32.mrf.mxu0  ;;  %v1731_v19 = vadd.f32 %v5084_v42, %v4568_v15  ;;  %v1887_v14 = vadd.f32 %v3267_v60, %v1726_v31  ;;  %v2521_v31 = vunpack.c.h.bf16 %v2488_v12 }
 0x219   : > { %v2024_v27 = vadd.f32 %v3333_v2, %v1863_v54  ;;  %3038 = vmatmul.mubr.msk.bf16.gmra.mxu1 %vm1080_vm2, %v4612_v32  ;;  %v5080_v32 = vld [vmem:[#allocation13_spill] sm:$0xff]  ;;  %v2091_v4 = vmax.f32 %v2013_v9, 0.0  ;;  %v5086_v54 = vld [vmem:[#allocation38_spill] sm:$0xff]  ;;  %v5087_v9 = vld [vmem:[#allocation8_spill] sm:$0xff]  ;;  %v3284_v63 = vpop.f32.mrf.mxu1 }
 0x21a   : > { %v2015_v58 = vpop.f32.mrf.mxu0  ;;  %2303 = vmatprep.mubr.bf16.mxu1 %v5024_v53  ;;  %v1718_v23 = vadd.f32 %v5080_v32, %v4568_v15  ;;  %v3264_v2 = vadd.f32 %v5086_v54, %v5085_v50  ;;  %v1892_v39 = vadd.f32 %v3270_v22, %v1731_v19 }
 0x21b   : > { %v2094_v16 = vmax.f32 %v2024_v27, 0.0  ;;  %v2016_v36 = vadd.f32 %v2015_v58, %v1855_v29  ;;  %v1723_v27 = vadd.f32 %v5087_v9, %v4568_v15 }
 0x21c   : > { %v3336_v49 = vpop.f32.mrf.mxu0  ;;  %v1879_v25 = vadd.f32 %v3261_v35, %v1718_v23  ;;  %v3282_v23 = vadd.f32 %v3281_v33, %v3280_v56  ;;  %v5092_v56 = vld [vmem:[#allocation24_spill] sm:$0xff] }
 0x21d   : > { %v4687_v48 = vpack.c.bf16 %v2094_v16, %v2093_v8  ;;  %v2092_v1 = vmax.f32 %v2016_v36, 0.0  ;;  %v2037_v61 = vadd.f32 %v3336_v49, %v1876_v24  ;;  %v1884_v36 = vadd.f32 %v3264_v2, %v1723_v27 }
 0x21e   : > { %v2028_v0 = vpop.f32.mrf.mxu0  ;;  %v1747_v49 = vadd.f32 %v5091_v44, %v4568_v15  ;;  %v3285_v24 = vadd.f32 %v3284_v63, %v3283_v3  ;;  %v2490_v63 = vld [vmem:[%s4757_s25 + $0x10] sm:$0xff] }
 0x21f   : > { %v4691_v45 = vpack.c.bf16 %v2092_v1, %v2091_v4  ;;  %v2029_v46 = vadd.f32 %v2028_v0, %v1868_v5  ;;  %v2097_v59 = vmax.f32 %v2037_v61, 0.0  ;;  %v3276_v4 = vadd.f32 %v4642_v55, %v4634_v52  ;;  %v5093_v5 = vld [vmem:[#allocation30_spill] sm:$0xff] }
 0x220   : > { %v3337_v38 = vpop.f32.mrf.mxu0  ;;  %v1739_v61 = vadd.f32 %v5092_v56, %v4568_v15  ;;  %v1908_v55 = vadd.f32 %v3282_v23, %v1747_v49 }
 0x221   : > { %v2040_v18 = vadd.f32 %v3337_v38, %v1879_v25  ;;  %3039 = vmatmul.mubr.msk.bf16.gmra.mxu1 %vm1080_vm2, %v4640_v43  ;;  %v5088_v43 = vld [vmem:[#allocation22_spill] sm:$0xff]  ;;  %v2095_v47 = vmax.f32 %v2029_v46, 0.0  ;;  %v3279_v25 = vadd.f32 %v4668_v7, %v4660_v10 }
 0x222   : > { %v2031_v51 = vpop.f32.mrf.mxu0  ;;  %2313 = vmatprep.mubr.bf16.mxu1 %v5024_v53  ;;  %v1734_v29 = vadd.f32 %v5088_v43, %v4568_v15  ;;  %v5094_v46 = vld [vmem:[#allocation26_spill] sm:$0xff]  ;;  %v1900_v50 = vadd.f32 %v3276_v4, %v1739_v61  ;;  %v2524_v4 = vunpack.c.l.bf16 %v2490_v63  ;;  %v2525_v61 = vunpack.c.h.bf16 %v2490_v63 }
 0x223   : > { %v2098_v20 = vmax.f32 %v2040_v18, 0.0  ;;  %v2032_v40 = vadd.f32 %v2031_v51, %v1871_v28  ;;  %v1742_v18 = vadd.f32 %v5094_v46, %v4568_v15 }
 0x224   : > { %v3340_v11 = vpop.f32.mrf.mxu0  ;;  %v1895_v57 = vadd.f32 %v3273_v26, %v1734_v29 }
 0x225   : > { %v2118_v58 = vpack.c.bf16 %v2098_v20, %v2097_v59  ;;  %v2096_v62 = vmax.f32 %v2032_v40, 0.0  ;;  %v2053_v16 = vadd.f32 %v3340_v11, %v1892_v39  ;;  %v1903_v10 = vadd.f32 %v3279_v25, %v1742_v18 }
 0x226   : > { %v2044_v35 = vpop.f32.mrf.mxu0 }
 0x227   : > { %v2117_v8 = vpack.c.bf16 %v2096_v62, %v2095_v47  ;;  %v2045_v37 = vadd.f32 %v2044_v35, %v1884_v36  ;;  %v2101_v21 = vmax.f32 %v2053_v16, 0.0  ;;  %v2520_v47 = vunpack.c.l.bf16 %v2488_v12  ;;  %v2489_v62 = vld [vmem:[%s4757_s25 + $0x8] sm:$0xff] }
 0x228   : > { %v3341_v32 = vpop.f32.mrf.mxu0  ;;  %v2523_v23 = vunpack.c.h.bf16 %v2489_v62 }
 0x229   : > { %v2056_v30 = vadd.f32 %v3341_v32, %v1895_v57  ;;  %3040 = vmatmul.mubr.msk.bf16.gmra.mxu1 %vm1080_vm2, %v4636_v6  ;;  %v1750_v6 = vadd.f32 %v5093_v5, %v4568_v15  ;;  %v2099_v38 = vmax.f32 %v2045_v37, 0.0  ;;  %v2522_v57 = vunpack.c.l.bf16 %v2489_v62 }
 0x22a   : > { %v2047_v1 = vpop.f32.mrf.mxu0  ;;  %2323 = vmatprep.mubr.bf16.mxu1 %v5024_v53 }
 0x22b   : > { %v2102_v41 = vmax.f32 %v2056_v30, 0.0  ;;  %v2048_v0 = vadd.f32 %v2047_v1, %v1887_v14  ;;  %v1911_v54 = vadd.f32 %v3285_v24, %v1750_v6 }
 0x22c   : > { %v3344_v33 = vpop.f32.mrf.mxu0 }
 0x22d   : > { %v2120_v22 = vpack.c.bf16 %v2102_v41, %v2101_v21  ;;  %v2100_v52 = vmax.f32 %v2048_v0, 0.0  ;;  %v2069_v19 = vadd.f32 %v3344_v33, %v1908_v55  ;;  %v2491_v0 = vld [vmem:[%s4757_s25 + $0x18] sm:$0xff] }
 0x22e   : > { %v2060_v28 = vpop.f32.mrf.mxu0 }
 0x22f   : > { %v2119_v42 = vpack.c.bf16 %v2100_v52, %v2099_v38  ;;  %v2061_v51 = vadd.f32 %v2060_v28, %v1900_v50  ;;  %v2105_v59 = vmax.f32 %v2069_v19, 0.0  ;;  %v2492_v28 = vld [vmem:[%s4757_s25 + $0x20] sm:$0xff]  ;;  %v2527_v19 = vunpack.c.h.bf16 %v2491_v0 }
 0x230   : > { %v3345_v2 = vpop.f32.mrf.mxu0 }
 0x231   : > { %v2072_v26 = vadd.f32 %v3345_v2, %v1911_v54  ;;  %3041 = vmatmul.mubr.msk.bf16.gmra.mxu1 %vm1080_vm2, %v4666_v34  ;;  %v2103_v9 = vmax.f32 %v2061_v51, 0.0 }
 0x232   : > { %v2063_v7 = vpop.f32.mrf.mxu0  ;;  %2333 = vmatprep.mubr.bf16.mxu1 %v5024_v53 }
 0x233   : > { %v2106_v20 = vmax.f32 %v2072_v26, 0.0  ;;  %v2064_v40 = vadd.f32 %v2063_v7, %v1903_v10  ;;  %v2528_v10 = vunpack.c.l.bf16 %v2492_v28 }
 0x235   : > { %v2122_v15 = vpack.c.bf16 %v2106_v20, %v2105_v59  ;;  %v2104_v27 = vmax.f32 %v2064_v40, 0.0 }
 0x237   : > { %v2121_v43 = vpack.c.bf16 %v2104_v27, %v2103_v9  ;;  %v2493_v9 = vld [vmem:[%s4757_s25 + $0x28] sm:$0xff]  ;;  %v2529_v27 = vunpack.c.h.bf16 %v2492_v28 }
 0x239   : > { %3042 = vmatmul.mubr.msk.bf16.gmra.mxu1 %vm1080_vm2, %v4662_v17  ;;  %v2133_v17 = vlaneseq }
 0x23a   : > { %2343 = vmatprep.mubr.bf16.mxu1 %v5024_v53 }
 0x23b   : > { %v2134_v34 = vshrl.u32 %v2133_v17, 7 }
 0x241   : > { %3043 = vmatmul.mubr.msk.bf16.gmra.mxu1 %vm1080_vm2, %v4691_v45  ;;  %v2131_v45 = vld [vmem:[%s4990_s6] sm:$0x3] }
 0x242   : > { %2353 = vmatprep.mubr.bf16.mxu1 %v5024_v53 }
 0x249   : > { %3044 = vmatmul.mubr.msk.bf16.gmra.mxu1 %vm1080_vm2, %v4687_v48  ;;  %v2135_v48 = vsub.s32 0, %v2134_v34 }
 0x24a   : > { %2363 = vmatprep.mubr.bf16.mxu1 %v5024_v53 }
 0x24b   : > { %v4759_v29 = vrot.slane %v2131_v45, %v2135_v48 }
 0x251   : > { %3045 = vmatmul.mubr.msk.bf16.gmra.mxu1 %vm1080_vm2, %v2117_v8 }
 0x252   : > { %2373 = vmatprep.mubr.bf16.mxu1 %v5024_v53 }
 0x259   : > { %3046 = vmatmul.mubr.msk.bf16.gmra.mxu1 %vm1080_vm2, %v2118_v58 }
 0x25a   : > { %2383 = vmatprep.mubr.bf16.mxu1 %v5024_v53 }
 0x261   : > { %3047 = vmatmul.mubr.msk.bf16.gmra.mxu1 %vm1080_vm2, %v2119_v42 }
 0x262   : > { %2393 = vmatprep.mubr.bf16.mxu1 %v5024_v53 }
 0x269   : > { %3048 = vmatmul.mubr.msk.bf16.gmra.mxu1 %vm1080_vm2, %v2120_v22  ;;  %v2526_v22 = vunpack.c.l.bf16 %v2491_v0 }
 0x26a   : > { %2403 = vmatprep.mubr.bf16.mxu1 %v5024_v53 }
 0x271   : > { %3049 = vmatmul.mubr.msk.bf16.gmra.mxu1 %vm1080_vm2, %v2121_v43 }
 0x272   : > { %2413 = vmatprep.mubr.bf16.mxu1 %v5024_v53  ;;  %v2139_v53 = vsub.s32 1, %v2134_v34 }
 0x274   : > { %v4762_v60 = vrot.slane %v2131_v45, %v2139_v53  ;;  %v2530_v53 = vunpack.c.l.bf16 %v2493_v9 }
 0x279   : > { %3050 = vmatmul.mubr.msk.bf16.gmra.mxu1 %vm1080_vm2, %v2122_v15 }
 0x2c1   : > { %v2265_v3 = vpop.f32.mrf.mxu1 }
 0x2c2   : > { %v2266_v11 = vadd.f32 %v2265_v3, %v4759_v29 }
 0x2c3   : > { %v2267_v58 = vpop.f32.mrf.mxu1 }
 0x2c4   : > { %v2424_v39 = vmax.f32 %v2266_v11, 0.0  ;;  %v2268_v13 = vadd.f32 %v2267_v58, %v4762_v60  ;;  %v2494_v58 = vld [vmem:[%s4757_s25 + $0x30] sm:$0xff] }
 0x2c5   : > { %v2269_v35 = vpop.f32.mrf.mxu1 }
 0x2c6   : > { %v2584_v8 = vadd.f32 %v2520_v47, %v2424_v39  ;;  %v2425_v16 = vmax.f32 %v2268_v13, 0.0  ;;  %v2270_v36 = vadd.f32 %v2269_v35, %v4759_v29  ;;  %v2531_v39 = vunpack.c.h.bf16 %v2493_v9 }
 0x2c7   : > { %v2271_v32 = vpop.f32.mrf.mxu1 }
 0x2c8   : > { %v2648_v37 = vmax.f32 %v2584_v8, 0.0  ;;  %v2585_v30 = vadd.f32 %v2521_v31, %v2425_v16  ;;  %v2426_v14 = vmax.f32 %v2270_v36, 0.0  ;;  %v2272_v44 = vadd.f32 %v2271_v32, %v4762_v60 }
 0x2c9   : > { %v2275_v49 = vpop.f32.mrf.mxu1  ;;  %v2532_v36 = vunpack.c.l.bf16 %v2494_v58 }
 0x2ca   : > { %2712 = vst [vmem:[%s4773_s10] sm:$0xff] %v2648_v37  ;;  %v2649_v1 = vmax.f32 %v2585_v30, 0.0  ;;  %v2586_v24 = vadd.f32 %v2522_v57, %v2426_v14  ;;  %v2427_v21 = vmax.f32 %v2272_v44, 0.0  ;;  %v2276_v41 = vadd.f32 %v2275_v49, %v4759_v29  ;;  %v2495_v37 = vld [vmem:[%s4757_s25 + $0x38] sm:$0xff] }
 0x2cb   : > { %v2277_v56 = vpop.f32.mrf.mxu1  ;;  %v2533_v14 = vunpack.c.h.bf16 %v2494_v58 }
 0x2cc   : > { %2713 = vst [vmem:[%s4773_s10 + $0x8] sm:$0xff] %v2649_v1  ;;  %v2650_v5 = vmax.f32 %v2586_v24, 0.0  ;;  %v2587_v6 = vadd.f32 %v2523_v23, %v2427_v21  ;;  %v2428_v25 = vmax.f32 %v2276_v41, 0.0  ;;  %v2278_v33 = vadd.f32 %v2277_v56, %v4762_v60 }
 0x2cd   : > { %v2279_v38 = vpop.f32.mrf.mxu1  ;;  %v2534_v21 = vunpack.c.l.bf16 %v2495_v37 }
 0x2ce   : > { %2714 = vst [vmem:[%s4773_s10 + $0x10] sm:$0xff] %v2650_v5  ;;  %v2651_v52 = vmax.f32 %v2587_v6, 0.0  ;;  %v2588_v55 = vadd.f32 %v2524_v4, %v2428_v25  ;;  %v2429_v46 = vmax.f32 %v2278_v33, 0.0  ;;  %v2280_v18 = vadd.f32 %v2279_v38, %v4759_v29  ;;  %v2496_v5 = vld [vmem:[%s4757_s25 + $0x40] sm:$0xff] }
 0x2cf   : > { %v2281_v42 = vpop.f32.mrf.mxu1  ;;  %v2535_v25 = vunpack.c.h.bf16 %v2495_v37 }
 0x2d0   : > { %2715 = vst [vmem:[%s4773_s10 + $0x18] sm:$0xff] %v2651_v52  ;;  %v2652_v50 = vmax.f32 %v2588_v55, 0.0  ;;  %v2589_v54 = vadd.f32 %v2525_v61, %v2429_v46  ;;  %v2430_v2 = vmax.f32 %v2280_v18, 0.0  ;;  %v2282_v51 = vadd.f32 %v2281_v42, %v4762_v60 }
 0x2d1   : > { %v2285_v26 = vpop.f32.mrf.mxu1  ;;  %v2536_v46 = vunpack.c.l.bf16 %v2496_v5 }
 0x2d2   : > { %2716 = vst [vmem:[%s4773_s10 + $0x20] sm:$0xff] %v2652_v50  ;;  %v2653_v7 = vmax.f32 %v2589_v54, 0.0  ;;  %v2590_v59 = vadd.f32 %v2526_v22, %v2430_v2  ;;  %v2431_v20 = vmax.f32 %v2282_v51, 0.0  ;;  %v2286_v40 = vadd.f32 %v2285_v26, %v4759_v29  ;;  %v2497_v50 = vld [vmem:[%s4757_s25 + $0x48] sm:$0xff] }
 0x2d3   : > { %v2287_v15 = vpop.f32.mrf.mxu1  ;;  %v2537_v2 = vunpack.c.h.bf16 %v2496_v5 }
 0x2d4   : > { %2717 = vst [vmem:[%s4773_s10 + $0x28] sm:$0xff] %v2653_v7  ;;  %v2654_v43 = vmax.f32 %v2590_v59, 0.0  ;;  %v2591_v17 = vadd.f32 %v2527_v19, %v2431_v20  ;;  %v2432_v34 = vmax.f32 %v2286_v40, 0.0  ;;  %v2288_v48 = vadd.f32 %v2287_v15, %v4762_v60 }
 0x2d5   : > { %v2289_v45 = vpop.f32.mrf.mxu1  ;;  %v2538_v20 = vunpack.c.l.bf16 %v2497_v50 }
 0x2d6   : > { %2718 = vst [vmem:[%s4773_s10 + $0x30] sm:$0xff] %v2654_v43  ;;  %v2655_v12 = vmax.f32 %v2591_v17, 0.0  ;;  %v2592_v3 = vadd.f32 %v2528_v10, %v2432_v34  ;;  %v2433_v11 = vmax.f32 %v2288_v48, 0.0  ;;  %v2290_v47 = vadd.f32 %v2289_v45, %v4759_v29  ;;  %v2498_v43 = vld [vmem:[%s4757_s25 + $0x50] sm:$0xff] }
 0x2d7   : > { %v2291_v62 = vpop.f32.mrf.mxu1  ;;  %v2539_v34 = vunpack.c.h.bf16 %v2497_v50 }
 0x2d8   : > { %2719 = vst [vmem:[%s4773_s10 + $0x38] sm:$0xff] %v2655_v12  ;;  %v2656_v13 = vmax.f32 %v2592_v3, 0.0  ;;  %v2593_v31 = vadd.f32 %v2529_v27, %v2433_v11  ;;  %v2434_v35 = vmax.f32 %v2290_v47, 0.0  ;;  %v2292_v8 = vadd.f32 %v2291_v62, %v4762_v60 }
 0x2d9   : > { %v2295_v16 = vpop.f32.mrf.mxu1  ;;  %v2540_v11 = vunpack.c.l.bf16 %v2498_v43 }
 0x2da   : > { %2720 = vst [vmem:[%s4773_s10 + $0x40] sm:$0xff] %v2656_v13  ;;  %v2657_v57 = vmax.f32 %v2593_v31, 0.0  ;;  %v2594_v63 = vadd.f32 %v2530_v53, %v2434_v35  ;;  %v2435_v32 = vmax.f32 %v2292_v8, 0.0  ;;  %v2296_v23 = vadd.f32 %v2295_v16, %v4759_v29  ;;  %v2499_v13 = vld [vmem:[%s4757_s25 + $0x58] sm:$0xff] }
 0x2db   : > { %v2297_v30 = vpop.f32.mrf.mxu1  ;;  %v2541_v35 = vunpack.c.h.bf16 %v2498_v43 }
 0x2dc   : > { %2721 = vst [vmem:[%s4773_s10 + $0x48] sm:$0xff] %v2657_v57  ;;  %v2658_v44 = vmax.f32 %v2594_v63, 0.0  ;;  %v2595_v49 = vadd.f32 %v2531_v39, %v2435_v32  ;;  %v2436_v4 = vmax.f32 %v2296_v23, 0.0  ;;  %v2298_v1 = vadd.f32 %v2297_v30, %v4762_v60 }
 0x2dd   : > { %v2299_v24 = vpop.f32.mrf.mxu1  ;;  %v2542_v32 = vunpack.c.l.bf16 %v2499_v13 }
 0x2de   : > { %2722 = vst [vmem:[%s4773_s10 + $0x50] sm:$0xff] %v2658_v44  ;;  %v2659_v41 = vmax.f32 %v2595_v49, 0.0  ;;  %v2596_v0 = vadd.f32 %v2532_v36, %v2436_v4  ;;  %v2437_v56 = vmax.f32 %v2298_v1, 0.0  ;;  %v2300_v61 = vadd.f32 %v2299_v24, %v4759_v29  ;;  %v2500_v44 = vld [vmem:[%s4757_s25 + $0x60] sm:$0xff] }
 0x2df   : > { %v2301_v6 = vpop.f32.mrf.mxu1  ;;  %v2543_v4 = vunpack.c.h.bf16 %v2499_v13 }
 0x2e0   : > { %2723 = vst [vmem:[%s4773_s10 + $0x58] sm:$0xff] %v2659_v41  ;;  %v2660_v33 = vmax.f32 %v2596_v0, 0.0  ;;  %v2597_v38 = vadd.f32 %v2533_v14, %v2437_v56  ;;  %v2438_v22 = vmax.f32 %v2300_v61, 0.0  ;;  %v2302_v52 = vadd.f32 %v2301_v6, %v4762_v60 }
 0x2e1   : > { %v2305_v55 = vpop.f32.mrf.mxu1  ;;  %v2544_v56 = vunpack.c.l.bf16 %v2500_v44 }
 0x2e2   : > { %2724 = vst [vmem:[%s4773_s10 + $0x60] sm:$0xff] %v2660_v33  ;;  %v2661_v18 = vmax.f32 %v2597_v38, 0.0  ;;  %v2598_v28 = vadd.f32 %v2534_v21, %v2438_v22  ;;  %v2439_v42 = vmax.f32 %v2302_v52, 0.0  ;;  %v2306_v19 = vadd.f32 %v2305_v55, %v4759_v29  ;;  %v2501_v33 = vld [vmem:[%s4757_s25 + $0x68] sm:$0xff] }
 0x2e3   : > { %v2307_v54 = vpop.f32.mrf.mxu1  ;;  %v2545_v22 = vunpack.c.h.bf16 %v2500_v44 }
 0x2e4   : > { %2725 = vst [vmem:[%s4773_s10 + $0x68] sm:$0xff] %v2661_v18  ;;  %v2662_v51 = vmax.f32 %v2598_v28, 0.0  ;;  %v2599_v26 = vadd.f32 %v2535_v25, %v2439_v42  ;;  %v2440_v10 = vmax.f32 %v2306_v19, 0.0  ;;  %v2308_v7 = vadd.f32 %v2307_v54, %v4762_v60 }
 0x2e5   : > { %v2309_v59 = vpop.f32.mrf.mxu1  ;;  %v2546_v42 = vunpack.c.l.bf16 %v2501_v33 }
 0x2e6   : > { %2726 = vst [vmem:[%s4773_s10 + $0x70] sm:$0xff] %v2662_v51  ;;  %v2663_v40 = vmax.f32 %v2599_v26, 0.0  ;;  %v2600_v9 = vadd.f32 %v2536_v46, %v2440_v10  ;;  %v2441_v15 = vmax.f32 %v2308_v7, 0.0  ;;  %v2310_v27 = vadd.f32 %v2309_v59, %v4759_v29  ;;  %v2502_v51 = vld [vmem:[%s4757_s25 + $0x70] sm:$0xff] }
 0x2e7   : > { %v2311_v17 = vpop.f32.mrf.mxu1  ;;  %v2547_v10 = vunpack.c.h.bf16 %v2501_v33 }
 0x2e8   : > { %2727 = vst [vmem:[%s4773_s10 + $0x78] sm:$0xff] %v2663_v40  ;;  %v2664_v48 = vmax.f32 %v2600_v9, 0.0  ;;  %v2601_v45 = vadd.f32 %v2537_v2, %v2441_v15  ;;  %v2442_v53 = vmax.f32 %v2310_v27, 0.0  ;;  %v2312_v12 = vadd.f32 %v2311_v17, %v4762_v60 }
 0x2e9   : > { %v2315_v3 = vpop.f32.mrf.mxu1  ;;  %v2548_v15 = vunpack.c.l.bf16 %v2502_v51 }
 0x2ea   : > { %2728 = vst [vmem:[%s4773_s10 + $0x80] sm:$0xff] %v2664_v48  ;;  %v2665_v47 = vmax.f32 %v2601_v45, 0.0  ;;  %v2602_v58 = vadd.f32 %v2538_v20, %v2442_v53  ;;  %v2443_v62 = vmax.f32 %v2312_v12, 0.0  ;;  %v2316_v39 = vadd.f32 %v2315_v3, %v4759_v29  ;;  %v2503_v48 = vld [vmem:[%s4757_s25 + $0x78] sm:$0xff] }
 0x2eb   : > { %v2317_v31 = vpop.f32.mrf.mxu1  ;;  %v2549_v53 = vunpack.c.h.bf16 %v2502_v51 }
 0x2ec   : > { %2729 = vst [vmem:[%s4773_s10 + $0x88] sm:$0xff] %v2665_v47  ;;  %v2666_v8 = vmax.f32 %v2602_v58, 0.0  ;;  %v2603_v16 = vadd.f32 %v2539_v34, %v2443_v62  ;;  %v2444_v36 = vmax.f32 %v2316_v39, 0.0  ;;  %v2318_v57 = vadd.f32 %v2317_v31, %v4762_v60 }
 0x2ed   : > { %v2319_v63 = vpop.f32.mrf.mxu1  ;;  %v2550_v62 = vunpack.c.l.bf16 %v2503_v48 }
 0x2ee   : > { %2730 = vst [vmem:[%s4773_s10 + $0x90] sm:$0xff] %v2666_v8  ;;  %v2667_v23 = vmax.f32 %v2603_v16, 0.0  ;;  %v2604_v37 = vadd.f32 %v2540_v11, %v2444_v36  ;;  %v2445_v30 = vmax.f32 %v2318_v57, 0.0  ;;  %v2320_v14 = vadd.f32 %v2319_v63, %v4759_v29  ;;  %v2504_v8 = vld [vmem:[%s4757_s25 + $0x80] sm:$0xff] }
 0x2ef   : > { %v2321_v49 = vpop.f32.mrf.mxu1  ;;  %v2551_v36 = vunpack.c.h.bf16 %v2503_v48 }
 0x2f0   : > { %2731 = vst [vmem:[%s4773_s10 + $0x98] sm:$0xff] %v2667_v23  ;;  %v2668_v1 = vmax.f32 %v2604_v37, 0.0  ;;  %v2605_v24 = vadd.f32 %v2541_v35, %v2445_v30  ;;  %v2446_v21 = vmax.f32 %v2320_v14, 0.0  ;;  %v2322_v41 = vadd.f32 %v2321_v49, %v4762_v60 }
 0x2f1   : > { %v2325_v0 = vpop.f32.mrf.mxu1  ;;  %v2552_v30 = vunpack.c.l.bf16 %v2504_v8 }
 0x2f2   : > { %2732 = vst [vmem:[%s4773_s10 + $0xa0] sm:$0xff] %v2668_v1  ;;  %v2669_v61 = vmax.f32 %v2605_v24, 0.0  ;;  %v2606_v5 = vadd.f32 %v2542_v32, %v2446_v21  ;;  %v2447_v6 = vmax.f32 %v2322_v41, 0.0  ;;  %v2326_v25 = vadd.f32 %v2325_v0, %v4759_v29  ;;  %v2505_v1 = vld [vmem:[%s4757_s25 + $0x88] sm:$0xff] }
 0x2f3   : > { %v2327_v38 = vpop.f32.mrf.mxu1  ;;  %v2553_v21 = vunpack.c.h.bf16 %v2504_v8 }
 0x2f4   : > { %2733 = vst [vmem:[%s4773_s10 + $0xa8] sm:$0xff] %v2669_v61  ;;  %v2670_v52 = vmax.f32 %v2606_v5, 0.0  ;;  %v2607_v55 = vadd.f32 %v2543_v4, %v2447_v6  ;;  %v2448_v46 = vmax.f32 %v2326_v25, 0.0  ;;  %v2328_v18 = vadd.f32 %v2327_v38, %v4762_v60 }
 0x2f5   : > { %v2329_v28 = vpop.f32.mrf.mxu1  ;;  %v2554_v6 = vunpack.c.l.bf16 %v2505_v1 }
 0x2f6   : > { %2734 = vst [vmem:[%s4773_s10 + $0xb0] sm:$0xff] %v2670_v52  ;;  %v2671_v19 = vmax.f32 %v2607_v55, 0.0  ;;  %v2608_v50 = vadd.f32 %v2544_v56, %v2448_v46  ;;  %v2449_v54 = vmax.f32 %v2328_v18, 0.0  ;;  %v2330_v2 = vadd.f32 %v2329_v28, %v4759_v29  ;;  %v2506_v52 = vld [vmem:[%s4757_s25 + $0x90] sm:$0xff] }
 0x2f7   : > { %v2331_v26 = vpop.f32.mrf.mxu1  ;;  %v2555_v46 = vunpack.c.h.bf16 %v2505_v1 }
 0x2f8   : > { %2735 = vst [vmem:[%s4773_s10 + $0xb8] sm:$0xff] %v2671_v19  ;;  %v2672_v7 = vmax.f32 %v2608_v50, 0.0  ;;  %v2609_v59 = vadd.f32 %v2545_v22, %v2449_v54  ;;  %v2450_v20 = vmax.f32 %v2330_v2, 0.0  ;;  %v2332_v40 = vadd.f32 %v2331_v26, %v4762_v60 }
 0x2f9   : > { %v2335_v9 = vpop.f32.mrf.mxu1  ;;  %v2556_v54 = vunpack.c.l.bf16 %v2506_v52 }
 0x2fa   : > { %2736 = vst [vmem:[%s4773_s10 + $0xc0] sm:$0xff] %v2672_v7  ;;  %v2673_v27 = vmax.f32 %v2609_v59, 0.0  ;;  %v2610_v43 = vadd.f32 %v2546_v42, %v2450_v20  ;;  %v2451_v17 = vmax.f32 %v2332_v40, 0.0  ;;  %v2336_v34 = vadd.f32 %v2335_v9, %v4759_v29  ;;  %v2507_v7 = vld [vmem:[%s4757_s25 + $0x98] sm:$0xff] }
 0x2fb   : > { %v2337_v45 = vpop.f32.mrf.mxu1  ;;  %v2557_v20 = vunpack.c.h.bf16 %v2506_v52 }
 0x2fc   : > { %2737 = vst [vmem:[%s4773_s10 + $0xc8] sm:$0xff] %v2673_v27  ;;  %v2674_v12 = vmax.f32 %v2610_v43, 0.0  ;;  %v2611_v3 = vadd.f32 %v2547_v10, %v2451_v17  ;;  %v2452_v11 = vmax.f32 %v2336_v34, 0.0  ;;  %v2338_v47 = vadd.f32 %v2337_v45, %v4762_v60 }
 0x2fd   : > { %v2339_v58 = vpop.f32.mrf.mxu1  ;;  %v2558_v17 = vunpack.c.l.bf16 %v2507_v7 }
 0x2fe   : > { %2738 = vst [vmem:[%s4773_s10 + $0xd0] sm:$0xff] %v2674_v12  ;;  %v2675_v39 = vmax.f32 %v2611_v3, 0.0  ;;  %v2612_v13 = vadd.f32 %v2548_v15, %v2452_v11  ;;  %v2453_v31 = vmax.f32 %v2338_v47, 0.0  ;;  %v2340_v35 = vadd.f32 %v2339_v58, %v4759_v29  ;;  %v2508_v12 = vld [vmem:[%s4757_s25 + $0xa0] sm:$0xff] }
 0x2ff   : > { %v2341_v16 = vpop.f32.mrf.mxu1  ;;  %v2559_v11 = vunpack.c.h.bf16 %v2507_v7 }
 0x300   : > { %2739 = vst [vmem:[%s4773_s10 + $0xd8] sm:$0xff] %v2675_v39  ;;  %v2676_v57 = vmax.f32 %v2612_v13, 0.0  ;;  %v2613_v63 = vadd.f32 %v2549_v53, %v2453_v31  ;;  %v2454_v32 = vmax.f32 %v2340_v35, 0.0  ;;  %v2342_v23 = vadd.f32 %v2341_v16, %v4762_v60 }
 0x301   : > { %v2345_v37 = vpop.f32.mrf.mxu1  ;;  %v2560_v31 = vunpack.c.l.bf16 %v2508_v12 }
 0x302   : > { %2740 = vst [vmem:[%s4773_s10 + $0xe0] sm:$0xff] %v2676_v57  ;;  %v2677_v14 = vmax.f32 %v2613_v63, 0.0  ;;  %v2614_v44 = vadd.f32 %v2550_v62, %v2454_v32  ;;  %v2455_v49 = vmax.f32 %v2342_v23, 0.0  ;;  %v2346_v4 = vadd.f32 %v2345_v37, %v4759_v29  ;;  %v2509_v57 = vld [vmem:[%s4757_s25 + $0xa8] sm:$0xff] }
 0x303   : > { %v2347_v24 = vpop.f32.mrf.mxu1  ;;  %v2561_v32 = vunpack.c.h.bf16 %v2508_v12 }
 0x304   : > { %2741 = vst [vmem:[%s4773_s10 + $0xe8] sm:$0xff] %v2677_v14  ;;  %v2678_v41 = vmax.f32 %v2614_v44, 0.0  ;;  %v2615_v0 = vadd.f32 %v2551_v36, %v2455_v49  ;;  %v2456_v56 = vmax.f32 %v2346_v4, 0.0  ;;  %v2348_v61 = vadd.f32 %v2347_v24, %v4762_v60 }
 0x305   : > { %v2349_v5 = vpop.f32.mrf.mxu1  ;;  %v2562_v49 = vunpack.c.l.bf16 %v2509_v57 }
 0x306   : > { %2742 = vst [vmem:[%s4773_s10 + $0xf0] sm:$0xff] %v2678_v41  ;;  %v2679_v25 = vmax.f32 %v2615_v0, 0.0  ;;  %v2616_v33 = vadd.f32 %v2552_v30, %v2456_v56  ;;  %v2457_v38 = vmax.f32 %v2348_v61, 0.0  ;;  %v2350_v22 = vadd.f32 %v2349_v5, %v4759_v29  ;;  %v2510_v41 = vld [vmem:[%s4757_s25 + $0xb0] sm:$0xff] }
 0x307   : > { %v2351_v55 = vpop.f32.mrf.mxu1  ;;  %v2563_v56 = vunpack.c.h.bf16 %v2509_v57 }
 0x308   : > { %2743 = vst [vmem:[%s4773_s10 + $0xf8] sm:$0xff] %v2679_v25  ;;  %v2680_v18 = vmax.f32 %v2616_v33, 0.0  ;;  %v2617_v28 = vadd.f32 %v2553_v21, %v2457_v38  ;;  %v2458_v42 = vmax.f32 %v2350_v22, 0.0  ;;  %v2352_v19 = vadd.f32 %v2351_v55, %v4762_v60 }
 0x309   : > { %v2355_v50 = vpop.f32.mrf.mxu1  ;;  %v2564_v38 = vunpack.c.l.bf16 %v2510_v41 }
 0x30a   : > { %2744 = vst [vmem:[%s4773_s10 + $0x100] sm:$0xff] %v2680_v18  ;;  %v2681_v2 = vmax.f32 %v2617_v28, 0.0  ;;  %v2618_v51 = vadd.f32 %v2554_v6, %v2458_v42  ;;  %v2459_v26 = vmax.f32 %v2352_v19, 0.0  ;;  %v2356_v10 = vadd.f32 %v2355_v50, %v4759_v29  ;;  %v2511_v18 = vld [vmem:[%s4757_s25 + $0xb8] sm:$0xff] }
 0x30b   : > { %v2357_v59 = vpop.f32.mrf.mxu1  ;;  %v2565_v42 = vunpack.c.h.bf16 %v2510_v41 }
 0x30c   : > { %2745 = vst [vmem:[%s4773_s10 + $0x108] sm:$0xff] %v2681_v2  ;;  %v2682_v40 = vmax.f32 %v2618_v51, 0.0  ;;  %v2619_v9 = vadd.f32 %v2555_v46, %v2459_v26  ;;  %v2460_v15 = vmax.f32 %v2356_v10, 0.0  ;;  %v2358_v27 = vadd.f32 %v2357_v59, %v4762_v60 }
 0x30d   : > { %v2359_v43 = vpop.f32.mrf.mxu1  ;;  %v2566_v26 = vunpack.c.l.bf16 %v2511_v18 }
 0x30e   : > { %2746 = vst [vmem:[%s4773_s10 + $0x110] sm:$0xff] %v2682_v40  ;;  %v2683_v34 = vmax.f32 %v2619_v9, 0.0  ;;  %v2620_v48 = vadd.f32 %v2556_v54, %v2460_v15  ;;  %v2461_v45 = vmax.f32 %v2358_v27, 0.0  ;;  %v2360_v53 = vadd.f32 %v2359_v43, %v4759_v29  ;;  %v2512_v40 = vld [vmem:[%s4757_s25 + $0xc0] sm:$0xff] }
 0x30f   : > { %v2361_v3 = vpop.f32.mrf.mxu1  ;;  %v2567_v15 = vunpack.c.h.bf16 %v2511_v18 }
 0x310   : > { %2747 = vst [vmem:[%s4773_s10 + $0x118] sm:$0xff] %v2683_v34  ;;  %v2684_v47 = vmax.f32 %v2620_v48, 0.0  ;;  %v2621_v58 = vadd.f32 %v2557_v20, %v2461_v45  ;;  %v2462_v62 = vmax.f32 %v2360_v53, 0.0  ;;  %v2362_v39 = vadd.f32 %v2361_v3, %v4762_v60 }
 0x311   : > { %v2365_v13 = vpop.f32.mrf.mxu1  ;;  %v2568_v45 = vunpack.c.l.bf16 %v2512_v40 }
 0x312   : > { %2748 = vst [vmem:[%s4773_s10 + $0x120] sm:$0xff] %v2684_v47  ;;  %v2685_v35 = vmax.f32 %v2621_v58, 0.0  ;;  %v2622_v8 = vadd.f32 %v2558_v17, %v2462_v62  ;;  %v2463_v16 = vmax.f32 %v2362_v39, 0.0  ;;  %v2366_v36 = vadd.f32 %v2365_v13, %v4759_v29  ;;  %v2513_v47 = vld [vmem:[%s4757_s25 + $0xc8] sm:$0xff] }
 0x313   : > { %v2367_v63 = vpop.f32.mrf.mxu1  ;;  %v2569_v62 = vunpack.c.h.bf16 %v2512_v40 }
 0x314   : > { %2749 = vst [vmem:[%s4773_s10 + $0x128] sm:$0xff] %v2685_v35  ;;  %v2686_v23 = vmax.f32 %v2622_v8, 0.0  ;;  %v2623_v37 = vadd.f32 %v2559_v11, %v2463_v16  ;;  %v2464_v30 = vmax.f32 %v2366_v36, 0.0  ;;  %v2368_v14 = vadd.f32 %v2367_v63, %v4762_v60 }
 0x315   : > { %v2369_v44 = vpop.f32.mrf.mxu1  ;;  %v2570_v16 = vunpack.c.l.bf16 %v2513_v47 }
 0x316   : > { %2750 = vst [vmem:[%s4773_s10 + $0x130] sm:$0xff] %v2686_v23  ;;  %v2687_v4 = vmax.f32 %v2623_v37, 0.0  ;;  %v2624_v1 = vadd.f32 %v2560_v31, %v2464_v30  ;;  %v2465_v24 = vmax.f32 %v2368_v14, 0.0  ;;  %v2370_v21 = vadd.f32 %v2369_v44, %v4759_v29  ;;  %v2514_v23 = vld [vmem:[%s4757_s25 + $0xd0] sm:$0xff] }
 0x317   : > { %v2371_v0 = vpop.f32.mrf.mxu1  ;;  %v2571_v30 = vunpack.c.h.bf16 %v2513_v47 }
 0x318   : > { %2751 = vst [vmem:[%s4773_s10 + $0x138] sm:$0xff] %v2687_v4  ;;  %v2688_v61 = vmax.f32 %v2624_v1, 0.0  ;;  %v2625_v5 = vadd.f32 %v2561_v32, %v2465_v24  ;;  %v2466_v6 = vmax.f32 %v2370_v21, 0.0  ;;  %v2372_v25 = vadd.f32 %v2371_v0, %v4762_v60 }
 0x319   : > { %v2375_v33 = vpop.f32.mrf.mxu1  ;;  %v2572_v24 = vunpack.c.l.bf16 %v2514_v23 }
 0x31a   : > { %2752 = vst [vmem:[%s4773_s10 + $0x140] sm:$0xff] %v2688_v61  ;;  %v2689_v22 = vmax.f32 %v2625_v5, 0.0  ;;  %v2626_v52 = vadd.f32 %v2562_v49, %v2466_v6  ;;  %v2467_v55 = vmax.f32 %v2372_v25, 0.0  ;;  %v2376_v46 = vadd.f32 %v2375_v33, %v4759_v29  ;;  %v2515_v61 = vld [vmem:[%s4757_s25 + $0xd8] sm:$0xff] }
 0x31b   : > { %v2377_v28 = vpop.f32.mrf.mxu1  ;;  %v2573_v6 = vunpack.c.h.bf16 %v2514_v23 }
 0x31c   : > { %2753 = vst [vmem:[%s4773_s10 + $0x148] sm:$0xff] %v2689_v22  ;;  %v2690_v19 = vmax.f32 %v2626_v52, 0.0  ;;  %v2627_v50 = vadd.f32 %v2563_v56, %v2467_v55  ;;  %v2468_v54 = vmax.f32 %v2376_v46, 0.0  ;;  %v2378_v2 = vadd.f32 %v2377_v28, %v4762_v60 }
 0x31d   : > { %v2379_v51 = vpop.f32.mrf.mxu1  ;;  %v2574_v55 = vunpack.c.l.bf16 %v2515_v61 }
 0x31e   : > { %2754 = vst [vmem:[%s4773_s10 + $0x150] sm:$0xff] %v2690_v19  ;;  %v2691_v10 = vmax.f32 %v2627_v50, 0.0  ;;  %v2628_v7 = vadd.f32 %v2564_v38, %v2468_v54  ;;  %v2469_v59 = vmax.f32 %v2378_v2, 0.0  ;;  %v2380_v20 = vadd.f32 %v2379_v51, %v4759_v29  ;;  %v2516_v19 = vld [vmem:[%s4757_s25 + $0xe0] sm:$0xff] }
 0x31f   : > { %v2381_v9 = vpop.f32.mrf.mxu1  ;;  %v2575_v54 = vunpack.c.h.bf16 %v2515_v61 }
 0x320   : > { %2755 = vst [vmem:[%s4773_s10 + $0x158] sm:$0xff] %v2691_v10  ;;  %v2692_v27 = vmax.f32 %v2628_v7, 0.0  ;;  %v2629_v43 = vadd.f32 %v2565_v42, %v2469_v59  ;;  %v2470_v17 = vmax.f32 %v2380_v20, 0.0  ;;  %v2382_v34 = vadd.f32 %v2381_v9, %v4762_v60 }
 0x321   : > { %v2385_v48 = vpop.f32.mrf.mxu1  ;;  %v2576_v59 = vunpack.c.l.bf16 %v2516_v19 }
 0x322   : > { %2756 = vst [vmem:[%s4773_s10 + $0x160] sm:$0xff] %v2692_v27  ;;  %v2693_v53 = vmax.f32 %v2629_v43, 0.0  ;;  %v2630_v12 = vadd.f32 %v2566_v26, %v2470_v17  ;;  %v2471_v3 = vmax.f32 %v2382_v34, 0.0  ;;  %v2386_v11 = vadd.f32 %v2385_v48, %v4759_v29  ;;  %v2517_v27 = vld [vmem:[%s4757_s25 + $0xe8] sm:$0xff] }
 0x323   : > { %v2387_v58 = vpop.f32.mrf.mxu1  ;;  %v2577_v17 = vunpack.c.h.bf16 %v2516_v19 }
 0x324   : > { %2757 = vst [vmem:[%s4773_s10 + $0x168] sm:$0xff] %v2693_v53  ;;  %v2694_v39 = vmax.f32 %v2630_v12, 0.0  ;;  %v2631_v13 = vadd.f32 %v2567_v15, %v2471_v3  ;;  %v2472_v31 = vmax.f32 %v2386_v11, 0.0  ;;  %v2388_v35 = vadd.f32 %v2387_v58, %v4762_v60 }
 0x325   : > { %v2389_v8 = vpop.f32.mrf.mxu1  ;;  %v2578_v3 = vunpack.c.l.bf16 %v2517_v27 }
 0x326   : > { %2758 = vst [vmem:[%s4773_s10 + $0x170] sm:$0xff] %v2694_v39  ;;  %v2695_v36 = vmax.f32 %v2631_v13, 0.0  ;;  %v2632_v57 = vadd.f32 %v2568_v45, %v2472_v31  ;;  %v2473_v63 = vmax.f32 %v2388_v35, 0.0  ;;  %v2390_v32 = vadd.f32 %v2389_v8, %v4759_v29  ;;  %v2518_v39 = vld [vmem:[%s4757_s25 + $0xf0] sm:$0xff] }
 0x327   : > { %v2391_v37 = vpop.f32.mrf.mxu1  ;;  %v2579_v31 = vunpack.c.h.bf16 %v2517_v27 }
 0x328   : > { %2759 = vst [vmem:[%s4773_s10 + $0x178] sm:$0xff] %v2695_v36  ;;  %v2696_v14 = vmax.f32 %v2632_v57, 0.0  ;;  %v2633_v44 = vadd.f32 %v2569_v62, %v2473_v63  ;;  %v2474_v49 = vmax.f32 %v2390_v32, 0.0  ;;  %v2392_v4 = vadd.f32 %v2391_v37, %v4762_v60 }
 0x329   : > { %v2395_v1 = vpop.f32.mrf.mxu1  ;;  %v2580_v63 = vunpack.c.l.bf16 %v2518_v39 }
 0x32a   : > { %2760 = vst [vmem:[%s4773_s10 + $0x180] sm:$0xff] %v2696_v14  ;;  %v2697_v21 = vmax.f32 %v2633_v44, 0.0  ;;  %v2634_v41 = vadd.f32 %v2570_v16, %v2474_v49  ;;  %v2475_v0 = vmax.f32 %v2392_v4, 0.0  ;;  %v2396_v56 = vadd.f32 %v2395_v1, %v4759_v29  ;;  %v2519_v14 = vld [vmem:[%s4757_s25 + $0xf8] sm:$0xff] }
 0x32b   : > { %v2397_v5 = vpop.f32.mrf.mxu1  ;;  %v2581_v49 = vunpack.c.h.bf16 %v2518_v39 }
 0x32c   : > { %2761 = vst [vmem:[%s4773_s10 + $0x188] sm:$0xff] %v2697_v21  ;;  %v2698_v25 = vmax.f32 %v2634_v41, 0.0  ;;  %v2635_v33 = vadd.f32 %v2571_v30, %v2475_v0  ;;  %v2476_v38 = vmax.f32 %v2396_v56, 0.0  ;;  %v2398_v22 = vadd.f32 %v2397_v5, %v4762_v60 }
 0x32d   : > { %v2399_v52 = vpop.f32.mrf.mxu1  ;;  %v2582_v0 = vunpack.c.l.bf16 %v2519_v14 }
 0x32e   : > { %2762 = vst [vmem:[%s4773_s10 + $0x190] sm:$0xff] %v2698_v25  ;;  %v2699_v46 = vmax.f32 %v2635_v33, 0.0  ;;  %v2636_v18 = vadd.f32 %v2572_v24, %v2476_v38  ;;  %v2477_v28 = vmax.f32 %v2398_v22, 0.0  ;;  %v2400_v42 = vadd.f32 %v2399_v52, %v4759_v29 }
 0x32f   : > { %v2401_v50 = vpop.f32.mrf.mxu1  ;;  %v2583_v33 = vunpack.c.h.bf16 %v2519_v14 }
 0x330   : > { %2763 = vst [vmem:[%s4773_s10 + $0x198] sm:$0xff] %v2699_v46  ;;  %v2700_v2 = vmax.f32 %v2636_v18, 0.0  ;;  %v2637_v51 = vadd.f32 %v2573_v6, %v2477_v28  ;;  %v2478_v26 = vmax.f32 %v2400_v42, 0.0  ;;  %v2402_v10 = vadd.f32 %v2401_v50, %v4762_v60 }
 0x331   : > { %v2405_v7 = vpop.f32.mrf.mxu1 }
 0x332   : > { %2764 = vst [vmem:[%s4773_s10 + $0x1a0] sm:$0xff] %v2700_v2  ;;  %v2701_v20 = vmax.f32 %v2637_v51, 0.0  ;;  %v2638_v40 = vadd.f32 %v2574_v55, %v2478_v26  ;;  %v2479_v9 = vmax.f32 %v2402_v10, 0.0  ;;  %v2406_v15 = vadd.f32 %v2405_v7, %v4759_v29 }
 0x333   : > { %v2407_v43 = vpop.f32.mrf.mxu1 }
 0x334   : > { %2765 = vst [vmem:[%s4773_s10 + $0x1a8] sm:$0xff] %v2701_v20  ;;  %v2702_v34 = vmax.f32 %v2638_v40, 0.0  ;;  %v2639_v48 = vadd.f32 %v2575_v54, %v2479_v9  ;;  %v2480_v45 = vmax.f32 %v2406_v15, 0.0  ;;  %v2408_v53 = vadd.f32 %v2407_v43, %v4762_v60 }
 0x335   : > { %v2409_v12 = vpop.f32.mrf.mxu1 }
 0x336   : > { %2766 = vst [vmem:[%s4773_s10 + $0x1b0] sm:$0xff] %v2702_v34  ;;  %v2703_v11 = vmax.f32 %v2639_v48, 0.0  ;;  %v2640_v47 = vadd.f32 %v2576_v59, %v2480_v45  ;;  %v2481_v58 = vmax.f32 %v2408_v53, 0.0  ;;  %v2410_v62 = vadd.f32 %v2409_v12, %v4759_v29 }
 0x337   : > { %v2411_v13 = vpop.f32.mrf.mxu1 }
 0x338   : > { %2767 = vst [vmem:[%s4773_s10 + $0x1b8] sm:$0xff] %v2703_v11  ;;  %v2704_v35 = vmax.f32 %v2640_v47, 0.0  ;;  %v2641_v8 = vadd.f32 %v2577_v17, %v2481_v58  ;;  %v2482_v16 = vmax.f32 %v2410_v62, 0.0  ;;  %v2412_v36 = vadd.f32 %v2411_v13, %v4762_v60 }
 0x339   : > { %v2415_v57 = vpop.f32.mrf.mxu1 }
 0x33a   : > { %2768 = vst [vmem:[%s4773_s10 + $0x1c0] sm:$0xff] %v2704_v35  ;;  %v2705_v32 = vmax.f32 %v2641_v8, 0.0  ;;  %v2642_v23 = vadd.f32 %v2578_v3, %v2482_v16  ;;  %v2483_v37 = vmax.f32 %v2412_v36, 0.0  ;;  %v2416_v30 = vadd.f32 %v2415_v57, %v4759_v29 }
 0x33b   : > { %v2417_v44 = vpop.f32.mrf.mxu1 }
 0x33c   : > { %2769 = vst [vmem:[%s4773_s10 + $0x1c8] sm:$0xff] %v2705_v32  ;;  %v2706_v4 = vmax.f32 %v2642_v23, 0.0  ;;  %v2643_v1 = vadd.f32 %v2579_v31, %v2483_v37  ;;  %v2484_v24 = vmax.f32 %v2416_v30, 0.0  ;;  %v2418_v21 = vadd.f32 %v2417_v44, %v4762_v60 }
 0x33d   : > { %v2419_v41 = vpop.f32.mrf.mxu1 }
 0x33e   : > { %2770 = vst [vmem:[%s4773_s10 + $0x1d0] sm:$0xff] %v2706_v4  ;;  %v2707_v56 = vmax.f32 %v2643_v1, 0.0  ;;  %v2644_v61 = vadd.f32 %v2580_v63, %v2484_v24  ;;  %v2485_v5 = vmax.f32 %v2418_v21, 0.0  ;;  %v2420_v6 = vadd.f32 %v2419_v41, %v4759_v29 }
 0x33f   : > { %v2421_v25 = vpop.f32.mrf.mxu1 }
 0x340   : > { %2771 = vst [vmem:[%s4773_s10 + $0x1d8] sm:$0xff] %v2707_v56  ;;  %v2708_v38 = vmax.f32 %v2644_v61, 0.0  ;;  %v2645_v22 = vadd.f32 %v2581_v49, %v2485_v5  ;;  %v2486_v52 = vmax.f32 %v2420_v6, 0.0  ;;  %v2422_v55 = vadd.f32 %v2421_v25, %v4762_v60 }
 0x342   : > { %2772 = vst [vmem:[%s4773_s10 + $0x1e0] sm:$0xff] %v2708_v38  ;;  %v2709_v46 = vmax.f32 %v2645_v22, 0.0  ;;  %v2646_v18 = vadd.f32 %v2582_v0, %v2486_v52  ;;  %v2487_v28 = vmax.f32 %v2422_v55, 0.0 }
 0x344   : > { %2773 = vst [vmem:[%s4773_s10 + $0x1e8] sm:$0xff] %v2709_v46  ;;  %v2710_v29 = vmax.f32 %v2646_v18, 0.0  ;;  %v2647_v42 = vadd.f32 %v2583_v33, %v2487_v28 }
 0x346   : > { %2774 = vst [vmem:[%s4773_s10 + $0x1f0] sm:$0xff] %v2710_v29  ;;  %v2711_v60 = vmax.f32 %v2647_v42, 0.0 }
 0x348   : > { %2775 = vst [vmem:[%s4773_s10 + $0x1f8] sm:$0xff] %v2711_v60 }
 0x349   : > { %3515 = shalt.err (!%p3512_p6)
}
 0x34a   : > { %s3516_s24 = scalar_lea.hbm %s4931_s21, 8192  ;;  %s3520_s9 = scalar_lea.hbm %s4992_s8, 16384 }
 0x34b   : > { %p3517_p7 = scmp.ne.s32.totalorder %s4931_s21, %s3516_s24  ;;  %p3521_p11 = scmp.lt.s32.totalorder %s4931_s21, %s4992_s8 }
 0x34c   : > { %p3522_p12 = scmp.lt.s32.totalorder %s3520_s9, %s3516_s24 }
 0x34d   : > { %p3518_p9 = pnand %p3517_p7, %p3670_p4 }
 0x34e   : > { %p3523_p13 = por %p3522_p12, %p3521_p11 }
 0x34f   : > { %p3519_p10 = pneg %p3518_p9 }
 0x351   : > { %p3524_p0 = pnand %p3523_p13, %p3519_p10 }
 0x353   : > { %3527 = shalt.err (!%p3524_p0)
}
 0x354   : > { %s3583_s19 = smov 256   ;;  %s3584_s20 = smov 16  }
 0x355   : > { %3363 = dma.vmem_to_hbm [thread:$0]  (%p3670_p4), %s4933_s17, 8192, %s4931_s21, %s4939_s22, %s3583_s19, %s3583_s19, %s3584_s20  }
 0x356 PF: > { %p3369_p1 = scmp.ge.s32.totalorder %s3578_s30, 2  ;;  %s2807_s28 = sand.u32 1, %s3558_s2  }
 0x357   : > { %s2808_s18 = scalar_lea.sflag [#allocation3], %s2807_s28 }
 0x358   : > { %p3366_p2 = pnand %p3369_p1, %p3677_p8 }
 0x35a   : > { %p3367_p3 = pneg %p3366_p2 }
 0x35c   : > { %3553 = dma.done.wait (%p3367_p3), %s2808_s18, 8192  }
 0x35d   : > { %3555 = vsyncadd (%p3367_p3), %s2808_s18, 4294959104  ;;  %s21_s30 = sadd.s32 1, %s3578_s30   ;;  %s5095_s2 = smov %s3562_s26 }
 0x35e   : > { %p18_p5 = scmp.ge.s32.totalorder %s21_s30, 4   ;;  %s5096_s26 = smov %s3566_s27 }
 0x35f   : > { %s5097_s27 = smov %s3683_s16  ;;  %s5098_s28 = smov %s3574_s29 }
 0x360   : > { %s5099_s29 = smov %s5101_s11  ;;  %20 = sbr.rel (!%p18_p5) target bundleno = 4 (0x4), region = 96 }
 0x365   :  { %2813 = vsyncpa [#allocation3], 1 }
 0x366   :  { %2815 = vsyncpa [#allocation3 + $0x1], 1 }

</bundles_post_ra>
